<compile_context>
chip_gen: v6e
topology: v6e:2x2x1
jax: 0.10.0
libtpu: 0.0.40
codegen_flags: <defaults>
</compile_context>

<pallas_src>
import functools
import math

import jax
import jax.numpy as jnp
from jax.experimental import pallas as pl
from jax.experimental.pallas import tpu as pltpu

EPS = 1e-5                      # matches PNA aggregate_std epsilon
MM_DTYPE = jnp.bfloat16         # MXU operand dtype (bf16-native on v5e/v6e/v7x)

# OGB feature vocab sizes (get_atom_feature_dims / get_bond_feature_dims)
ATOM_FEATURE_DIMS = [119, 5, 12, 12, 10, 6, 6, 2, 2]
BOND_FEATURE_DIMS = [5, 6, 2]


# ----------------------------- Pallas kernel --------------------------------

def _pna_fused_kernel(h0_ref, g_ref, e_ref,
                      w1_ref, w2_ref, w3_ref, bpre_ref,
                      wh_ref, wagg_ref, bpost_ref,
                      o_ref, *, n_layers, k_deg, n_nodes, hidden_dim):
    """All propagation_depth PNA layers in one kernel invocation (grid=())."""
    H, K, N = hidden_dim, k_deg, n_nodes
    inv_k = 1.0 / K

    g = g_ref[...]                     # (K*N, N)  bf16 one-hot source selector
    e = e_ref[...]                     # (K*N, H)  bf16 edge features (dst-grouped, slot-major)
    h = h0_ref[...]                    # (N, H)    f32 node features (stay resident as a value)

    for l in range(n_layers):          # fully unrolled: L=5, static
        hb = h.astype(MM_DTYPE)        # single cast per layer, reused by W1/W2/Wh

        # ---- pretrans, weight-split: msg = h_src@W1 + h_dst@W2 + e@W3 + b_pre ----
        h_w1 = jnp.dot(hb, w1_ref[l], preferred_element_type=jnp.float32)          # (N, H)
        dst_term = jnp.dot(hb, w2_ref[l], preferred_element_type=jnp.float32) \
            + bpre_ref[l]                                                           # (N, H)

        # batched on-chip gather of h_src rows (bf16 one-hot MXU matmul) + batched e@W3
        src_all = jnp.dot(g, h_w1.astype(MM_DTYPE),
                          preferred_element_type=jnp.float32)                       # (K*N, H)
        e_all = jnp.dot(e, w3_ref[l], preferred_element_type=jnp.float32)           # (K*N, H)
        msg_all = src_all + e_all                                                   # (K*N, H)

        # ---- per-destination aggregation over the K in-degree slots ----
        s = mx = mn = ssq = None
        for k in range(K):
            msg = msg_all[k * N:(k + 1) * N, :] + dst_term                          # (N, H)
            if k == 0:
                s, mx, mn, ssq = msg, msg, msg, msg * msg
            else:
                s = s + msg
                mx = jnp.maximum(mx, msg)
                mn = jnp.minimum(mn, msg)
                ssq = ssq + msg * msg

        mean = s * inv_k
        var = jnp.maximum(ssq * inv_k - mean * mean, 0.0)      # relu(E[x^2]-E[x]^2)
        std = jnp.sqrt(var + EPS)

        # ---- posttrans (degree scalers folded into wagg) + residual ----
        agg = jnp.concatenate([mean, mx, mn, std], axis=-1).astype(MM_DTYPE)        # (N, 4H)
        out = jnp.dot(hb, wh_ref[l], preferred_element_type=jnp.float32) + bpost_ref[l]
        out = out + jnp.dot(agg, wagg_ref[l], preferred_element_type=jnp.float32)
        h = h + out                                            # residual connection

    o_ref[...] = h


def pna_fused_layers(h0, g_flat, e_flat, stacked, k_deg, hidden_dim):
    n_nodes, H = h0.shape
    n_layers = stacked["w1"].shape[0]
    kern = functools.partial(_pna_fused_kernel, n_layers=n_layers, k_deg=k_deg,
                             n_nodes=n_nodes, hidden_dim=hidden_dim)
    vmem_spec = lambda: pl.BlockSpec(memory_space=pltpu.MemorySpace.VMEM)
    return pl.pallas_call(
        kern,
        out_shape=jax.ShapeDtypeStruct((n_nodes, H), jnp.float32),
        in_specs=[vmem_spec() for _ in range(10)],
        out_specs=vmem_spec(),
    )(h0, g_flat, e_flat,
      stacked["w1"], stacked["w2"], stacked["w3"], stacked["b_pre"],
      stacked["w_h"], stacked["w_agg"], stacked["b_post"])


# ----------------------------- parameters -----------------------------------

def xavier_uniform(key, shape):
    a = math.sqrt(6.0 / (shape[0] + shape[1]))
    return jax.random.uniform(key, shape, jnp.float32, -a, a)


def init_params(key, hidden_dim, random_vec_dim, propagation_depth,
                n_agg=4, n_scale=3):
    emb_dim = hidden_dim - random_vec_dim
    keys = iter(jax.random.split(key, 4 * propagation_depth
                                 + len(ATOM_FEATURE_DIMS) + len(BOND_FEATURE_DIMS)))
    params = {
        "atom_emb": [xavier_uniform(next(keys), (d, emb_dim)) for d in ATOM_FEATURE_DIMS],
        "bond_emb": [xavier_uniform(next(keys), (d, emb_dim)) for d in BOND_FEATURE_DIMS],
        "layers": [],
    }
    pre_in = 3 * hidden_dim                         # [h_src, h_dst, e_feat]
    post_in = (n_agg * n_scale + 1) * hidden_dim    # [h_old, scaled aggregations]
    for _ in range(propagation_depth):
        params["layers"].append({
            "w_pre": xavier_uniform(next(keys), (pre_in, hidden_dim)),
            "b_pre": jnp.zeros((hidden_dim,), jnp.float32),
            "w_post": xavier_uniform(next(keys), (post_in, hidden_dim)),
            "b_post": jnp.zeros((hidden_dim,), jnp.float32),
        })
    return params


def prepare_layer_stacks(params, hidden_dim, k_deg, n_agg=4):
    """Split w_pre into 3 blocks, fold the PNA degree scalers into w_post, stack per layer."""
    H = hidden_dim
    amp = math.log(k_deg + 1) / 1.0       # amplification: log(D+1)/avg_d['log'], avg_d['log']=1
    att = 1.0 / math.log(k_deg + 1)       # attenuation:   avg_d['log']/log(D+1)
    w1, w2, w3, bpre, wh, wagg, bpost = [], [], [], [], [], [], []
    for lp in params["layers"]:
        wp = lp["w_pre"]                  # (3H, H): rows [src | dst | edge]
        w1.append(wp[0:H]); w2.append(wp[H:2 * H]); w3.append(wp[2 * H:3 * H])
        bpre.append(lp["b_pre"].reshape(1, H))
        wq = lp["w_post"]                 # (13H, H): rows [h | id(4H) | amp(4H) | att(4H)]
        wh.append(wq[0:H])
        wagg.append(wq[H:(1 + n_agg) * H]
                    + amp * wq[(1 + n_agg) * H:(1 + 2 * n_agg) * H]
                    + att * wq[(1 + 2 * n_agg) * H:(1 + 3 * n_agg) * H])
        bpost.append(lp["b_post"].reshape(1, H))
    stk = lambda xs, dt: jnp.stack(xs).astype(dt)
    return {
        "w1": stk(w1, MM_DTYPE), "w2": stk(w2, MM_DTYPE), "w3": stk(w3, MM_DTYPE),
        "b_pre": stk(bpre, jnp.float32),
        "w_h": stk(wh, MM_DTYPE), "w_agg": stk(wagg, MM_DTYPE),
        "b_post": stk(bpost, jnp.float32),
    }


# ------------------------------ forward --------------------------------------

def _encode(params, rand_x, rand_edge, node_feat_cat, edge_feat_cat):
    # AtomEncoder / BondEncoder: sum of per-column embedding lookups (plain-JAX glue).
    atom_emb = sum(params["atom_emb"][i][node_feat_cat[:, i]]
                   for i in range(node_feat_cat.shape[1]))
    bond_emb = sum(params["bond_emb"][i][edge_feat_cat[:, i]]
                   for i in range(edge_feat_cat.shape[1]))
    h0 = jnp.concatenate([atom_emb, rand_x], axis=-1).astype(jnp.float32)    # (N, H)
    e = jnp.concatenate([bond_emb, rand_edge], axis=-1).astype(jnp.float32)  # (E, H)
    return h0, e


def pna_gnn_random_forward(params, rand_x, rand_edge, node_feat_cat, edge_feat_cat,
                           src, dst, k_deg, hidden_dim):
    h0, e = _encode(params, rand_x, rand_edge, node_feat_cat, edge_feat_cat)
    n_nodes, H = h0.shape
    assert H == hidden_dim
    # Edges are dst-grouped with uniform in-degree: edge n*k_deg + k targets node n
    # (dst is implied by that layout; kept as an argument for interface parity).
    del dst
    src_by_slot = src.reshape(n_nodes, k_deg).T                              # (K, N)
    # bf16 one-hot (0/1 exact) -> gather runs on the bf16 MXU path; flattened slot-major
    g_flat = jax.nn.one_hot(src_by_slot, n_nodes,
                            dtype=MM_DTYPE).reshape(k_deg * n_nodes, n_nodes)
    e_flat = (e.reshape(n_nodes, k_deg, H).transpose(1, 0, 2)
              .reshape(k_deg * n_nodes, H).astype(MM_DTYPE))

    stacked = prepare_layer_stacks(params, hidden_dim, k_deg)
    feat = pna_fused_layers(h0, g_flat, e_flat, stacked, k_deg, hidden_dim)
    return feat, None


# --------------------------- pure-JAX f32 reference ---------------------------

def pna_reference(params, rand_x, rand_edge, node_feat_cat, edge_feat_cat,
                  src, dst, k_deg, hidden_dim):
    h, e = _encode(params, rand_x, rand_edge, node_feat_cat, edge_feat_cat)
    n_nodes, H = h.shape
    amp = math.log(k_deg + 1)
    att = 1.0 / math.log(k_deg + 1)
    for lp in params["layers"]:
        z2 = jnp.concatenate([h[src], h[dst], e], axis=-1)                   # (E, 3H)
        msg = (z2 @ lp["w_pre"] + lp["b_pre"]).reshape(n_nodes, k_deg, H)
        mean = msg.mean(axis=1)
        mx = msg.max(axis=1)
        mn = msg.min(axis=1)
        var = jnp.maximum((msg * msg).mean(axis=1) - mean * mean, 0.0)
        std = jnp.sqrt(var + EPS)
        agg = jnp.concatenate([mean, mx, mn, std], axis=-1)
        cat = jnp.concatenate([h, agg, amp * agg, att * agg], axis=-1)       # (N, 13H)
        h = h + (cat @ lp["w_post"] + lp["b_post"])
    return h


# -------------------------------- main ----------------------------------------

if __name__ == "__main__":
    hidden_dim = 32
    random_vec_dim = 8
    propagation_depth = 5
    n_nodes = 64
    k_deg = 4                      # uniform in-degree
    n_edges = n_nodes * k_deg

    key = jax.random.PRNGKey(0)
    k1, k2, k3, k4, k5 = jax.random.split(key, 5)

    # synthetic graph: edge n*K + k has dst = n, src = (n + k + 1) % N
    dst = jnp.repeat(jnp.arange(n_nodes), k_deg)
    src = (dst + jnp.tile(jnp.arange(1, k_deg + 1), n_nodes)) % n_nodes

    node_feat_cat = jnp.stack(
        [jax.random.randint(jax.random.fold_in(k1, i), (n_nodes,), 0, d)
         for i, d in enumerate(ATOM_FEATURE_DIMS)], axis=1)
    edge_feat_cat = jnp.stack(
        [jax.random.randint(jax.random.fold_in(k2, i), (n_edges,), 0, d)
         for i, d in enumerate(BOND_FEATURE_DIMS)], axis=1)
    rand_x = jax.random.normal(k3, (n_nodes, random_vec_dim), jnp.float32)
    rand_edge = jax.random.normal(k4, (n_edges, random_vec_dim), jnp.float32)

    params = init_params(k5, hidden_dim, random_vec_dim, propagation_depth)

    feat, _ = pna_gnn_random_forward(params, rand_x, rand_edge, node_feat_cat,
                                     edge_feat_cat, src, dst, k_deg, hidden_dim)
    feat = jax.block_until_ready(feat)

    assert feat.shape == (n_nodes, hidden_dim)
    assert bool(jnp.all(jnp.isfinite(feat)))

    # tolerance check against a pure-JAX f32 reference (bf16 matmuls in the kernel)
    ref = pna_reference(params, rand_x, rand_edge, node_feat_cat, edge_feat_cat,
                        src, dst, k_deg, hidden_dim)
    err = float(jnp.max(jnp.abs(feat - ref)) / (jnp.max(jnp.abs(ref)) + 1e-6))
    assert err < 8e-2, f"kernel/reference mismatch: rel-max err {err:.4f}"

    print("KERNEL_OK")
</pallas_src>

<mosaic_0001>
module attributes {stable_mosaic.version = 11 : i64} {
  func.func @_pna_fused_kernel(%arg0: memref<64x32xf32, #tpu.memory_space<vmem>>, %arg1: memref<256x64xbf16, #tpu.memory_space<vmem>>, %arg2: memref<256x32xbf16, #tpu.memory_space<vmem>>, %arg3: memref<5x32x32xbf16, #tpu.memory_space<vmem>>, %arg4: memref<5x32x32xbf16, #tpu.memory_space<vmem>>, %arg5: memref<5x32x32xbf16, #tpu.memory_space<vmem>>, %arg6: memref<5x1x32xf32, #tpu.memory_space<vmem>>, %arg7: memref<5x32x32xbf16, #tpu.memory_space<vmem>>, %arg8: memref<5x128x32xbf16, #tpu.memory_space<vmem>>, %arg9: memref<5x1x32xf32, #tpu.memory_space<vmem>>, %arg10: memref<64x32xf32, #tpu.memory_space<vmem>>) attributes {dimension_semantics = [], scalar_prefetch = 0 : i64, scratch_operands = 0 : i64, tpu.core_type = #tpu.core_type<tc>} {
    %c0 = arith.constant 0 : index
    %c0_0 = arith.constant 0 : index
    %0 = vector.load %arg1[%c0, %c0_0] : memref<256x64xbf16, #tpu.memory_space<vmem>>, vector<256x64xbf16>
    %c0_1 = arith.constant 0 : index
    %c0_2 = arith.constant 0 : index
    %1 = vector.load %arg2[%c0_1, %c0_2] : memref<256x32xbf16, #tpu.memory_space<vmem>>, vector<256x32xbf16>
    %c0_3 = arith.constant 0 : index
    %c0_4 = arith.constant 0 : index
    %2 = vector.load %arg0[%c0_3, %c0_4] : memref<64x32xf32, #tpu.memory_space<vmem>>, vector<64x32xf32>
    %3 = arith.truncf %2 : vector<64x32xf32> to vector<64x32xbf16>
    %c0_5 = arith.constant 0 : index
    %c0_6 = arith.constant 0 : index
    %c0_7 = arith.constant 0 : index
    %4 = vector.load %arg3[%c0_5, %c0_6, %c0_7] : memref<5x32x32xbf16, #tpu.memory_space<vmem>>, vector<1x32x32xbf16>
    %5 = vector.shape_cast %4 : vector<1x32x32xbf16> to vector<32x32xbf16>
    %cst = arith.constant dense<0.000000e+00> : vector<64x32xf32>
    %6 = tpu.matmul %3, %5, %cst {dimension_numbers = #tpu.dot_dimension_numbers<[1], [0], [0], [1], [0, 0, 1, 1], [], []>} : vector<64x32xbf16>, vector<32x32xbf16>, vector<64x32xf32> -> vector<64x32xf32>
    %c0_8 = arith.constant 0 : index
    %c0_9 = arith.constant 0 : index
    %c0_10 = arith.constant 0 : index
    %7 = vector.load %arg4[%c0_8, %c0_9, %c0_10] : memref<5x32x32xbf16, #tpu.memory_space<vmem>>, vector<1x32x32xbf16>
    %8 = vector.shape_cast %7 : vector<1x32x32xbf16> to vector<32x32xbf16>
    %cst_11 = arith.constant dense<0.000000e+00> : vector<64x32xf32>
    %9 = tpu.matmul %3, %8, %cst_11 {dimension_numbers = #tpu.dot_dimension_numbers<[1], [0], [0], [1], [0, 0, 1, 1], [], []>} : vector<64x32xbf16>, vector<32x32xbf16>, vector<64x32xf32> -> vector<64x32xf32>
    %c0_12 = arith.constant 0 : index
    %c0_13 = arith.constant 0 : index
    %c0_14 = arith.constant 0 : index
    %10 = vector.load %arg6[%c0_12, %c0_13, %c0_14] : memref<5x1x32xf32, #tpu.memory_space<vmem>>, vector<1x1x32xf32>
    %11 = vector.shape_cast %10 : vector<1x1x32xf32> to vector<1x32xf32>
    %12 = vector.broadcast %11 : vector<1x32xf32> to vector<64x32xf32>
    %13 = arith.addf %9, %12 : vector<64x32xf32>
    %14 = arith.truncf %6 : vector<64x32xf32> to vector<64x32xbf16>
    %cst_15 = arith.constant dense<0.000000e+00> : vector<256x32xf32>
    %15 = tpu.matmul %0, %14, %cst_15 {dimension_numbers = #tpu.dot_dimension_numbers<[1], [0], [0], [1], [0, 0, 1, 1], [], []>} : vector<256x64xbf16>, vector<64x32xbf16>, vector<256x32xf32> -> vector<256x32xf32>
    %c0_16 = arith.constant 0 : index
    %c0_17 = arith.constant 0 : index
    %c0_18 = arith.constant 0 : index
    %16 = vector.load %arg5[%c0_16, %c0_17, %c0_18] : memref<5x32x32xbf16, #tpu.memory_space<vmem>>, vector<1x32x32xbf16>
    %17 = vector.shape_cast %16 : vector<1x32x32xbf16> to vector<32x32xbf16>
    %cst_19 = arith.constant dense<0.000000e+00> : vector<256x32xf32>
    %18 = tpu.matmul %1, %17, %cst_19 {dimension_numbers = #tpu.dot_dimension_numbers<[1], [0], [0], [1], [0, 0, 1, 1], [], []>} : vector<256x32xbf16>, vector<32x32xbf16>, vector<256x32xf32> -> vector<256x32xf32>
    %19 = arith.addf %15, %18 : vector<256x32xf32>
    %20 = vector.extract_strided_slice %19 {offsets = [0, 0], sizes = [64, 32], strides = [1, 1]} : vector<256x32xf32> to vector<64x32xf32>
    %21 = arith.addf %20, %13 : vector<64x32xf32>
    %22 = arith.mulf %21, %21 : vector<64x32xf32>
    %23 = vector.extract_strided_slice %19 {offsets = [64, 0], sizes = [64, 32], strides = [1, 1]} : vector<256x32xf32> to vector<64x32xf32>
    %24 = arith.addf %23, %13 : vector<64x32xf32>
    %25 = arith.addf %21, %24 : vector<64x32xf32>
    %26 = arith.maximumf %21, %24 : vector<64x32xf32>
    %27 = arith.minimumf %21, %24 : vector<64x32xf32>
    %28 = arith.mulf %24, %24 : vector<64x32xf32>
    %29 = arith.addf %22, %28 : vector<64x32xf32>
    %30 = vector.extract_strided_slice %19 {offsets = [128, 0], sizes = [64, 32], strides = [1, 1]} : vector<256x32xf32> to vector<64x32xf32>
    %31 = arith.addf %30, %13 : vector<64x32xf32>
    %32 = arith.addf %25, %31 : vector<64x32xf32>
    %33 = arith.maximumf %26, %31 : vector<64x32xf32>
    %34 = arith.minimumf %27, %31 : vector<64x32xf32>
    %35 = arith.mulf %31, %31 : vector<64x32xf32>
    %36 = arith.addf %29, %35 : vector<64x32xf32>
    %37 = vector.extract_strided_slice %19 {offsets = [192, 0], sizes = [64, 32], strides = [1, 1]} : vector<256x32xf32> to vector<64x32xf32>
    %38 = arith.addf %37, %13 : vector<64x32xf32>
    %39 = arith.addf %32, %38 : vector<64x32xf32>
    %40 = arith.maximumf %33, %38 : vector<64x32xf32>
    %41 = arith.minimumf %34, %38 : vector<64x32xf32>
    %42 = arith.mulf %38, %38 : vector<64x32xf32>
    %43 = arith.addf %36, %42 : vector<64x32xf32>
    %cst_20 = arith.constant 2.500000e-01 : f32
    %44 = vector.broadcast %cst_20 : f32 to vector<64x32xf32>
    %45 = arith.mulf %39, %44 : vector<64x32xf32>
    %cst_21 = arith.constant 2.500000e-01 : f32
    %46 = vector.broadcast %cst_21 : f32 to vector<64x32xf32>
    %47 = arith.mulf %43, %46 : vector<64x32xf32>
    %48 = arith.mulf %45, %45 : vector<64x32xf32>
    %49 = arith.subf %47, %48 : vector<64x32xf32>
    %cst_22 = arith.constant 0.000000e+00 : f32
    %50 = vector.broadcast %cst_22 : f32 to vector<64x32xf32>
    %51 = arith.maximumf %49, %50 : vector<64x32xf32>
    %cst_23 = arith.constant 9.99999974E-6 : f32
    %52 = vector.broadcast %cst_23 : f32 to vector<64x32xf32>
    %53 = arith.addf %51, %52 : vector<64x32xf32>
    %54 = math.sqrt %53 : vector<64x32xf32>
    %55 = tpu.concatenate %45, %40, %41, %54 in 1 : vector<64x32xf32>, vector<64x32xf32>, vector<64x32xf32>, vector<64x32xf32> -> vector<64x128xf32>
    %56 = arith.truncf %55 : vector<64x128xf32> to vector<64x128xbf16>
    %c0_24 = arith.constant 0 : index
    %c0_25 = arith.constant 0 : index
    %c0_26 = arith.constant 0 : index
    %57 = vector.load %arg7[%c0_24, %c0_25, %c0_26] : memref<5x32x32xbf16, #tpu.memory_space<vmem>>, vector<1x32x32xbf16>
    %58 = vector.shape_cast %57 : vector<1x32x32xbf16> to vector<32x32xbf16>
    %cst_27 = arith.constant dense<0.000000e+00> : vector<64x32xf32>
    %59 = tpu.matmul %3, %58, %cst_27 {dimension_numbers = #tpu.dot_dimension_numbers<[1], [0], [0], [1], [0, 0, 1, 1], [], []>} : vector<64x32xbf16>, vector<32x32xbf16>, vector<64x32xf32> -> vector<64x32xf32>
    %c0_28 = arith.constant 0 : index
    %c0_29 = arith.constant 0 : index
    %c0_30 = arith.constant 0 : index
    %60 = vector.load %arg9[%c0_28, %c0_29, %c0_30] : memref<5x1x32xf32, #tpu.memory_space<vmem>>, vector<1x1x32xf32>
    %61 = vector.shape_cast %60 : vector<1x1x32xf32> to vector<1x32xf32>
    %62 = vector.broadcast %61 : vector<1x32xf32> to vector<64x32xf32>
    %63 = arith.addf %59, %62 : vector<64x32xf32>
    %c0_31 = arith.constant 0 : index
    %c0_32 = arith.constant 0 : index
    %c0_33 = arith.constant 0 : index
    %64 = vector.load %arg8[%c0_31, %c0_32, %c0_33] : memref<5x128x32xbf16, #tpu.memory_space<vmem>>, vector<1x128x32xbf16>
    %65 = vector.shape_cast %64 : vector<1x128x32xbf16> to vector<128x32xbf16>
    %cst_34 = arith.constant dense<0.000000e+00> : vector<64x32xf32>
    %66 = tpu.matmul %56, %65, %cst_34 {dimension_numbers = #tpu.dot_dimension_numbers<[1], [0], [0], [1], [0, 0, 1, 1], [], []>} : vector<64x128xbf16>, vector<128x32xbf16>, vector<64x32xf32> -> vector<64x32xf32>
    %67 = arith.addf %63, %66 : vector<64x32xf32>
    %68 = arith.addf %2, %67 : vector<64x32xf32>
    %69 = arith.truncf %68 : vector<64x32xf32> to vector<64x32xbf16>
    %c1 = arith.constant 1 : index
    %c0_35 = arith.constant 0 : index
    %c0_36 = arith.constant 0 : index
    %70 = vector.load %arg3[%c1, %c0_35, %c0_36] : memref<5x32x32xbf16, #tpu.memory_space<vmem>>, vector<1x32x32xbf16>
    %71 = vector.shape_cast %70 : vector<1x32x32xbf16> to vector<32x32xbf16>
    %cst_37 = arith.constant dense<0.000000e+00> : vector<64x32xf32>
    %72 = tpu.matmul %69, %71, %cst_37 {dimension_numbers = #tpu.dot_dimension_numbers<[1], [0], [0], [1], [0, 0, 1, 1], [], []>} : vector<64x32xbf16>, vector<32x32xbf16>, vector<64x32xf32> -> vector<64x32xf32>
    %c1_38 = arith.constant 1 : index
    %c0_39 = arith.constant 0 : index
    %c0_40 = arith.constant 0 : index
    %73 = vector.load %arg4[%c1_38, %c0_39, %c0_40] : memref<5x32x32xbf16, #tpu.memory_space<vmem>>, vector<1x32x32xbf16>
    %74 = vector.shape_cast %73 : vector<1x32x32xbf16> to vector<32x32xbf16>
    %cst_41 = arith.constant dense<0.000000e+00> : vector<64x32xf32>
    %75 = tpu.matmul %69, %74, %cst_41 {dimension_numbers = #tpu.dot_dimension_numbers<[1], [0], [0], [1], [0, 0, 1, 1], [], []>} : vector<64x32xbf16>, vector<32x32xbf16>, vector<64x32xf32> -> vector<64x32xf32>
    %c1_42 = arith.constant 1 : index
    %c0_43 = arith.constant 0 : index
    %c0_44 = arith.constant 0 : index
    %76 = vector.load %arg6[%c1_42, %c0_43, %c0_44] : memref<5x1x32xf32, #tpu.memory_space<vmem>>, vector<1x1x32xf32>
    %77 = vector.shape_cast %76 : vector<1x1x32xf32> to vector<1x32xf32>
    %78 = vector.broadcast %77 : vector<1x32xf32> to vector<64x32xf32>
    %79 = arith.addf %75, %78 : vector<64x32xf32>
    %80 = arith.truncf %72 : vector<64x32xf32> to vector<64x32xbf16>
    %cst_45 = arith.constant dense<0.000000e+00> : vector<256x32xf32>
    %81 = tpu.matmul %0, %80, %cst_45 {dimension_numbers = #tpu.dot_dimension_numbers<[1], [0], [0], [1], [0, 0, 1, 1], [], []>} : vector<256x64xbf16>, vector<64x32xbf16>, vector<256x32xf32> -> vector<256x32xf32>
    %c1_46 = arith.constant 1 : index
    %c0_47 = arith.constant 0 : index
    %c0_48 = arith.constant 0 : index
    %82 = vector.load %arg5[%c1_46, %c0_47, %c0_48] : memref<5x32x32xbf16, #tpu.memory_space<vmem>>, vector<1x32x32xbf16>
    %83 = vector.shape_cast %82 : vector<1x32x32xbf16> to vector<32x32xbf16>
    %cst_49 = arith.constant dense<0.000000e+00> : vector<256x32xf32>
    %84 = tpu.matmul %1, %83, %cst_49 {dimension_numbers = #tpu.dot_dimension_numbers<[1], [0], [0], [1], [0, 0, 1, 1], [], []>} : vector<256x32xbf16>, vector<32x32xbf16>, vector<256x32xf32> -> vector<256x32xf32>
    %85 = arith.addf %81, %84 : vector<256x32xf32>
    %86 = vector.extract_strided_slice %85 {offsets = [0, 0], sizes = [64, 32], strides = [1, 1]} : vector<256x32xf32> to vector<64x32xf32>
    %87 = arith.addf %86, %79 : vector<64x32xf32>
    %88 = arith.mulf %87, %87 : vector<64x32xf32>
    %89 = vector.extract_strided_slice %85 {offsets = [64, 0], sizes = [64, 32], strides = [1, 1]} : vector<256x32xf32> to vector<64x32xf32>
    %90 = arith.addf %89, %79 : vector<64x32xf32>
    %91 = arith.addf %87, %90 : vector<64x32xf32>
    %92 = arith.maximumf %87, %90 : vector<64x32xf32>
    %93 = arith.minimumf %87, %90 : vector<64x32xf32>
    %94 = arith.mulf %90, %90 : vector<64x32xf32>
    %95 = arith.addf %88, %94 : vector<64x32xf32>
    %96 = vector.extract_strided_slice %85 {offsets = [128, 0], sizes = [64, 32], strides = [1, 1]} : vector<256x32xf32> to vector<64x32xf32>
    %97 = arith.addf %96, %79 : vector<64x32xf32>
    %98 = arith.addf %91, %97 : vector<64x32xf32>
    %99 = arith.maximumf %92, %97 : vector<64x32xf32>
    %100 = arith.minimumf %93, %97 : vector<64x32xf32>
    %101 = arith.mulf %97, %97 : vector<64x32xf32>
    %102 = arith.addf %95, %101 : vector<64x32xf32>
    %103 = vector.extract_strided_slice %85 {offsets = [192, 0], sizes = [64, 32], strides = [1, 1]} : vector<256x32xf32> to vector<64x32xf32>
    %104 = arith.addf %103, %79 : vector<64x32xf32>
    %105 = arith.addf %98, %104 : vector<64x32xf32>
    %106 = arith.maximumf %99, %104 : vector<64x32xf32>
    %107 = arith.minimumf %100, %104 : vector<64x32xf32>
    %108 = arith.mulf %104, %104 : vector<64x32xf32>
    %109 = arith.addf %102, %108 : vector<64x32xf32>
    %cst_50 = arith.constant 2.500000e-01 : f32
    %110 = vector.broadcast %cst_50 : f32 to vector<64x32xf32>
    %111 = arith.mulf %105, %110 : vector<64x32xf32>
    %cst_51 = arith.constant 2.500000e-01 : f32
    %112 = vector.broadcast %cst_51 : f32 to vector<64x32xf32>
    %113 = arith.mulf %109, %112 : vector<64x32xf32>
    %114 = arith.mulf %111, %111 : vector<64x32xf32>
    %115 = arith.subf %113, %114 : vector<64x32xf32>
    %cst_52 = arith.constant 0.000000e+00 : f32
    %116 = vector.broadcast %cst_52 : f32 to vector<64x32xf32>
    %117 = arith.maximumf %115, %116 : vector<64x32xf32>
    %cst_53 = arith.constant 9.99999974E-6 : f32
    %118 = vector.broadcast %cst_53 : f32 to vector<64x32xf32>
    %119 = arith.addf %117, %118 : vector<64x32xf32>
    %120 = math.sqrt %119 : vector<64x32xf32>
    %121 = tpu.concatenate %111, %106, %107, %120 in 1 : vector<64x32xf32>, vector<64x32xf32>, vector<64x32xf32>, vector<64x32xf32> -> vector<64x128xf32>
    %122 = arith.truncf %121 : vector<64x128xf32> to vector<64x128xbf16>
    %c1_54 = arith.constant 1 : index
    %c0_55 = arith.constant 0 : index
    %c0_56 = arith.constant 0 : index
    %123 = vector.load %arg7[%c1_54, %c0_55, %c0_56] : memref<5x32x32xbf16, #tpu.memory_space<vmem>>, vector<1x32x32xbf16>
    %124 = vector.shape_cast %123 : vector<1x32x32xbf16> to vector<32x32xbf16>
    %cst_57 = arith.constant dense<0.000000e+00> : vector<64x32xf32>
    %125 = tpu.matmul %69, %124, %cst_57 {dimension_numbers = #tpu.dot_dimension_numbers<[1], [0], [0], [1], [0, 0, 1, 1], [], []>} : vector<64x32xbf16>, vector<32x32xbf16>, vector<64x32xf32> -> vector<64x32xf32>
    %c1_58 = arith.constant 1 : index
    %c0_59 = arith.constant 0 : index
    %c0_60 = arith.constant 0 : index
    %126 = vector.load %arg9[%c1_58, %c0_59, %c0_60] : memref<5x1x32xf32, #tpu.memory_space<vmem>>, vector<1x1x32xf32>
    %127 = vector.shape_cast %126 : vector<1x1x32xf32> to vector<1x32xf32>
    %128 = vector.broadcast %127 : vector<1x32xf32> to vector<64x32xf32>
    %129 = arith.addf %125, %128 : vector<64x32xf32>
    %c1_61 = arith.constant 1 : index
    %c0_62 = arith.constant 0 : index
    %c0_63 = arith.constant 0 : index
    %130 = vector.load %arg8[%c1_61, %c0_62, %c0_63] : memref<5x128x32xbf16, #tpu.memory_space<vmem>>, vector<1x128x32xbf16>
    %131 = vector.shape_cast %130 : vector<1x128x32xbf16> to vector<128x32xbf16>
    %cst_64 = arith.constant dense<0.000000e+00> : vector<64x32xf32>
    %132 = tpu.matmul %122, %131, %cst_64 {dimension_numbers = #tpu.dot_dimension_numbers<[1], [0], [0], [1], [0, 0, 1, 1], [], []>} : vector<64x128xbf16>, vector<128x32xbf16>, vector<64x32xf32> -> vector<64x32xf32>
    %133 = arith.addf %129, %132 : vector<64x32xf32>
    %134 = arith.addf %68, %133 : vector<64x32xf32>
    %135 = arith.truncf %134 : vector<64x32xf32> to vector<64x32xbf16>
    %c2 = arith.constant 2 : index
    %c0_65 = arith.constant 0 : index
    %c0_66 = arith.constant 0 : index
    %136 = vector.load %arg3[%c2, %c0_65, %c0_66] : memref<5x32x32xbf16, #tpu.memory_space<vmem>>, vector<1x32x32xbf16>
    %137 = vector.shape_cast %136 : vector<1x32x32xbf16> to vector<32x32xbf16>
    %cst_67 = arith.constant dense<0.000000e+00> : vector<64x32xf32>
    %138 = tpu.matmul %135, %137, %cst_67 {dimension_numbers = #tpu.dot_dimension_numbers<[1], [0], [0], [1], [0, 0, 1, 1], [], []>} : vector<64x32xbf16>, vector<32x32xbf16>, vector<64x32xf32> -> vector<64x32xf32>
    %c2_68 = arith.constant 2 : index
    %c0_69 = arith.constant 0 : index
    %c0_70 = arith.constant 0 : index
    %139 = vector.load %arg4[%c2_68, %c0_69, %c0_70] : memref<5x32x32xbf16, #tpu.memory_space<vmem>>, vector<1x32x32xbf16>
    %140 = vector.shape_cast %139 : vector<1x32x32xbf16> to vector<32x32xbf16>
    %cst_71 = arith.constant dense<0.000000e+00> : vector<64x32xf32>
    %141 = tpu.matmul %135, %140, %cst_71 {dimension_numbers = #tpu.dot_dimension_numbers<[1], [0], [0], [1], [0, 0, 1, 1], [], []>} : vector<64x32xbf16>, vector<32x32xbf16>, vector<64x32xf32> -> vector<64x32xf32>
    %c2_72 = arith.constant 2 : index
    %c0_73 = arith.constant 0 : index
    %c0_74 = arith.constant 0 : index
    %142 = vector.load %arg6[%c2_72, %c0_73, %c0_74] : memref<5x1x32xf32, #tpu.memory_space<vmem>>, vector<1x1x32xf32>
    %143 = vector.shape_cast %142 : vector<1x1x32xf32> to vector<1x32xf32>
    %144 = vector.broadcast %143 : vector<1x32xf32> to vector<64x32xf32>
    %145 = arith.addf %141, %144 : vector<64x32xf32>
    %146 = arith.truncf %138 : vector<64x32xf32> to vector<64x32xbf16>
    %cst_75 = arith.constant dense<0.000000e+00> : vector<256x32xf32>
    %147 = tpu.matmul %0, %146, %cst_75 {dimension_numbers = #tpu.dot_dimension_numbers<[1], [0], [0], [1], [0, 0, 1, 1], [], []>} : vector<256x64xbf16>, vector<64x32xbf16>, vector<256x32xf32> -> vector<256x32xf32>
    %c2_76 = arith.constant 2 : index
    %c0_77 = arith.constant 0 : index
    %c0_78 = arith.constant 0 : index
    %148 = vector.load %arg5[%c2_76, %c0_77, %c0_78] : memref<5x32x32xbf16, #tpu.memory_space<vmem>>, vector<1x32x32xbf16>
    %149 = vector.shape_cast %148 : vector<1x32x32xbf16> to vector<32x32xbf16>
    %cst_79 = arith.constant dense<0.000000e+00> : vector<256x32xf32>
    %150 = tpu.matmul %1, %149, %cst_79 {dimension_numbers = #tpu.dot_dimension_numbers<[1], [0], [0], [1], [0, 0, 1, 1], [], []>} : vector<256x32xbf16>, vector<32x32xbf16>, vector<256x32xf32> -> vector<256x32xf32>
    %151 = arith.addf %147, %150 : vector<256x32xf32>
    %152 = vector.extract_strided_slice %151 {offsets = [0, 0], sizes = [64, 32], strides = [1, 1]} : vector<256x32xf32> to vector<64x32xf32>
    %153 = arith.addf %152, %145 : vector<64x32xf32>
    %154 = arith.mulf %153, %153 : vector<64x32xf32>
    %155 = vector.extract_strided_slice %151 {offsets = [64, 0], sizes = [64, 32], strides = [1, 1]} : vector<256x32xf32> to vector<64x32xf32>
    %156 = arith.addf %155, %145 : vector<64x32xf32>
    %157 = arith.addf %153, %156 : vector<64x32xf32>
    %158 = arith.maximumf %153, %156 : vector<64x32xf32>
    %159 = arith.minimumf %153, %156 : vector<64x32xf32>
    %160 = arith.mulf %156, %156 : vector<64x32xf32>
    %161 = arith.addf %154, %160 : vector<64x32xf32>
    %162 = vector.extract_strided_slice %151 {offsets = [128, 0], sizes = [64, 32], strides = [1, 1]} : vector<256x32xf32> to vector<64x32xf32>
    %163 = arith.addf %162, %145 : vector<64x32xf32>
    %164 = arith.addf %157, %163 : vector<64x32xf32>
    %165 = arith.maximumf %158, %163 : vector<64x32xf32>
    %166 = arith.minimumf %159, %163 : vector<64x32xf32>
    %167 = arith.mulf %163, %163 : vector<64x32xf32>
    %168 = arith.addf %161, %167 : vector<64x32xf32>
    %169 = vector.extract_strided_slice %151 {offsets = [192, 0], sizes = [64, 32], strides = [1, 1]} : vector<256x32xf32> to vector<64x32xf32>
    %170 = arith.addf %169, %145 : vector<64x32xf32>
    %171 = arith.addf %164, %170 : vector<64x32xf32>
    %172 = arith.maximumf %165, %170 : vector<64x32xf32>
    %173 = arith.minimumf %166, %170 : vector<64x32xf32>
    %174 = arith.mulf %170, %170 : vector<64x32xf32>
    %175 = arith.addf %168, %174 : vector<64x32xf32>
    %cst_80 = arith.constant 2.500000e-01 : f32
    %176 = vector.broadcast %cst_80 : f32 to vector<64x32xf32>
    %177 = arith.mulf %171, %176 : vector<64x32xf32>
    %cst_81 = arith.constant 2.500000e-01 : f32
    %178 = vector.broadcast %cst_81 : f32 to vector<64x32xf32>
    %179 = arith.mulf %175, %178 : vector<64x32xf32>
    %180 = arith.mulf %177, %177 : vector<64x32xf32>
    %181 = arith.subf %179, %180 : vector<64x32xf32>
    %cst_82 = arith.constant 0.000000e+00 : f32
    %182 = vector.broadcast %cst_82 : f32 to vector<64x32xf32>
    %183 = arith.maximumf %181, %182 : vector<64x32xf32>
    %cst_83 = arith.constant 9.99999974E-6 : f32
    %184 = vector.broadcast %cst_83 : f32 to vector<64x32xf32>
    %185 = arith.addf %183, %184 : vector<64x32xf32>
    %186 = math.sqrt %185 : vector<64x32xf32>
    %187 = tpu.concatenate %177, %172, %173, %186 in 1 : vector<64x32xf32>, vector<64x32xf32>, vector<64x32xf32>, vector<64x32xf32> -> vector<64x128xf32>
    %188 = arith.truncf %187 : vector<64x128xf32> to vector<64x128xbf16>
    %c2_84 = arith.constant 2 : index
    %c0_85 = arith.constant 0 : index
    %c0_86 = arith.constant 0 : index
    %189 = vector.load %arg7[%c2_84, %c0_85, %c0_86] : memref<5x32x32xbf16, #tpu.memory_space<vmem>>, vector<1x32x32xbf16>
    %190 = vector.shape_cast %189 : vector<1x32x32xbf16> to vector<32x32xbf16>
    %cst_87 = arith.constant dense<0.000000e+00> : vector<64x32xf32>
    %191 = tpu.matmul %135, %190, %cst_87 {dimension_numbers = #tpu.dot_dimension_numbers<[1], [0], [0], [1], [0, 0, 1, 1], [], []>} : vector<64x32xbf16>, vector<32x32xbf16>, vector<64x32xf32> -> vector<64x32xf32>
    %c2_88 = arith.constant 2 : index
    %c0_89 = arith.constant 0 : index
    %c0_90 = arith.constant 0 : index
    %192 = vector.load %arg9[%c2_88, %c0_89, %c0_90] : memref<5x1x32xf32, #tpu.memory_space<vmem>>, vector<1x1x32xf32>
    %193 = vector.shape_cast %192 : vector<1x1x32xf32> to vector<1x32xf32>
    %194 = vector.broadcast %193 : vector<1x32xf32> to vector<64x32xf32>
    %195 = arith.addf %191, %194 : vector<64x32xf32>
    %c2_91 = arith.constant 2 : index
    %c0_92 = arith.constant 0 : index
    %c0_93 = arith.constant 0 : index
    %196 = vector.load %arg8[%c2_91, %c0_92, %c0_93] : memref<5x128x32xbf16, #tpu.memory_space<vmem>>, vector<1x128x32xbf16>
    %197 = vector.shape_cast %196 : vector<1x128x32xbf16> to vector<128x32xbf16>
    %cst_94 = arith.constant dense<0.000000e+00> : vector<64x32xf32>
    %198 = tpu.matmul %188, %197, %cst_94 {dimension_numbers = #tpu.dot_dimension_numbers<[1], [0], [0], [1], [0, 0, 1, 1], [], []>} : vector<64x128xbf16>, vector<128x32xbf16>, vector<64x32xf32> -> vector<64x32xf32>
    %199 = arith.addf %195, %198 : vector<64x32xf32>
    %200 = arith.addf %134, %199 : vector<64x32xf32>
    %201 = arith.truncf %200 : vector<64x32xf32> to vector<64x32xbf16>
    %c3 = arith.constant 3 : index
    %c0_95 = arith.constant 0 : index
    %c0_96 = arith.constant 0 : index
    %202 = vector.load %arg3[%c3, %c0_95, %c0_96] : memref<5x32x32xbf16, #tpu.memory_space<vmem>>, vector<1x32x32xbf16>
    %203 = vector.shape_cast %202 : vector<1x32x32xbf16> to vector<32x32xbf16>
    %cst_97 = arith.constant dense<0.000000e+00> : vector<64x32xf32>
    %204 = tpu.matmul %201, %203, %cst_97 {dimension_numbers = #tpu.dot_dimension_numbers<[1], [0], [0], [1], [0, 0, 1, 1], [], []>} : vector<64x32xbf16>, vector<32x32xbf16>, vector<64x32xf32> -> vector<64x32xf32>
    %c3_98 = arith.constant 3 : index
    %c0_99 = arith.constant 0 : index
    %c0_100 = arith.constant 0 : index
    %205 = vector.load %arg4[%c3_98, %c0_99, %c0_100] : memref<5x32x32xbf16, #tpu.memory_space<vmem>>, vector<1x32x32xbf16>
    %206 = vector.shape_cast %205 : vector<1x32x32xbf16> to vector<32x32xbf16>
    %cst_101 = arith.constant dense<0.000000e+00> : vector<64x32xf32>
    %207 = tpu.matmul %201, %206, %cst_101 {dimension_numbers = #tpu.dot_dimension_numbers<[1], [0], [0], [1], [0, 0, 1, 1], [], []>} : vector<64x32xbf16>, vector<32x32xbf16>, vector<64x32xf32> -> vector<64x32xf32>
    %c3_102 = arith.constant 3 : index
    %c0_103 = arith.constant 0 : index
    %c0_104 = arith.constant 0 : index
    %208 = vector.load %arg6[%c3_102, %c0_103, %c0_104] : memref<5x1x32xf32, #tpu.memory_space<vmem>>, vector<1x1x32xf32>
    %209 = vector.shape_cast %208 : vector<1x1x32xf32> to vector<1x32xf32>
    %210 = vector.broadcast %209 : vector<1x32xf32> to vector<64x32xf32>
    %211 = arith.addf %207, %210 : vector<64x32xf32>
    %212 = arith.truncf %204 : vector<64x32xf32> to vector<64x32xbf16>
    %cst_105 = arith.constant dense<0.000000e+00> : vector<256x32xf32>
    %213 = tpu.matmul %0, %212, %cst_105 {dimension_numbers = #tpu.dot_dimension_numbers<[1], [0], [0], [1], [0, 0, 1, 1], [], []>} : vector<256x64xbf16>, vector<64x32xbf16>, vector<256x32xf32> -> vector<256x32xf32>
    %c3_106 = arith.constant 3 : index
    %c0_107 = arith.constant 0 : index
    %c0_108 = arith.constant 0 : index
    %214 = vector.load %arg5[%c3_106, %c0_107, %c0_108] : memref<5x32x32xbf16, #tpu.memory_space<vmem>>, vector<1x32x32xbf16>
    %215 = vector.shape_cast %214 : vector<1x32x32xbf16> to vector<32x32xbf16>
    %cst_109 = arith.constant dense<0.000000e+00> : vector<256x32xf32>
    %216 = tpu.matmul %1, %215, %cst_109 {dimension_numbers = #tpu.dot_dimension_numbers<[1], [0], [0], [1], [0, 0, 1, 1], [], []>} : vector<256x32xbf16>, vector<32x32xbf16>, vector<256x32xf32> -> vector<256x32xf32>
    %217 = arith.addf %213, %216 : vector<256x32xf32>
    %218 = vector.extract_strided_slice %217 {offsets = [0, 0], sizes = [64, 32], strides = [1, 1]} : vector<256x32xf32> to vector<64x32xf32>
    %219 = arith.addf %218, %211 : vector<64x32xf32>
    %220 = arith.mulf %219, %219 : vector<64x32xf32>
    %221 = vector.extract_strided_slice %217 {offsets = [64, 0], sizes = [64, 32], strides = [1, 1]} : vector<256x32xf32> to vector<64x32xf32>
    %222 = arith.addf %221, %211 : vector<64x32xf32>
    %223 = arith.addf %219, %222 : vector<64x32xf32>
    %224 = arith.maximumf %219, %222 : vector<64x32xf32>
    %225 = arith.minimumf %219, %222 : vector<64x32xf32>
    %226 = arith.mulf %222, %222 : vector<64x32xf32>
    %227 = arith.addf %220, %226 : vector<64x32xf32>
    %228 = vector.extract_strided_slice %217 {offsets = [128, 0], sizes = [64, 32], strides = [1, 1]} : vector<256x32xf32> to vector<64x32xf32>
    %229 = arith.addf %228, %211 : vector<64x32xf32>
    %230 = arith.addf %223, %229 : vector<64x32xf32>
    %231 = arith.maximumf %224, %229 : vector<64x32xf32>
    %232 = arith.minimumf %225, %229 : vector<64x32xf32>
    %233 = arith.mulf %229, %229 : vector<64x32xf32>
    %234 = arith.addf %227, %233 : vector<64x32xf32>
    %235 = vector.extract_strided_slice %217 {offsets = [192, 0], sizes = [64, 32], strides = [1, 1]} : vector<256x32xf32> to vector<64x32xf32>
    %236 = arith.addf %235, %211 : vector<64x32xf32>
    %237 = arith.addf %230, %236 : vector<64x32xf32>
    %238 = arith.maximumf %231, %236 : vector<64x32xf32>
    %239 = arith.minimumf %232, %236 : vector<64x32xf32>
    %240 = arith.mulf %236, %236 : vector<64x32xf32>
    %241 = arith.addf %234, %240 : vector<64x32xf32>
    %cst_110 = arith.constant 2.500000e-01 : f32
    %242 = vector.broadcast %cst_110 : f32 to vector<64x32xf32>
    %243 = arith.mulf %237, %242 : vector<64x32xf32>
    %cst_111 = arith.constant 2.500000e-01 : f32
    %244 = vector.broadcast %cst_111 : f32 to vector<64x32xf32>
    %245 = arith.mulf %241, %244 : vector<64x32xf32>
    %246 = arith.mulf %243, %243 : vector<64x32xf32>
    %247 = arith.subf %245, %246 : vector<64x32xf32>
    %cst_112 = arith.constant 0.000000e+00 : f32
    %248 = vector.broadcast %cst_112 : f32 to vector<64x32xf32>
    %249 = arith.maximumf %247, %248 : vector<64x32xf32>
    %cst_113 = arith.constant 9.99999974E-6 : f32
    %250 = vector.broadcast %cst_113 : f32 to vector<64x32xf32>
    %251 = arith.addf %249, %250 : vector<64x32xf32>
    %252 = math.sqrt %251 : vector<64x32xf32>
    %253 = tpu.concatenate %243, %238, %239, %252 in 1 : vector<64x32xf32>, vector<64x32xf32>, vector<64x32xf32>, vector<64x32xf32> -> vector<64x128xf32>
    %254 = arith.truncf %253 : vector<64x128xf32> to vector<64x128xbf16>
    %c3_114 = arith.constant 3 : index
    %c0_115 = arith.constant 0 : index
    %c0_116 = arith.constant 0 : index
    %255 = vector.load %arg7[%c3_114, %c0_115, %c0_116] : memref<5x32x32xbf16, #tpu.memory_space<vmem>>, vector<1x32x32xbf16>
    %256 = vector.shape_cast %255 : vector<1x32x32xbf16> to vector<32x32xbf16>
    %cst_117 = arith.constant dense<0.000000e+00> : vector<64x32xf32>
    %257 = tpu.matmul %201, %256, %cst_117 {dimension_numbers = #tpu.dot_dimension_numbers<[1], [0], [0], [1], [0, 0, 1, 1], [], []>} : vector<64x32xbf16>, vector<32x32xbf16>, vector<64x32xf32> -> vector<64x32xf32>
    %c3_118 = arith.constant 3 : index
    %c0_119 = arith.constant 0 : index
    %c0_120 = arith.constant 0 : index
    %258 = vector.load %arg9[%c3_118, %c0_119, %c0_120] : memref<5x1x32xf32, #tpu.memory_space<vmem>>, vector<1x1x32xf32>
    %259 = vector.shape_cast %258 : vector<1x1x32xf32> to vector<1x32xf32>
    %260 = vector.broadcast %259 : vector<1x32xf32> to vector<64x32xf32>
    %261 = arith.addf %257, %260 : vector<64x32xf32>
    %c3_121 = arith.constant 3 : index
    %c0_122 = arith.constant 0 : index
    %c0_123 = arith.constant 0 : index
    %262 = vector.load %arg8[%c3_121, %c0_122, %c0_123] : memref<5x128x32xbf16, #tpu.memory_space<vmem>>, vector<1x128x32xbf16>
    %263 = vector.shape_cast %262 : vector<1x128x32xbf16> to vector<128x32xbf16>
    %cst_124 = arith.constant dense<0.000000e+00> : vector<64x32xf32>
    %264 = tpu.matmul %254, %263, %cst_124 {dimension_numbers = #tpu.dot_dimension_numbers<[1], [0], [0], [1], [0, 0, 1, 1], [], []>} : vector<64x128xbf16>, vector<128x32xbf16>, vector<64x32xf32> -> vector<64x32xf32>
    %265 = arith.addf %261, %264 : vector<64x32xf32>
    %266 = arith.addf %200, %265 : vector<64x32xf32>
    %267 = arith.truncf %266 : vector<64x32xf32> to vector<64x32xbf16>
    %c4 = arith.constant 4 : index
    %c0_125 = arith.constant 0 : index
    %c0_126 = arith.constant 0 : index
    %268 = vector.load %arg3[%c4, %c0_125, %c0_126] : memref<5x32x32xbf16, #tpu.memory_space<vmem>>, vector<1x32x32xbf16>
    %269 = vector.shape_cast %268 : vector<1x32x32xbf16> to vector<32x32xbf16>
    %cst_127 = arith.constant dense<0.000000e+00> : vector<64x32xf32>
    %270 = tpu.matmul %267, %269, %cst_127 {dimension_numbers = #tpu.dot_dimension_numbers<[1], [0], [0], [1], [0, 0, 1, 1], [], []>} : vector<64x32xbf16>, vector<32x32xbf16>, vector<64x32xf32> -> vector<64x32xf32>
    %c4_128 = arith.constant 4 : index
    %c0_129 = arith.constant 0 : index
    %c0_130 = arith.constant 0 : index
    %271 = vector.load %arg4[%c4_128, %c0_129, %c0_130] : memref<5x32x32xbf16, #tpu.memory_space<vmem>>, vector<1x32x32xbf16>
    %272 = vector.shape_cast %271 : vector<1x32x32xbf16> to vector<32x32xbf16>
    %cst_131 = arith.constant dense<0.000000e+00> : vector<64x32xf32>
    %273 = tpu.matmul %267, %272, %cst_131 {dimension_numbers = #tpu.dot_dimension_numbers<[1], [0], [0], [1], [0, 0, 1, 1], [], []>} : vector<64x32xbf16>, vector<32x32xbf16>, vector<64x32xf32> -> vector<64x32xf32>
    %c4_132 = arith.constant 4 : index
    %c0_133 = arith.constant 0 : index
    %c0_134 = arith.constant 0 : index
    %274 = vector.load %arg6[%c4_132, %c0_133, %c0_134] : memref<5x1x32xf32, #tpu.memory_space<vmem>>, vector<1x1x32xf32>
    %275 = vector.shape_cast %274 : vector<1x1x32xf32> to vector<1x32xf32>
    %276 = vector.broadcast %275 : vector<1x32xf32> to vector<64x32xf32>
    %277 = arith.addf %273, %276 : vector<64x32xf32>
    %278 = arith.truncf %270 : vector<64x32xf32> to vector<64x32xbf16>
    %cst_135 = arith.constant dense<0.000000e+00> : vector<256x32xf32>
    %279 = tpu.matmul %0, %278, %cst_135 {dimension_numbers = #tpu.dot_dimension_numbers<[1], [0], [0], [1], [0, 0, 1, 1], [], []>} : vector<256x64xbf16>, vector<64x32xbf16>, vector<256x32xf32> -> vector<256x32xf32>
    %c4_136 = arith.constant 4 : index
    %c0_137 = arith.constant 0 : index
    %c0_138 = arith.constant 0 : index
    %280 = vector.load %arg5[%c4_136, %c0_137, %c0_138] : memref<5x32x32xbf16, #tpu.memory_space<vmem>>, vector<1x32x32xbf16>
    %281 = vector.shape_cast %280 : vector<1x32x32xbf16> to vector<32x32xbf16>
    %cst_139 = arith.constant dense<0.000000e+00> : vector<256x32xf32>
    %282 = tpu.matmul %1, %281, %cst_139 {dimension_numbers = #tpu.dot_dimension_numbers<[1], [0], [0], [1], [0, 0, 1, 1], [], []>} : vector<256x32xbf16>, vector<32x32xbf16>, vector<256x32xf32> -> vector<256x32xf32>
    %283 = arith.addf %279, %282 : vector<256x32xf32>
    %284 = vector.extract_strided_slice %283 {offsets = [0, 0], sizes = [64, 32], strides = [1, 1]} : vector<256x32xf32> to vector<64x32xf32>
    %285 = arith.addf %284, %277 : vector<64x32xf32>
    %286 = arith.mulf %285, %285 : vector<64x32xf32>
    %287 = vector.extract_strided_slice %283 {offsets = [64, 0], sizes = [64, 32], strides = [1, 1]} : vector<256x32xf32> to vector<64x32xf32>
    %288 = arith.addf %287, %277 : vector<64x32xf32>
    %289 = arith.addf %285, %288 : vector<64x32xf32>
    %290 = arith.maximumf %285, %288 : vector<64x32xf32>
    %291 = arith.minimumf %285, %288 : vector<64x32xf32>
    %292 = arith.mulf %288, %288 : vector<64x32xf32>
    %293 = arith.addf %286, %292 : vector<64x32xf32>
    %294 = vector.extract_strided_slice %283 {offsets = [128, 0], sizes = [64, 32], strides = [1, 1]} : vector<256x32xf32> to vector<64x32xf32>
    %295 = arith.addf %294, %277 : vector<64x32xf32>
    %296 = arith.addf %289, %295 : vector<64x32xf32>
    %297 = arith.maximumf %290, %295 : vector<64x32xf32>
    %298 = arith.minimumf %291, %295 : vector<64x32xf32>
    %299 = arith.mulf %295, %295 : vector<64x32xf32>
    %300 = arith.addf %293, %299 : vector<64x32xf32>
    %301 = vector.extract_strided_slice %283 {offsets = [192, 0], sizes = [64, 32], strides = [1, 1]} : vector<256x32xf32> to vector<64x32xf32>
    %302 = arith.addf %301, %277 : vector<64x32xf32>
    %303 = arith.addf %296, %302 : vector<64x32xf32>
    %304 = arith.maximumf %297, %302 : vector<64x32xf32>
    %305 = arith.minimumf %298, %302 : vector<64x32xf32>
    %306 = arith.mulf %302, %302 : vector<64x32xf32>
    %307 = arith.addf %300, %306 : vector<64x32xf32>
    %cst_140 = arith.constant 2.500000e-01 : f32
    %308 = vector.broadcast %cst_140 : f32 to vector<64x32xf32>
    %309 = arith.mulf %303, %308 : vector<64x32xf32>
    %cst_141 = arith.constant 2.500000e-01 : f32
    %310 = vector.broadcast %cst_141 : f32 to vector<64x32xf32>
    %311 = arith.mulf %307, %310 : vector<64x32xf32>
    %312 = arith.mulf %309, %309 : vector<64x32xf32>
    %313 = arith.subf %311, %312 : vector<64x32xf32>
    %cst_142 = arith.constant 0.000000e+00 : f32
    %314 = vector.broadcast %cst_142 : f32 to vector<64x32xf32>
    %315 = arith.maximumf %313, %314 : vector<64x32xf32>
    %cst_143 = arith.constant 9.99999974E-6 : f32
    %316 = vector.broadcast %cst_143 : f32 to vector<64x32xf32>
    %317 = arith.addf %315, %316 : vector<64x32xf32>
    %318 = math.sqrt %317 : vector<64x32xf32>
    %319 = tpu.concatenate %309, %304, %305, %318 in 1 : vector<64x32xf32>, vector<64x32xf32>, vector<64x32xf32>, vector<64x32xf32> -> vector<64x128xf32>
    %320 = arith.truncf %319 : vector<64x128xf32> to vector<64x128xbf16>
    %c4_144 = arith.constant 4 : index
    %c0_145 = arith.constant 0 : index
    %c0_146 = arith.constant 0 : index
    %321 = vector.load %arg7[%c4_144, %c0_145, %c0_146] : memref<5x32x32xbf16, #tpu.memory_space<vmem>>, vector<1x32x32xbf16>
    %322 = vector.shape_cast %321 : vector<1x32x32xbf16> to vector<32x32xbf16>
    %cst_147 = arith.constant dense<0.000000e+00> : vector<64x32xf32>
    %323 = tpu.matmul %267, %322, %cst_147 {dimension_numbers = #tpu.dot_dimension_numbers<[1], [0], [0], [1], [0, 0, 1, 1], [], []>} : vector<64x32xbf16>, vector<32x32xbf16>, vector<64x32xf32> -> vector<64x32xf32>
    %c4_148 = arith.constant 4 : index
    %c0_149 = arith.constant 0 : index
    %c0_150 = arith.constant 0 : index
    %324 = vector.load %arg9[%c4_148, %c0_149, %c0_150] : memref<5x1x32xf32, #tpu.memory_space<vmem>>, vector<1x1x32xf32>
    %325 = vector.shape_cast %324 : vector<1x1x32xf32> to vector<1x32xf32>
    %326 = vector.broadcast %325 : vector<1x32xf32> to vector<64x32xf32>
    %327 = arith.addf %323, %326 : vector<64x32xf32>
    %c4_151 = arith.constant 4 : index
    %c0_152 = arith.constant 0 : index
    %c0_153 = arith.constant 0 : index
    %328 = vector.load %arg8[%c4_151, %c0_152, %c0_153] : memref<5x128x32xbf16, #tpu.memory_space<vmem>>, vector<1x128x32xbf16>
    %329 = vector.shape_cast %328 : vector<1x128x32xbf16> to vector<128x32xbf16>
    %cst_154 = arith.constant dense<0.000000e+00> : vector<64x32xf32>
    %330 = tpu.matmul %320, %329, %cst_154 {dimension_numbers = #tpu.dot_dimension_numbers<[1], [0], [0], [1], [0, 0, 1, 1], [], []>} : vector<64x128xbf16>, vector<128x32xbf16>, vector<64x32xf32> -> vector<64x32xf32>
    %331 = arith.addf %327, %330 : vector<64x32xf32>
    %332 = arith.addf %266, %331 : vector<64x32xf32>
    %c0_155 = arith.constant 0 : index
    %c0_156 = arith.constant 0 : index
    %333 = vector.load %arg10[%c0_155, %c0_156] : memref<64x32xf32, #tpu.memory_space<vmem>>, vector<64x32xf32>
    tpu.vector_store %arg10[%c0_155, %c0_156], %332 {strides = array<i32>} : memref<64x32xf32, #tpu.memory_space<vmem>>, vector<64x32xf32>,
    return
  }
}

</mosaic_0001>

<bundles_post_ra>
// kernel: tpu_custom_call.1
= control target key start
LH: loop header
LB: loop body
LE: loop exit
PB: predicated region body
PF: predicated region fallthrough
CT: control target
= control target key end

     0   :  { %vm128_vm0 = vcmask 261120   ;;  %vm683_vm1 = vcmask 523264   ;;  %s8276_s25 = smov 64   ;;  %s8277_s26 = smov 32   ;;  %s12151_s3 = inlined_call_operand.vmem [shape: bf16[5,32,32], index: 3, kind: input, shape index: {}]   ;;  %s12152_s0 = inlined_call_operand.vmem [shape: f32[64,32], index: 0, kind: input, shape index: {}]   ;;  %s12153_s4 = inlined_call_operand.vmem [shape: bf16[5,32,32], index: 4, kind: input, shape index: {}]   ;;  %s12154_s5 = inlined_call_operand.vmem [shape: bf16[5,32,32], index: 5, kind: input, shape index: {}]   ;;  %s12155_s2 = inlined_call_operand.vmem [shape: bf16[256,32], index: 2, kind: input, shape index: {}]   ;;  %s12156_s1 = inlined_call_operand.vmem [shape: bf16[256,64], index: 1, kind: input, shape index: {}]   ;;  %s12157_s7 = inlined_call_operand.vmem [shape: bf16[5,32,32], index: 7, kind: input, shape index: {}]   ;;  %s12158_s8 = inlined_call_operand.vmem [shape: bf16[5,128,32], index: 8, kind: input, shape index: {}]   ;;  %s12159_s6 = inlined_call_operand.vmem [shape: f32[5,1,32], index: 6, kind: input, shape index: {}]   ;;  %s12160_s9 = inlined_call_operand.vmem [shape: f32[5,1,32], index: 9, kind: input, shape index: {}]   ;;  %s12161_s10 = inlined_call_operand.vmem [shape: f32[64,32], index: 10, kind: output, shape index: {}]  }
   0x1   :  { %v7948_v0 = vld [vmem:[%s12151_s3 + $0x8] sm:$0xff]   ;;  %v7949_v1 = vld [vmem:[%s12151_s3] sm:$0xff]   ;;  %v102_v5 = vld [vmem:[%s12152_s0 + $0x10] sm:$0xff]  ;;  %s8278_s29 = smov 96  }
   0x2   :  { %6965 = vmatprep.subr.bf16.mxu0 %v7948_v0  ;;  %v100_v2 = vld [vmem:[%s12152_s0] sm:$0xff]  ;;  %v101_v3 = vld [vmem:[%s12152_s0 + $0x8] sm:$0xff]  ;;  %v103_v6 = vld [vmem:[%s12152_s0 + $0x18] sm:$0xff] }
   0x3   :  { %6966 = vmatpush3.bf16.msra.mxu0 %v7948_v0  ;;  %v8346_v4 = vpack.c.bf16 %v101_v3, %v100_v2  ;;  %v104_v7 = vld [vmem:[%s12152_s0 + $0x20] sm:$0xff]  ;;  %v105_v8 = vld [vmem:[%s12152_s0 + $0x28] sm:$0xff]  ;;  %v8364_v9 = vpack.c.bf16 %v103_v6, %v102_v5  ;;  %v106_v11 = vld [vmem:[%s12152_s0 + $0x30] sm:$0xff] }
   0x4   :  { %6967 = vmatprep.subr.bf16.mxu0 %v7949_v1  ;;  %v8366_v10 = vpack.c.bf16 %v105_v8, %v104_v7  ;;  %v107_v12 = vld [vmem:[%s12152_s0 + $0x38] sm:$0xff]  ;;  %v7950_v14 = vld [vmem:[%s12153_s4 + $0x8] sm:$0xff]   ;;  %v7951_v15 = vld [vmem:[%s12153_s4] sm:$0xff]  }
   0x5   :  { %6969 = vmatprep.mubr.msk.bf16.mxu0 %vm128_vm0, %v8346_v4  ;;  %6981 = vmatprep.mubr.msk.bf16.mxu1 %vm128_vm0, %v8346_v4  ;;  %12225 = vst [vmem:[#allocation2_spill] sm:$0xff] %v8364_v9  ;;  %v8378_v13 = vpack.c.bf16 %v107_v12, %v106_v11  ;;  %v7952_v16 = vld [vmem:[%s12154_s5 + $0x8] sm:$0xff]   ;;  %v7953_v17 = vld [vmem:[%s12154_s5] sm:$0xff]   ;;  %v7958_v21 = vld [vmem:[%s12155_s2 + $0x10] sm:$0xff]  }
   0x6   :  { %12226 = vst [vmem:[#allocation3_spill] sm:$0xff] %v8366_v10  ;;  %6977 = vmatprep.subr.bf16.mxu1 %v7950_v14  ;;  %v7954_v18 = vld [vmem:[%s12155_s2] sm:$0xff]   ;;  %v7955_v19 = vld [vmem:[%s12155_s2 + $0x8] sm:$0xff]   ;;  %v7959_v22 = vld [vmem:[%s12155_s2 + $0x18] sm:$0xff]  }
   0x7   :  { %6968 = vmatpush3.bf16.msra.mxu0 %v7949_v1  ;;  %12227 = vst [vmem:[#allocation4_spill] sm:$0xff] %v8378_v13  ;;  %6978 = vmatpush3.bf16.msra.mxu1 %v7950_v14  ;;  %v7956_v20 = vld [vmem:[%s12156_s1] sm:$0xff]   ;;  %v7963_v24 = vld [vmem:[%s12155_s2 + $0x28] sm:$0xff]   ;;  %v7966_v25 = vld [vmem:[%s12155_s2 + $0x30] sm:$0xff]  }
   0x8   :  { %6979 = vmatprep.subr.bf16.mxu1 %v7951_v15  ;;  %6989 = vmatprep.subr.bf16.mxu0 %v7952_v16  ;;  %v7962_v23 = vld [vmem:[%s12155_s2 + $0x20] sm:$0xff]   ;;  %v7967_v26 = vld [vmem:[%s12155_s2 + $0x38] sm:$0xff]   ;;  %v7971_v28 = vld [vmem:[%s12155_s2 + $0x48] sm:$0xff]  }
   0x9   :  { %v7970_v27 = vld [vmem:[%s12155_s2 + $0x40] sm:$0xff]   ;;  %v7974_v29 = vld [vmem:[%s12155_s2 + $0x50] sm:$0xff]   ;;  %v7975_v30 = vld [vmem:[%s12155_s2 + $0x58] sm:$0xff]  }
   0xa   :  { %6970 = vmatmul.mubr.msk.bf16.vlgmr.msra.gmra.mxu0 %vm128_vm0, %v8364_v9  ;;  %v7978_v31 = vld [vmem:[%s12155_s2 + $0x60] sm:$0xff]   ;;  %v7979_v32 = vld [vmem:[%s12155_s2 + $0x68] sm:$0xff]   ;;  %v7982_v33 = vld [vmem:[%s12155_s2 + $0x70] sm:$0xff]  }
   0xb   :  { %6973 = vmatprep.mubr.msk.bf16.mxu0 %vm128_vm0, %v8366_v10  ;;  %6980 = vmatpush3.bf16.msra.mxu1 %v7951_v15  ;;  %v7983_v34 = vld [vmem:[%s12155_s2 + $0x78] sm:$0xff]   ;;  %v7957_v47 = vld [vmem:[%s12156_s1 + $0x8] sm:$0xff]   ;;  %v7960_v48 = vld [vmem:[%s12156_s1 + $0x10] sm:$0xff]  }
   0xc   :  { %6990 = vmatpush3.bf16.msra.mxu0 %v7952_v16  ;;  %v7961_v49 = vld [vmem:[%s12156_s1 + $0x18] sm:$0xff]   ;;  %v7964_v50 = vld [vmem:[%s12156_s1 + $0x20] sm:$0xff]   ;;  %v7965_v51 = vld [vmem:[%s12156_s1 + $0x28] sm:$0xff]  }
   0xd   :  { %6991 = vmatprep.subr.bf16.mxu0 %v7953_v17  ;;  %v7968_v52 = vld [vmem:[%s12156_s1 + $0x30] sm:$0xff]   ;;  %v7969_v53 = vld [vmem:[%s12156_s1 + $0x38] sm:$0xff]   ;;  %v7972_v54 = vld [vmem:[%s12156_s1 + $0x40] sm:$0xff]  }
   0xe   :  { %6982 = vmatmul.mubr.msk.bf16.vlgmr.msra.gmra.mxu1 %vm128_vm0, %v8364_v9  ;;  %v7973_v55 = vld [vmem:[%s12156_s1 + $0x48] sm:$0xff]   ;;  %v7976_v56 = vld [vmem:[%s12156_s1 + $0x50] sm:$0xff]   ;;  %v7977_v57 = vld [vmem:[%s12156_s1 + $0x58] sm:$0xff]  }
   0xf   :  { %6985 = vmatprep.mubr.msk.bf16.mxu1 %vm128_vm0, %v8366_v10  ;;  %v7980_v58 = vld [vmem:[%s12156_s1 + $0x60] sm:$0xff]   ;;  %v7981_v59 = vld [vmem:[%s12156_s1 + $0x68] sm:$0xff]   ;;  %v7984_v60 = vld [vmem:[%s12156_s1 + $0x70] sm:$0xff]  }
  0x10   :  { %6992 = vmatpush3.bf16.msra.mxu0 %v7953_v17  ;;  %v7985_v61 = vld [vmem:[%s12156_s1 + $0x78] sm:$0xff]   ;;  %v7986_v16 = vld [vmem:[%s12157_s7 + $0x8] sm:$0xff]  }
  0x11   :  { %v7987_v17 = vld [vmem:[%s12158_s8 + $0x38] sm:$0xff]   ;;  %7065 = vmatprep.subr.bf16.mxu0 %v7986_v16 }
  0x12   :  { %6974 = vmatmul.mubr.msk.bf16.gmra.mxu0 %vm128_vm0, %v8378_v13 }
  0x13   :  { %6993 = vmatprep.mubr.msk.bf16.mxu0 %vm128_vm0, %v7954_v18  ;;  %v7988_v18 = vld [vmem:[%s12158_s8 + $0x30] sm:$0xff]  }
  0x16   :  { %6986 = vmatmul.mubr.msk.bf16.gmra.mxu1 %vm128_vm0, %v8378_v13 }
  0x17   :  { %7033 = vmatprep.mubr.msk.bf16.mxu1 %vm683_vm1, %v7956_v20 }
  0x1a   :  { %6994 = vmatmul.mubr.msk.bf16.vlgmr.msra.gmra.mxu0 %vm128_vm0, %v7955_v19 }
  0x1b   :  { %6997 = vmatprep.mubr.msk.bf16.mxu0 %vm128_vm0, %v7958_v21  ;;  %7066 = vmatpush3.bf16.msra.mxu0 %v7986_v16  ;;  %v7989_v21 = vld [vmem:[%s12158_s8 + $0x28] sm:$0xff]  }
  0x22   :  { %6998 = vmatmul.mubr.msk.bf16.gmra.mxu0 %vm128_vm0, %v7959_v22  ;;  %v7990_v22 = vld [vmem:[%s12158_s8 + $0x20] sm:$0xff]  }
  0x23   :  { %7001 = vmatprep.mubr.msk.bf16.mxu0 %vm128_vm0, %v7962_v23 }
  0x2a   :  { %7002 = vmatmul.mubr.msk.bf16.gmra.mxu0 %vm128_vm0, %v7963_v24 }
  0x2b   :  { %7005 = vmatprep.mubr.msk.bf16.mxu0 %vm128_vm0, %v7966_v25 }
  0x32   :  { %7006 = vmatmul.mubr.msk.bf16.gmra.mxu0 %vm128_vm0, %v7967_v26 }
  0x33   :  { %7009 = vmatprep.mubr.msk.bf16.mxu0 %vm128_vm0, %v7970_v27 }
  0x3a   :  { %7010 = vmatmul.mubr.msk.bf16.gmra.mxu0 %vm128_vm0, %v7971_v28 }
  0x3b   :  { %7013 = vmatprep.mubr.msk.bf16.mxu0 %vm128_vm0, %v7974_v29 }
  0x42   :  { %7014 = vmatmul.mubr.msk.bf16.gmra.mxu0 %vm128_vm0, %v7975_v30 }
  0x43   :  { %7017 = vmatprep.mubr.msk.bf16.mxu0 %vm128_vm0, %v7978_v31 }
  0x4a   :  { %7018 = vmatmul.mubr.msk.bf16.gmra.mxu0 %vm128_vm0, %v7979_v32 }
  0x4b   :  { %7021 = vmatprep.mubr.msk.bf16.mxu0 %vm128_vm0, %v7982_v33 }
  0x52   :  { %7022 = vmatmul.mubr.msk.bf16.gmra.mxu0 %vm128_vm0, %v7983_v34 }
  0x53   :  { %7069 = vmatprep.mubr.msk.bf16.mxu0 %vm128_vm0, %v8346_v4 }
  0xca   :  { %v6971_v35 = vpop.f32.mrf.mxu0 }
  0xcc   :  { %v175_v36 = vpop.f32.mrf.mxu0 }
  0xce   :  { %v6972_v37 = vpop.f32.mrf.mxu0  ;;  %v6983_v5 = vpop.f32.mrf.mxu1 }
  0xcf   :  { %v295_v45 = vpack.c.bf16 %v6972_v37, %v6971_v35 }
  0xd0   :  { %v178_v38 = vpop.f32.mrf.mxu0  ;;  %v263_v7 = vpop.f32.mrf.mxu1 }
  0xd1   :  { %v294_v46 = vpack.c.bf16 %v178_v38, %v175_v36 }
  0xd2   :  { %v6975_v39 = vpop.f32.mrf.mxu0  ;;  %v6984_v11 = vpop.f32.mrf.mxu1 }
  0xd4   :  { %v191_v40 = vpop.f32.mrf.mxu0  ;;  %v266_v14 = vpop.f32.mrf.mxu1 }
  0xd6   :  { %v6976_v41 = vpop.f32.mrf.mxu0  ;;  %v6987_v19 = vpop.f32.mrf.mxu1 }
  0xd7   :  { %v297_v42 = vpack.c.bf16 %v6976_v41, %v6975_v39  ;;  %v6153_v39 = vld [vmem:[%s12159_s6] ss:$0 sm:$0xff] }
  0xd8   :  { %v194_v43 = vpop.f32.mrf.mxu0  ;;  %v279_v23 = vpop.f32.mrf.mxu1 }
  0xd9   :  { %v296_v44 = vpack.c.bf16 %v194_v43, %v191_v40  ;;  %7025 = vmatprep.subr.bf16.mxu1 %v297_v42 }
  0xda   :  { %7026 = vmatpush3.bf16.msra.mxu1 %v297_v42  ;;  %v6995_v62 = vpop.f32.mrf.mxu0  ;;  %v6988_v25 = vpop.f32.mrf.mxu1 }
  0xdb   :  { %7027 = vmatprep.subr.bf16.mxu1 %v296_v44 }
  0xdc   :  { %v476_v63 = vpop.f32.mrf.mxu0  ;;  %v282_v27 = vpop.f32.mrf.mxu1 }
  0xde   :  { %7028 = vmatpush3.bf16.msra.mxu1 %v296_v44  ;;  %v6996_v0 = vpop.f32.mrf.mxu0 }
  0xdf   :  { %7029 = vmatprep.subr.bf16.mxu1 %v295_v45 }
  0xe0   :  { %v479_v1 = vpop.f32.mrf.mxu0 }
  0xe2   :  { %7030 = vmatpush3.bf16.msra.mxu1 %v295_v45  ;;  %v8530_v2 = vpop.f32.mrf.mxu0  ;;  %v8576_v45 = vadd.f32 %v6983_v5, %v6153_v39 }
  0xe3   :  { %7031 = vmatprep.subr.bf16.mxu1 %v294_v46 }
  0xe4   :  { %v8532_v3 = vpop.f32.mrf.mxu0 }
  0xe6   :  { %7032 = vmatpush3.bf16.msra.mxu1 %v294_v46  ;;  %v8534_v4 = vpop.f32.mrf.mxu0 }
  0xe7   :  { %7077 = vmatprep.subr.bf16.mxu1 %v7987_v17 }
  0xe8   :  { %v8536_v6 = vpop.f32.mrf.mxu0 }
  0xe9   :  { %7034 = vmatmul.mubr.msk.bf16.vlgmr.msra.gmra.mxu1 %vm683_vm1, %v7957_v47 }
  0xea   :  { %7037 = vmatprep.mubr.msk.bf16.mxu1 %vm683_vm1, %v7960_v48  ;;  %v7003_v8 = vpop.f32.mrf.mxu0  ;;  %7078 = vmatpush3.bf16.msra.mxu1 %v7987_v17 }
  0xeb   :  { %7079 = vmatprep.subr.bf16.mxu1 %v7988_v18 }
  0xec   :  { %v508_v12 = vpop.f32.mrf.mxu0 }
  0xee   :  { %v8538_v15 = vpop.f32.mrf.mxu0  ;;  %7080 = vmatpush3.bf16.msra.mxu1 %v7988_v18 }
  0xef   :  { %7081 = vmatprep.subr.bf16.mxu1 %v7989_v21 }
  0xf0   :  { %v8549_v20 = vpop.f32.mrf.mxu0 }
  0xf1   :  { %7038 = vmatmul.mubr.msk.bf16.gmra.mxu1 %vm683_vm1, %v7961_v49  ;;  %v8578_v49 = vadd.f32 %v6153_v39, %v263_v7 }
  0xf2   :  { %7041 = vmatprep.mubr.msk.bf16.mxu1 %vm683_vm1, %v7964_v50  ;;  %v8557_v24 = vpop.f32.mrf.mxu0  ;;  %7082 = vmatpush3.bf16.msra.mxu1 %v7989_v21  ;;  %v8580_v50 = vadd.f32 %v6984_v11, %v6153_v39 }
  0xf3   :  { %7083 = vmatprep.subr.bf16.mxu1 %v7990_v22 }
  0xf4   :  { %v8559_v26 = vpop.f32.mrf.mxu0 }
  0xf6   :  { %v8561_v28 = vpop.f32.mrf.mxu0  ;;  %7084 = vmatpush3.bf16.msra.mxu1 %v7990_v22 }
  0xf8   :  { %v8563_v31 = vpop.f32.mrf.mxu0 }
  0xf9   :  { %7042 = vmatmul.mubr.msk.bf16.gmra.mxu1 %vm683_vm1, %v7965_v51 }
  0xfa   :  { %7045 = vmatprep.mubr.msk.bf16.mxu1 %vm683_vm1, %v7968_v52  ;;  %v8565_v34 = vpop.f32.mrf.mxu0 }
  0xfc   :  { %v8567_v37 = vpop.f32.mrf.mxu0 }
  0xfe   :  { %v8572_v41 = vpop.f32.mrf.mxu0 }
 0x100   :  { %v8574_v44 = vpop.f32.mrf.mxu0 }
 0x101   :  { %7046 = vmatmul.mubr.msk.bf16.gmra.mxu1 %vm683_vm1, %v7969_v53 }
 0x102   :  { %7049 = vmatprep.mubr.msk.bf16.mxu1 %vm683_vm1, %v7972_v54  ;;  %v8582_v54 = vadd.f32 %v6153_v39, %v266_v14 }
 0x109   :  { %7050 = vmatmul.mubr.msk.bf16.gmra.mxu1 %vm683_vm1, %v7973_v55 }
 0x10a   :  { %7053 = vmatprep.mubr.msk.bf16.mxu1 %vm683_vm1, %v7976_v56 }
 0x111   :  { %7054 = vmatmul.mubr.msk.bf16.gmra.mxu1 %vm683_vm1, %v7977_v57 }
 0x112   :  { %7057 = vmatprep.mubr.msk.bf16.mxu1 %vm683_vm1, %v7980_v58  ;;  %v8587_v58 = vadd.f32 %v6987_v19, %v6153_v39 }
 0x119   :  { %7058 = vmatmul.mubr.msk.bf16.gmra.mxu1 %vm683_vm1, %v7981_v59  ;;  %v8589_v59 = vadd.f32 %v6153_v39, %v279_v23 }
 0x11a   :  { %7061 = vmatprep.mubr.msk.bf16.mxu1 %vm683_vm1, %v7984_v60 }
 0x121   :  { %7062 = vmatmul.mubr.msk.bf16.gmra.mxu1 %vm683_vm1, %v7985_v61 }
 0x1a9   :  { %v7035_v29 = vpop.f32.mrf.mxu1 }
 0x1aa   :  { %v775_v46 = vadd.f32 %v7035_v29, %v6995_v62 }
 0x1ab   :  { %v766_v30 = vpop.f32.mrf.mxu1 }
 0x1ac   :  { %v767_v47 = vadd.f32 %v766_v30, %v476_v63  ;;  %v8592_v63 = vpop.f32.mrf.mxu0 }
 0x1ad   :  { %v7036_v32 = vpop.f32.mrf.mxu1 }
 0x1ae   :  { %v778_v51 = vadd.f32 %v7036_v32, %v6996_v0  ;;  %v8594_v0 = vadd.f32 %v6988_v25, %v6153_v39 }
 0x1af   :  { %v769_v33 = vpop.f32.mrf.mxu1 }
 0x1b0   :  { %v770_v52 = vadd.f32 %v769_v33, %v479_v1  ;;  %v8597_v1 = vadd.f32 %v775_v46, %v8576_v45  ;;  %v8608_v5 = vadd.f32 %v778_v51, %v8580_v50 }
 0x1b1   :  { %v7039_v35 = vpop.f32.mrf.mxu1 }
 0x1b2   :  { %v791_v55 = vadd.f32 %v7039_v35, %v8530_v2  ;;  %v8600_v2 = vadd.f32 %v767_v47, %v8578_v49  ;;  %v903_v21 = vmul.f32 %v8597_v1, %v8597_v1 }
 0x1b3   :  { %v782_v36 = vpop.f32.mrf.mxu1 }
 0x1b4   :  { %v783_v56 = vadd.f32 %v782_v36, %v8532_v3  ;;  %v8615_v11 = vadd.f32 %v791_v55, %v8587_v58  ;;  %v901_v22 = vmul.f32 %v8600_v2, %v8600_v2 }
 0x1b5   :  { %v7040_v38 = vpop.f32.mrf.mxu1 }
 0x1b6   :  { %v794_v57 = vadd.f32 %v7040_v38, %v8534_v4  ;;  %v8605_v4 = vadd.f32 %v6153_v39, %v282_v27  ;;  %12228 = vst [vmem:[#allocation5_spill] sm:$0xff] %v8615_v11  ;;  %v904_v27 = vmul.f32 %v8608_v5, %v8608_v5  ;;  %v907_v33 = vmul.f32 %v8615_v11, %v8615_v11 }
 0x1b7   :  { %v785_v40 = vpop.f32.mrf.mxu1 }
 0x1b8   :  { %v786_v60 = vadd.f32 %v785_v40, %v8536_v6  ;;  %v8611_v6 = vadd.f32 %v770_v52, %v8582_v54  ;;  %v8621_v14 = vadd.f32 %v794_v57, %v8594_v0 }
 0x1b9   :  { %v7043_v42 = vpop.f32.mrf.mxu1 }
 0x1ba   :  { %v807_v48 = vadd.f32 %v7043_v42, %v7003_v8  ;;  %12230 = vst [vmem:[#allocation7_spill] sm:$0xff] %v8621_v14  ;;  %v8624_v16 = vadd.f32 %v786_v60, %v8605_v4 }
 0x1bb   :  { %v798_v43 = vpop.f32.mrf.mxu1 }
 0x1bc   :  { %v799_v61 = vadd.f32 %v798_v43, %v508_v12  ;;  %v8603_v3 = vadd.f32 %v807_v48, %v8576_v45  ;;  %v8618_v12 = vadd.f32 %v783_v56, %v8589_v59  ;;  %12231 = vst [vmem:[#allocation8_spill] sm:$0xff] %v8624_v16  ;;  %v8656_v38 = vmul.f32 %v8624_v16, %v8624_v16 }
 0x1bd   :  { %v7044_v53 = vpop.f32.mrf.mxu1 }
 0x1be   :  { %v810_v7 = vadd.f32 %v7044_v53, %v8538_v15  ;;  %12229 = vst [vmem:[#allocation6_spill] sm:$0xff] %v8618_v12  ;;  %v8627_v17 = vadd.f32 %v799_v61, %v8578_v49  ;;  %v8630_v15 = vpop.f32.mrf.mxu0  ;;  %v943_v23 = vmul.f32 %v8603_v3, %v8603_v3  ;;  %v905_v35 = vmul.f32 %v8618_v12, %v8618_v12 }
 0x1bf   :  { %v801_v62 = vpop.f32.mrf.mxu1  ;;  %v8660_v39 = vadd.f32 %v8603_v3, %v8597_v1  ;;  %v935_v47 = vmin.f32 %v8597_v1, %v8603_v3  ;;  %v927_v48 = vmax.f32 %v8597_v1, %v8603_v3 }
 0x1c0   :  { %v802_v18 = vadd.f32 %v801_v62, %v8549_v20  ;;  %v902_v20 = vmul.f32 %v8611_v6, %v8611_v6  ;;  %v8644_v29 = vadd.f32 %v810_v7, %v8580_v50  ;;  %v8667_v43 = vpop.f32.mrf.mxu0  ;;  %v951_v46 = vadd.f32 %v943_v23, %v903_v21 }
 0x1c1   :  { %v7047_v8 = vpop.f32.mrf.mxu1  ;;  %v917_v51 = vadd.f32 %v8627_v17, %v8600_v2  ;;  %v933_v61 = vmin.f32 %v8600_v2, %v8627_v17 }
 0x1c2   :  { %v823_v25 = vadd.f32 %v7047_v8, %v8557_v24  ;;  %v908_v24 = vmul.f32 %v8621_v14, %v8621_v14  ;;  %v8665_v40 = vadd.f32 %v802_v18, %v8582_v54  ;;  %v944_v52 = vmul.f32 %v8644_v29, %v8644_v29  ;;  %v8696_v8 = vpop.f32.mrf.mxu0 }
 0x1c3   :  { %v814_v19 = vpop.f32.mrf.mxu1  ;;  %v920_v3 = vadd.f32 %v8644_v29, %v8608_v5  ;;  %v936_v18 = vmin.f32 %v8608_v5, %v8644_v29 }
 0x1c4   :  { %v815_v30 = vadd.f32 %v814_v19, %v8559_v26  ;;  %v941_v26 = vmul.f32 %v8627_v17, %v8627_v17  ;;  %v942_v7 = vmul.f32 %v8665_v40, %v8665_v40  ;;  %v952_v23 = vadd.f32 %v944_v52, %v904_v27 }
 0x1c5   :  { %v7048_v32 = vpop.f32.mrf.mxu1 }
 0x1c6   :  { %v826_v36 = vadd.f32 %v7048_v32, %v8561_v28  ;;  %v8670_v28 = vadd.f32 %v823_v25, %v8587_v58  ;;  %v8681_v53 = vadd.f32 %v815_v30, %v8589_v59  ;;  %v949_v1 = vadd.f32 %v941_v26, %v901_v22 }
 0x1c7   :  { %v817_v42 = vpop.f32.mrf.mxu1  ;;  %v928_v22 = vmax.f32 %v8608_v5, %v8644_v29  ;;  %v918_v25 = vadd.f32 %v8665_v40, %v8611_v6  ;;  %v926_v5 = vmax.f32 %v8611_v6, %v8665_v40  ;;  %v950_v27 = vadd.f32 %v942_v7, %v902_v20 }
 0x1c8   :  { %12232 = vst [vmem:[#allocation9_spill] sm:$0xff] %v8670_v28  ;;  %12233 = vst [vmem:[#allocation10_spill] sm:$0xff] %v8681_v53  ;;  %v818_v55 = vadd.f32 %v817_v42, %v8563_v31  ;;  %v8685_v57 = vadd.f32 %v826_v36, %v8594_v0  ;;  %v945_v30 = vmul.f32 %v8681_v53, %v8681_v53 }
 0x1c9   :  { %v7051_v56 = vpop.f32.mrf.mxu1  ;;  %v923_v29 = vadd.f32 %v8670_v28, %v8615_v11 }
 0x1ca   :  { %12234 = vst [vmem:[#allocation11_spill] sm:$0xff] %v8685_v57  ;;  %v839_v60 = vadd.f32 %v7051_v56, %v8565_v34  ;;  %v947_v34 = vmul.f32 %v8670_v28, %v8670_v28  ;;  %v8703_v19 = vadd.f32 %v818_v55, %v8605_v4  ;;  %v948_v26 = vmul.f32 %v8685_v57, %v8685_v57  ;;  %v7019_v56 = vpop.f32.mrf.mxu0 }
 0x1cb   :  { %v830_v31 = vpop.f32.mrf.mxu1  ;;  %v953_v20 = vadd.f32 %v945_v30, %v905_v35 }
 0x1cc   :  { %12235 = vst [vmem:[#allocation12_spill] sm:$0xff] %v8703_v19  ;;  %v831_v21 = vadd.f32 %v830_v31, %v8567_v37  ;;  %v959_v32 = vadd.f32 %v839_v60, %v8576_v45  ;;  %v934_v37 = vmin.f32 %v8611_v6, %v8665_v40  ;;  %v931_v60 = vmax.f32 %v8615_v11, %v8670_v28 }
 0x1cd   :  { %v7052_v36 = vpop.f32.mrf.mxu1  ;;  %v955_v31 = vadd.f32 %v947_v34, %v907_v33  ;;  %v929_v6 = vmax.f32 %v8618_v12, %v8681_v53  ;;  %v924_v11 = vadd.f32 %v8685_v57, %v8621_v14  ;;  %v956_v33 = vadd.f32 %v948_v26, %v908_v24 }
 0x1ce   :  { %v842_v42 = vadd.f32 %v7052_v36, %v8572_v41  ;;  %v957_v52 = vadd.f32 %v831_v21, %v8578_v49  ;;  %v921_v41 = vadd.f32 %v8681_v53, %v8618_v12  ;;  %v946_v36 = vmul.f32 %v8703_v19, %v8703_v19 }
 0x1cf   :  { %v833_v55 = vpop.f32.mrf.mxu1  ;;  %v991_v40 = vmul.f32 %v959_v32, %v959_v32  ;;  %v932_v28 = vmax.f32 %v8621_v14, %v8685_v57  ;;  %v922_v13 = vadd.f32 %v8703_v19, %v8624_v16  ;;  %v967_v24 = vadd.f32 %v959_v32, %v8660_v39 }
 0x1d0   :  { %v960_v7 = vadd.f32 %v842_v42, %v8580_v50  ;;  %v834_v21 = vadd.f32 %v833_v55, %v8574_v44  ;;  %v989_v12 = vmul.f32 %v957_v52, %v957_v52  ;;  %v572_v42 = vpop.f32.mrf.mxu0  ;;  %v930_v44 = vmax.f32 %v8624_v16, %v8703_v19 }
 0x1d1   :  { %v7055_v62 = vpop.f32.mrf.mxu1  ;;  %v954_v55 = vadd.f32 %v946_v36, %v8656_v38  ;;  %v999_v26 = vadd.f32 %v991_v40, %v951_v46  ;;  %v8749_v57 = vmin.f32 %v935_v47, %v959_v32  ;;  %v965_v10 = vadd.f32 %v957_v52, %v917_v51 }
 0x1d2   :  { %v855_v34 = vadd.f32 %v7055_v62, %v8592_v63  ;;  %v958_v35 = vadd.f32 %v834_v21, %v8582_v54  ;;  %v992_v53 = vmul.f32 %v960_v7, %v960_v7  ;;  %v8751_v21 = vmax.f32 %v927_v48, %v959_v32  ;;  %v7020_v19 = vpop.f32.mrf.mxu0 }
 0x1d3   :  { %v846_v30 = vpop.f32.mrf.mxu1  ;;  %v8757_v36 = vmin.f32 %v933_v61, %v957_v52  ;;  %v997_v39 = vadd.f32 %v989_v12, %v949_v1  ;;  %v12236_v46 = vmax.f32 %v8600_v2, %v8627_v17  ;;  %v8769_v32 = vmin.f32 %v936_v18, %v960_v7 }
 0x1d4   :  { %v8746_v63 = vadd.f32 %v855_v34, %v8587_v58  ;;  %v847_v62 = vadd.f32 %v846_v30, %v8630_v15  ;;  %v968_v34 = vadd.f32 %v960_v7, %v920_v3  ;;  %v990_v16 = vmul.f32 %v958_v35, %v958_v35 }
 0x1d5   :  { %v7056_v14 = vpop.f32.mrf.mxu1  ;;  %v8762_v47 = vmax.f32 %v12236_v46, %v957_v52  ;;  %v1000_v12 = vadd.f32 %v992_v53, %v952_v23  ;;  %v8779_v52 = vmin.f32 %v934_v37, %v958_v35  ;;  %v8781_v40 = vmax.f32 %v926_v5, %v958_v35  ;;  %v575_v23 = vpop.f32.mrf.mxu0 }
 0x1d6   :  { %v8754_v9 = vadd.f32 %v847_v62, %v8589_v59  ;;  %v858_v38 = vadd.f32 %v7056_v14, %v8667_v43  ;;  %v995_v48 = vmul.f32 %v8746_v63, %v8746_v63  ;;  %v8771_v14 = vmax.f32 %v928_v22, %v960_v7 }
 0x1d7   :  { %v849_v15 = vpop.f32.mrf.mxu1  ;;  %v966_v43 = vadd.f32 %v958_v35, %v918_v25  ;;  %v8777_v17 = vadd.f32 %v8746_v63, %v923_v29  ;;  %v998_v18 = vadd.f32 %v990_v16, %v950_v27 }
 0x1d8   :  { %v8767_v51 = vadd.f32 %v858_v38, %v8594_v0  ;;  %v993_v61 = vmul.f32 %v8754_v9, %v8754_v9  ;;  %v850_v1 = vadd.f32 %v849_v15, %v8696_v8  ;;  %v8789_v8 = vmax.f32 %v931_v60, %v8746_v63 }
 0x1d9   :  { %v7059_v2 = vpop.f32.mrf.mxu1  ;;  %v8791_v7 = vadd.f32 %v995_v48, %v955_v31  ;;  %v969_v29 = vadd.f32 %v8754_v9, %v921_v41  ;;  %v8805_v60 = vmax.f32 %v929_v6, %v8754_v9 }
 0x1da   :  { %v871_v3 = vadd.f32 %v7059_v2, %v7019_v56  ;;  %v996_v22 = vmul.f32 %v8767_v51, %v8767_v51  ;;  %v8786_v53 = vadd.f32 %v850_v1, %v8605_v4  ;;  %v8797_v16 = vadd.f32 %v993_v61, %v953_v20 }
 0x1db   :  { %v862_v25 = vpop.f32.mrf.mxu1  ;;  %v8800_v27 = vadd.f32 %v8767_v51, %v924_v11  ;;  %v8819_v38 = vmax.f32 %v932_v28, %v8767_v51 }
 0x1dc   :  { %v8795_v37 = vadd.f32 %v871_v3, %v8576_v45  ;;  %v863_v5 = vadd.f32 %v862_v25, %v572_v42  ;;  %v994_v56 = vmul.f32 %v8786_v53, %v8786_v53  ;;  %v8813_v30 = vadd.f32 %v996_v22, %v956_v33  ;;  %v7023_v42 = vpop.f32.mrf.mxu0 }
 0x1dd   :  { %v7060_v35 = vpop.f32.mrf.mxu1  ;;  %v8816_v11 = vadd.f32 %v8786_v53, %v922_v13  ;;  %v8822_v6 = vmax.f32 %v930_v44, %v8786_v53 }
 0x1de   :  { %v1015_v31 = vadd.f32 %v8795_v37, %v967_v24  ;;  %v1039_v41 = vmul.f32 %v8795_v37, %v8795_v37  ;;  %v8811_v45 = vadd.f32 %v863_v5, %v8578_v49  ;;  %v874_v20 = vadd.f32 %v7060_v35, %v7020_v19 }
 0x1df   :  { %v865_v62 = vpop.f32.mrf.mxu1  ;;  %v8829_v33 = vadd.f32 %v994_v56, %v954_v55  ;;  %v1031_v28 = vmin.f32 %v8749_v57, %v8795_v37 }
 0x1e0   :  { %v1047_v24 = vadd.f32 %v1039_v41, %v999_v26  ;;  %v8824_v15 = vmul.f32 0.25, %v1015_v31  ;;  %v1013_v49 = vadd.f32 %v8811_v45, %v965_v10  ;;  %v1037_v19 = vmul.f32 %v8811_v45, %v8811_v45  ;;  %v588_v10 = vpop.f32.mrf.mxu0 }
 0x1e1   :  { %v8832_v13 = vadd.f32 %v874_v20, %v8580_v50  ;;  %v866_v46 = vadd.f32 %v865_v62, %v575_v23  ;;  %v7063_v48 = vpop.f32.mrf.mxu1 }
 0x1e2   :  { %v1063_v44 = vmul.f32 0.25, %v1047_v24  ;;  %v1071_v26 = vmul.f32 %v8824_v15, %v8824_v15  ;;  %v1045_v61 = vadd.f32 %v1037_v19, %v997_v39  ;;  %v8838_v1 = vmul.f32 0.25, %v1013_v49 }
 0x1e3   :  { %v1016_v2 = vadd.f32 %v8832_v13, %v968_v34  ;;  %v1040_v55 = vmul.f32 %v8832_v13, %v8832_v13  ;;  %v8844_v50 = vadd.f32 %v866_v46, %v8582_v54  ;;  %v887_v3 = vadd.f32 %v7063_v48, %v7023_v42  ;;  %v878_v22 = vpop.f32.mrf.mxu1 }
 0x1e4   :  { %v1061_v23 = vmul.f32 0.25, %v1045_v61  ;;  %v1069_v57 = vmul.f32 %v8838_v1, %v8838_v1  ;;  %v879_v25 = vadd.f32 %v878_v22, %v588_v10  ;;  %v1023_v39 = vmax.f32 %v8751_v21, %v8795_v37 }
 0x1e5   :  { %v1048_v5 = vadd.f32 %v1040_v55, %v1000_v12  ;;  %v8850_v56 = vmul.f32 0.25, %v1016_v2  ;;  %v1014_v34 = vadd.f32 %v8844_v50, %v966_v43  ;;  %v1038_v35 = vmul.f32 %v8844_v50, %v8844_v50  ;;  %v7991_v43 = vld [vmem:[%s12157_s7] sm:$0xff]   ;;  %v7064_v24 = vpop.f32.mrf.mxu1 }
 0x1e6   :  { %v1079_v54 = vsub.f32 %v1063_v44, %v1071_v26  ;;  %v1077_v31 = vsub.f32 %v1061_v23, %v1069_v57  ;;  %v8856_v41 = vadd.f32 %v887_v3, %v8587_v58  ;;  %v8859_v20 = vadd.f32 %v879_v25, %v8589_v59  ;;  %7067 = vmatprep.subr.bf16.mxu0 %v7991_v43 }
 0x1e7   :  { %v1064_v42 = vmul.f32 0.25, %v1048_v5  ;;  %v1072_v21 = vmul.f32 %v8850_v56, %v8850_v56  ;;  %v1046_v12 = vadd.f32 %v1038_v35, %v998_v18  ;;  %v8863_v37 = vmul.f32 0.25, %v1014_v34  ;;  %7068 = vmatpush3.bf16.msra.mxu0 %v7991_v43  ;;  %v881_v25 = vpop.f32.mrf.mxu1 }
 0x1e8   :  { %v1019_v62 = vadd.f32 %v8856_v41, %v8777_v17  ;;  %v1043_v58 = vmul.f32 %v8856_v41, %v8856_v41  ;;  %v1029_v59 = vmin.f32 %v8757_v36, %v8811_v45  ;;  %v1021_v49 = vmax.f32 %v8762_v47, %v8811_v45  ;;  %v7024_v17 = vpop.f32.mrf.mxu0 }
 0x1e9   :  { %v1080_v18 = vsub.f32 %v1064_v42, %v1072_v21  ;;  %v1062_v19 = vmul.f32 0.25, %v1046_v12  ;;  %v1070_v46 = vmul.f32 %v8863_v37, %v8863_v37  ;;  %v1017_v48 = vadd.f32 %v8859_v20, %v969_v29  ;;  %v7992_v29 = vld [vmem:[%s12158_s8 + $0x18] sm:$0xff]  }
 0x1ea   :  { %v1087_v44 = vmax.f32 %v1079_v54, 0.0  ;;  %v1051_v26 = vadd.f32 %v1043_v58, %v8791_v7  ;;  %v8880_v61 = vmul.f32 0.25, %v1019_v62  ;;  %v1041_v36 = vmul.f32 %v8859_v20, %v8859_v20  ;;  %7085 = vmatprep.subr.bf16.mxu1 %v7992_v29  ;;  %v12237_v54 = vld [vmem:[#allocation2_spill] sm:$0xff] }
 0x1eb   :  { %v1085_v10 = vmax.f32 %v1077_v31, 0.0  ;;  %v1088_v2 = vmax.f32 %v1080_v18, 0.0  ;;  %v8884_v55 = vmul.f32 0.25, %v1017_v48  ;;  %v890_v3 = vadd.f32 %v7064_v24, %v7024_v17  ;;  %7070 = vmatmul.mubr.msk.bf16.vlgmr.msra.gmra.mxu0 %vm128_vm0, %v12237_v54  ;;  %v591_v31 = vpop.f32.mrf.mxu0  ;;  %7086 = vmatpush3.bf16.msra.mxu1 %v7992_v29  ;;  %v12240_v54 = vld [vmem:[#allocation9_spill] sm:$0xff] }
 0x1ec   :  { %v1067_v22 = vmul.f32 0.25, %v1051_v26  ;;  %v1075_v23 = vmul.f32 %v8880_v61, %v8880_v61  ;;  %v1049_v7 = vadd.f32 %v1041_v36, %v8797_v16  ;;  %v1032_v57 = vmin.f32 %v8769_v32, %v8832_v13  ;;  %v12238_v32 = vld [vmem:[#allocation3_spill] sm:$0xff] }
 0x1ed   :  { %v1078_v5 = vsub.f32 %v1062_v19, %v1070_v46  ;;  %v1073_v34 = vmul.f32 %v8884_v55, %v8884_v55  ;;  %v8897_v35 = vadd.f32 %v890_v3, %v8594_v0  ;;  %v1024_v16 = vmax.f32 %v8771_v14, %v8832_v13  ;;  %7073 = vmatprep.mubr.msk.bf16.mxu0 %vm128_vm0, %v12238_v32  ;;  %v7994_v14 = vld [vmem:[%s12158_s8 + $0x8] sm:$0xff]   ;;  %v12244_v32 = vld [vmem:[#allocation10_spill] sm:$0xff] }
 0x1ee   :  { %v1083_v42 = vsub.f32 %v1067_v22, %v1075_v23  ;;  %v1065_v21 = vmul.f32 0.25, %v1049_v7  ;;  %v7653_v12 = vpack.i.bf16 %v1032_v57, %v1031_v28  ;;  %v8905_v43 = vadd.f32 1e-05, %v1087_v44  ;;  %v7993_v28 = vld [vmem:[%s12158_s8 + $0x10] sm:$0xff]  }
 0x1ef   :  { %v1020_v0 = vadd.f32 %v8897_v35, %v8800_v27  ;;  %v1044_v62 = vmul.f32 %v8897_v35, %v8897_v35  ;;  %v882_v58 = vadd.f32 %v881_v25, %v591_v31  ;;  %v8917_v13 = vadd.f32 1e-05, %v1085_v10  ;;  %7087 = vmatprep.subr.bf16.mxu1 %v7993_v28  ;;  %v12239_v23 = vld [vmem:[#allocation4_spill] sm:$0xff]  ;;  %v12241_v31 = vld [vmem:[#allocation5_spill] sm:$0xff] }
 0x1f0   :  { %v8919_v24 = vadd.f32 1e-05, %v1088_v2  ;;  %7654 = vrot.lane.b32.xlu1 %v7653_v12, %s8276_s25  ;;  %v7648_v27 = vpack.i.bf16 %v1024_v16, %v1023_v39  ;;  %v1030_v18 = vmin.f32 %v8779_v52, %v8844_v50  ;;  %v1022_v44 = vmax.f32 %v8781_v40, %v8844_v50  ;;  %7088 = vmatpush3.bf16.msra.mxu1 %v7993_v28  ;;  %v12243_v12 = vld [vmem:[#allocation7_spill] sm:$0xff]  ;;  %v12247_v28 = vld [vmem:[#allocation8_spill] sm:$0xff] }
 0x1f1   :  { %v1052_v19 = vadd.f32 %v1044_v62, %v8813_v30  ;;  %v8925_v46 = vmul.f32 0.25, %v1020_v0  ;;  %v8928_v48 = vadd.f32 %v882_v58, %v8605_v4  ;;  %v1086_v17 = vmax.f32 %v1078_v5, 0.0  ;;  %7089 = vmatprep.subr.bf16.mxu1 %v7994_v14  ;;  %v12245_v0 = vld [vmem:[#allocation6_spill] sm:$0xff]  ;;  %v12246_v58 = vld [vmem:[#allocation12_spill] sm:$0xff] }
 0x1f2   :  { %v1091_v26 = vmax.f32 %v1083_v42, 0.0  ;;  %v1081_v36 = vsub.f32 %v1065_v21, %v1073_v34  ;;  %7649 = vrot.lane.b32.xlu0 %v7648_v27, %s8277_s26  ;;  %v7663_v39 = vpack.i.bf16 %v1030_v18, %v1029_v59  ;;  %v7658_v40 = vpack.i.bf16 %v1022_v44, %v1021_v49  ;;  %v12242_v21 = vld [vmem:[#allocation11_spill] sm:$0xff]  ;;  %v7995_v44 = vld [vmem:[%s12158_s8] sm:$0xff]  }
 0x1f3   :  { %v1068_v52 = vmul.f32 0.25, %v1052_v19  ;;  %v1076_v30 = vmul.f32 %v8925_v46, %v8925_v46  ;;  %v1018_v4 = vadd.f32 %v8928_v48, %v8816_v11  ;;  %v1042_v10 = vmul.f32 %v8928_v48, %v8928_v48  ;;  %7074 = vmatmul.mubr.msk.bf16.gmra.mxu0 %vm128_vm0, %v12239_v23 }
 0x1f4   :  { %7664 = vrot.lane.b32.xlu1 %v7663_v39, %s8276_s25  ;;  %v1027_v50 = vmax.f32 %v8789_v8, %v8856_v41  ;;  %v1028_v59 = vmax.f32 %v8819_v38, %v8897_v35  ;;  %v1025_v2 = vmax.f32 %v8805_v60, %v8859_v20  ;;  %v1026_v22 = vmax.f32 %v8822_v6, %v8928_v48 }
 0x1f5   :  { %v1084_v11 = vsub.f32 %v1068_v52, %v1076_v30  ;;  %v1050_v3 = vadd.f32 %v1042_v10, %v8829_v33  ;;  %v8950_v29 = vmul.f32 0.25, %v1018_v4  ;;  %v8956_v47 = vadd.f32 1e-05, %v1086_v17  ;;  %7090 = vmatpush3.bf16.msra.mxu1 %v7994_v14 }
 0x1f6   :  { %v1089_v8 = vmax.f32 %v1081_v36, 0.0  ;;  %7659 = vrot.lane.b32.xlu0 %v7658_v40, %s8277_s26  ;;  %v7668_v45 = vpack.i.bf16 %v1028_v59, %v1027_v50  ;;  %8060 = vrsqrt.f32 %v8905_v43  ;;  %v7673_v49 = vpack.i.bf16 %v1026_v22, %v1025_v2  ;;  %7091 = vmatprep.subr.bf16.mxu1 %v7995_v44 }
 0x1f7   :  { %v1092_v60 = vmax.f32 %v1084_v11, 0.0  ;;  %v1066_v38 = vmul.f32 0.25, %v1050_v3  ;;  %v1074_v33 = vmul.f32 %v8950_v29, %v8950_v29  ;;  %8062 = vrsqrt.f32 %v8919_v24 }
 0x1f8   :  { %7669 = vrot.lane.b32.xlu1 %v7668_v45, %s8277_s26  ;;  %v8964_v6 = vadd.f32 1e-05, %v1091_v26  ;;  %8064 = vrsqrt.f32 %v8917_v13  ;;  %v8971_v25 = vadd.f32 1e-05, %v1089_v8  ;;  %v939_v42 = vmin.f32 %v12241_v31, %v12240_v54 }
 0x1f9   :  { %v1082_v7 = vsub.f32 %v1066_v38, %v1074_v33  ;;  %v8967_v57 = vadd.f32 1e-05, %v1092_v60  ;;  %8066 = vrsqrt.f32 %v8956_v47  ;;  %v940_v16 = vmin.f32 %v12243_v12, %v12242_v21  ;;  %7092 = vmatpush3.bf16.msra.mxu1 %v7995_v44 }
 0x1fa   :  { %7674 = vrot.lane.b32.xlu0 %v7673_v49, %s8277_s26  ;;  %8068 = vrsqrt.f32 %v8964_v6  ;;  %v937_v62 = vmin.f32 %v12245_v0, %v12244_v32  ;;  %v938_v14 = vmin.f32 %v12247_v28, %v12246_v58  ;;  %v987_v27 = vmin.f32 %v939_v42, %v8746_v63 }
 0x1fb   :  { %v1090_v5 = vmax.f32 %v1082_v7, 0.0  ;;  %8070 = vrsqrt.f32 %v8967_v57  ;;  %v988_v18 = vmin.f32 %v940_v16, %v8767_v51  ;;  %vm1117_vm2 = vcmp.eq.f32.partialorder %v8905_v43, inf }
 0x1fc   :  { %8072 = vrsqrt.f32 %v8971_v25  ;;  %v985_v19 = vmin.f32 %v937_v62, %v8754_v9  ;;  %vm1119_vm3 = vcmp.eq.f32.partialorder %v8905_v43, 0.0  ;;  %v1120_v26 = vand.u32 2147483648, %v8905_v43 }
 0x1fd   :  { %v8973_v34 = vadd.f32 1e-05, %v1090_v5  ;;  %v986_v36 = vmin.f32 %v938_v14, %v8786_v53  ;;  %vm1124_vm4 = vcmp.eq.f32.partialorder %v8919_v24, inf  ;;  %vm1126_vm5 = vcmp.eq.f32.partialorder %v8919_v24, 0.0 }
 0x1fe   :  { %v1127_v9 = vand.u32 2147483648, %v8919_v24  ;;  %vm1103_vm6 = vcmp.eq.f32.partialorder %v8917_v13, inf  ;;  %vm1105_vm7 = vcmp.eq.f32.partialorder %v8917_v13, 0.0  ;;  %v1106_v51 = vand.u32 2147483648, %v8917_v13 }
 0x1ff   :  { %8074 = vrsqrt.f32 %v8973_v34  ;;  %vm1110_vm8 = vcmp.eq.f32.partialorder %v8956_v47, inf  ;;  %v1036_v4 = vmin.f32 %v988_v18, %v8897_v35  ;;  %v1034_v10 = vmin.f32 %v986_v36, %v8928_v48  ;;  %v7996_v18 = vld [vmem:[%s12151_s3 + $0x18] sm:$0xff]  }
 0x200   :  { %vm1112_vm9 = vcmp.eq.f32.partialorder %v8956_v47, 0.0  ;;  %v1113_v59 = vand.u32 2147483648, %v8956_v47  ;;  %v1035_v2 = vmin.f32 %v987_v27, %v8856_v41  ;;  %v1033_v22 = vmin.f32 %v985_v19, %v8859_v20  ;;  %7101 = vmatprep.subr.bf16.mxu0 %v7996_v18 }
 0x201   :  { %vm1145_vm10 = vcmp.eq.f32.partialorder %v8964_v6, inf  ;;  %vm1147_vm11 = vcmp.eq.f32.partialorder %v8964_v6, 0.0  ;;  %v1148_v49 = vand.u32 2147483648, %v8964_v6  ;;  %vm1152_vm12 = vcmp.eq.f32.partialorder %v8967_v57, inf  ;;  %7102 = vmatpush3.bf16.msra.mxu0 %v7996_v18 }
 0x202   :  { %v7693_v45 = vpack.i.bf16 %v1036_v4, %v1035_v2  ;;  %v7688_v60 = vpack.i.bf16 %v1034_v10, %v1033_v22  ;;  %vm1154_vm13 = vcmp.eq.f32.partialorder %v8967_v57, 0.0  ;;  %v1155_v31 = vand.u32 2147483648, %v8967_v57 }
 0x203   :  { %v8061_v17 = vpop.eup %8060  ;;  %vm1131_vm14 = vcmp.eq.f32.partialorder %v8971_v25, inf  ;;  %v1134_v12 = vand.u32 2147483648, %v8971_v25  ;;  %vm1138_vm15 = vcmp.eq.f32.partialorder %v8973_v34, inf  ;;  %v1141_v58 = vand.u32 2147483648, %v8973_v34 }
 0x204   :  { %v1116_v39 = vmul.f32 %v8061_v17, %v8905_v43  ;;  %v8063_v63 = vpop.eup %8062 }
 0x205   :  { %v8065_v53 = vpop.eup %8064  ;;  %v1123_v30 = vmul.f32 %v8063_v63, %v8919_v24 }
 0x206   :  { %v1118_v52 = vsel %vm1117_vm2, %v8905_v43, %v1116_v39  ;;  %v8067_v40 = vpop.eup %8066  ;;  %v1102_v50 = vmul.f32 %v8065_v53, %v8917_v13  ;;  %vm1133_vm2 = vcmp.eq.f32.partialorder %v8971_v25, 0.0 }
 0x207   :  { %v1125_v11 = vsel %vm1124_vm4, %v8919_v24, %v1123_v30  ;;  %v1109_v3 = vmul.f32 %v8067_v40, %v8956_v47  ;;  %v1121_v35 = vsel %vm1119_vm3, %v1120_v26, %v1118_v52  ;;  %v8069_v23 = vpop.eup %8068  ;;  %vm1140_vm3 = vcmp.eq.f32.partialorder %v8973_v34, 0.0 }
 0x208   :  { %v1128_v48 = vsel %vm1126_vm5, %v1127_v9, %v1125_v11  ;;  %v1104_v41 = vsel %vm1103_vm6, %v8917_v13, %v1102_v50  ;;  %v8071_v38 = vpop.eup %8070  ;;  %v1144_v33 = vmul.f32 %v8069_v23, %v8964_v6  ;;  %vm1269_vm4 = vcmask 785408  }
 0x209   :  { %v7678_v8 = vpack.i.bf16 %v1128_v48, %v1121_v35  ;;  %v1111_v20 = vsel %vm1110_vm8, %v8956_v47, %v1109_v3  ;;  %v1107_v43 = vsel %vm1105_vm7, %v1106_v51, %v1104_v41  ;;  %v8073_v7 = vpop.eup %8072  ;;  %v1151_v54 = vmul.f32 %v8071_v38, %v8967_v57 }
 0x20a   :  { %v1114_v24 = vsel %vm1112_vm9, %v1113_v59, %v1111_v20  ;;  %v1146_v47 = vsel %vm1145_vm10, %v8964_v6, %v1144_v33  ;;  %v1130_v42 = vmul.f32 %v8073_v7, %v8971_v25 }
 0x20b   :  { %7679 = vrot.lane.b32.xlu1 %v7678_v8, %s8278_s29  ;;  %v7683_v5 = vpack.i.bf16 %v1114_v24, %v1107_v43  ;;  %v1153_v21 = vsel %vm1152_vm12, %v8967_v57, %v1151_v54  ;;  %v1149_v32 = vsel %vm1147_vm11, %v1148_v49, %v1146_v47 }
 0x20c   :  { %v8075_v13 = vpop.eup %8074  ;;  %v1156_v0 = vsel %vm1154_vm13, %v1155_v31, %v1153_v21  ;;  %v1132_v62 = vsel %vm1131_vm14, %v8971_v25, %v1130_v42 }
 0x20d   :  { %7684 = vrot.lane.b32.xlu0 %v7683_v5, %s8278_s29  ;;  %v1137_v16 = vmul.f32 %v8075_v13, %v8973_v34  ;;  %v7703_v28 = vpack.i.bf16 %v1156_v0, %v1149_v32  ;;  %v1135_v14 = vsel %vm1133_vm2, %v1134_v12, %v1132_v62 }
 0x20f   :  { %7694 = vrot.lane.b32.xlu1 %v7693_v45, %s8276_s25  ;;  %v1139_v57 = vsel %vm1138_vm15, %v8973_v34, %v1137_v16 }
 0x210   :  { %v1142_v27 = vsel %vm1140_vm3, %v1141_v58, %v1139_v57 }
 0x211   :  { %7689 = vrot.lane.b32.xlu0 %v7688_v60, %s8276_s25  ;;  %v7698_v6 = vpack.i.bf16 %v1142_v27, %v1135_v14 }
 0x213   :  { %7704 = vrot.lane.b32.xlu1 %v7703_v28, %s8278_s29 }
 0x215   :  { %7699 = vrot.lane.b32.xlu0 %v7698_v6, %s8278_s29 }
 0x262   :  { %v7655_v25 = vpop.permute.xlu1 %7654 }
 0x263   :  { %v7657_v51 = vunpack.i.h.bf16 %v7655_v25  ;;  %v7656_v53 = vunpack.i.l.bf16 %v7655_v25  ;;  %v7997_v25 = vld [vmem:[%s12151_s3 + $0x10] sm:$0xff]  }
 0x264   :  { %v7650_v19 = vpop.permute.xlu0 %7649  ;;  %7103 = vmatprep.subr.bf16.mxu0 %v7997_v25 }
 0x265   :  { %v7652_v34 = vunpack.i.h.bf16 %v7650_v19  ;;  %v7651_v26 = vunpack.i.l.bf16 %v7650_v19  ;;  %v7998_v19 = vld [vmem:[%s12153_s4 + $0x18] sm:$0xff]   ;;  %7104 = vmatpush3.bf16.msra.mxu0 %v7997_v25 }
 0x266   :  { %v7665_v44 = vpop.permute.xlu1 %7664  ;;  %7113 = vmatprep.subr.bf16.mxu1 %v7998_v19  ;;  %v8152_v25 = vld [vmem:[%s12155_s2 + $0x18] sm:$0xff]  }
 0x267   :  { %v1255_v52 = vsel %vm128_vm0, %v8824_v15, %v7651_v26  ;;  %v1256_v30 = vsel %vm128_vm0, %v8850_v56, %v7652_v34  ;;  %v7667_v4 = vunpack.i.h.bf16 %v7665_v44  ;;  %v7666_v10 = vunpack.i.l.bf16 %v7665_v44  ;;  %v7999_v44 = vld [vmem:[%s12153_s4 + $0x10] sm:$0xff]  }
 0x268   :  { %v7660_v17 = vpop.permute.xlu0 %7659  ;;  %v1263_v22 = vsel %vm683_vm1, %v1255_v52, %v7656_v53  ;;  %v1264_v35 = vsel %vm683_vm1, %v1256_v30, %v7657_v51 }
 0x269   :  { %v7662_v39 = vunpack.i.h.bf16 %v7660_v17  ;;  %v7661_v9 = vunpack.i.l.bf16 %v7660_v17  ;;  %v8000_v17 = vld [vmem:[%s12154_s5 + $0x18] sm:$0xff]  }
 0x26a   :  { %v7670_v36 = vpop.permute.xlu1 %7669  ;;  %7125 = vmatprep.subr.bf16.mxu0 %v8000_v17 }
 0x26b   :  { %v1254_v50 = vsel %vm128_vm0, %v8863_v37, %v7662_v39  ;;  %v1253_v59 = vsel %vm128_vm0, %v8838_v1, %v7661_v9  ;;  %v7672_v20 = vunpack.i.h.bf16 %v7670_v36  ;;  %v7671_v60 = vunpack.i.l.bf16 %v7670_v36 }
 0x26c   :  { %v7675_v63 = vpop.permute.xlu0 %7674  ;;  %v1261_v8 = vsel %vm683_vm1, %v1253_v59, %v7666_v10  ;;  %v1262_v37 = vsel %vm683_vm1, %v1254_v50, %v7667_v4 }
 0x26d   :  { %v7677_v38 = vunpack.i.h.bf16 %v7675_v63  ;;  %v7676_v43 = vunpack.i.l.bf16 %v7675_v63  ;;  %v1260_v21 = vsel %vm128_vm0, %v8925_v46, %v7672_v20  ;;  %v1259_v12 = vsel %vm128_vm0, %v8880_v61, %v7671_v60  ;;  %v6226_v63 = vld [vmem:[%s12160_s9] ss:$0 sm:$0xff] }
 0x26f   :  { %v1258_v16 = vsel %vm128_vm0, %v8950_v29, %v7677_v38  ;;  %v1257_v32 = vsel %vm128_vm0, %v8884_v55, %v7676_v43 }
 0x27d   :  { %v7680_v40 = vpop.permute.xlu1 %7679 }
 0x27e   :  { %v7682_v2 = vunpack.i.h.bf16 %v7680_v40  ;;  %v7681_v11 = vunpack.i.l.bf16 %v7680_v40 }
 0x27f   :  { %v7685_v3 = vpop.permute.xlu0 %7684 }
 0x280   :  { %v7687_v15 = vunpack.i.h.bf16 %v7685_v3  ;;  %v7686_v48 = vunpack.i.l.bf16 %v7685_v3  ;;  %v1273_v56 = vsel %vm1269_vm4, %v1264_v35, %v7682_v2  ;;  %v1272_v41 = vsel %vm1269_vm4, %v1263_v22, %v7681_v11 }
 0x281   :  { %v7695_v23 = vpop.permute.xlu1 %7694  ;;  %v1279_v49 = vpack.c.bf16 %v1273_v56, %v1272_v41  ;;  %v8141_v41 = vld [vmem:[%s12152_s0] sm:$0xff] }
 0x282   :  { %v1270_v1 = vsel %vm1269_vm4, %v1261_v8, %v7686_v48  ;;  %v1271_v45 = vsel %vm1269_vm4, %v1262_v37, %v7687_v15  ;;  %v7697_v7 = vunpack.i.h.bf16 %v7695_v23  ;;  %v7696_v5 = vunpack.i.l.bf16 %v7695_v23  ;;  %v8140_v15 = vld [vmem:[%s12152_s0 + $0x18] sm:$0xff]  ;;  %v8142_v8 = vld [vmem:[%s12152_s0 + $0x8] sm:$0xff] }
 0x283   :  { %v7690_v24 = vpop.permute.xlu0 %7689  ;;  %v1278_v33 = vpack.c.bf16 %v1271_v45, %v1270_v1  ;;  %v8143_v1 = vld [vmem:[%s12152_s0 + $0x10] sm:$0xff] }
 0x284   :  { %v7692_v54 = vunpack.i.h.bf16 %v7690_v24  ;;  %v7691_v13 = vunpack.i.l.bf16 %v7690_v24  ;;  %v1267_v62 = vsel %vm683_vm1, %v1259_v12, %v7696_v5  ;;  %v1268_v58 = vsel %vm683_vm1, %v1260_v21, %v7697_v7  ;;  %v8001_v5 = vld [vmem:[%s12154_s5 + $0x10] sm:$0xff]   ;;  %v8144_v12 = vld [vmem:[%s12152_s0 + $0x38] sm:$0xff] }
 0x285   :  { %v7705_v47 = vpop.permute.xlu1 %7704  ;;  %7093 = vmatprep.mubr.bf16.mxu1 %v1278_v33 }
 0x286   :  { %v7707_v31 = vunpack.i.h.bf16 %v7705_v47  ;;  %v7706_v42 = vunpack.i.l.bf16 %v7705_v47  ;;  %7094 = vmatmul.mubr.bf16.vlgmr.msra.gmra.mxu1 %v1279_v49  ;;  %v1266_v14 = vsel %vm683_vm1, %v1258_v16, %v7692_v54  ;;  %v1265_v46 = vsel %vm683_vm1, %v1257_v32, %v7691_v13  ;;  %v8002_v32 = vld [vmem:[%s12157_s7 + $0x18] sm:$0xff]  }
 0x287   :  { %v7700_v0 = vpop.permute.xlu0 %7699  ;;  %7114 = vmatpush3.bf16.msra.mxu1 %v7998_v19  ;;  %v8153_v19 = vld [vmem:[%s12155_s2 + $0x20] sm:$0xff]  }
 0x288   :  { %v7702_v28 = vunpack.i.h.bf16 %v7700_v0  ;;  %v7701_v57 = vunpack.i.l.bf16 %v7700_v0  ;;  %v1276_v27 = vsel %vm1269_vm4, %v1267_v62, %v7706_v42  ;;  %v1277_v61 = vsel %vm1269_vm4, %v1268_v58, %v7707_v31  ;;  %7115 = vmatprep.subr.bf16.mxu1 %v7999_v44  ;;  %v8145_v0 = vld [vmem:[%s12152_s0 + $0x20] sm:$0xff]  ;;  %v8146_v58 = vld [vmem:[%s12152_s0 + $0x28] sm:$0xff] }
 0x289   :  { %v1281_v18 = vpack.c.bf16 %v1277_v61, %v1276_v27  ;;  %v8148_v61 = vld [vmem:[%s12155_s2] sm:$0xff]  }
 0x28a   :  { %v1274_v29 = vsel %vm1269_vm4, %v1265_v46, %v7701_v57  ;;  %v1275_v6 = vsel %vm1269_vm4, %v1266_v14, %v7702_v28  ;;  %v8147_v57 = vld [vmem:[%s12152_s0 + $0x30] sm:$0xff] }
 0x28b   :  { %v1280_v55 = vpack.c.bf16 %v1275_v6, %v1274_v29  ;;  %7116 = vmatpush3.bf16.msra.mxu1 %v7999_v44  ;;  %v8149_v29 = vld [vmem:[%s12156_s1] sm:$0xff]   ;;  %v8003_v6 = vld [vmem:[%s12157_s7 + $0x10] sm:$0xff]   ;;  %v8154_v44 = vld [vmem:[%s12155_s2 + $0x28] sm:$0xff]  }
 0x28d   :  { %7097 = vmatprep.mubr.bf16.mxu1 %v1280_v55  ;;  %v8150_v55 = vld [vmem:[%s12155_s2 + $0x8] sm:$0xff]  }
 0x28e   :  { %7098 = vmatmul.mubr.bf16.gmra.mxu1 %v1281_v18  ;;  %v8151_v18 = vld [vmem:[%s12155_s2 + $0x10] sm:$0xff]  }
 0x2ab   :  { %v7071_v34 = vpop.f32.mrf.mxu0 }
 0x2ac   :  { %v1348_v53 = vadd.f32 %v7071_v34, %v6226_v63  ;;  %v8156_v34 = vld [vmem:[%s12155_s2 + $0x38] sm:$0xff]  }
 0x2ad   :  { %v1339_v26 = vpop.f32.mrf.mxu0 }
 0x2ae   :  { %v1340_v4 = vadd.f32 %v6226_v63, %v1339_v26  ;;  %v8157_v26 = vld [vmem:[%s12155_s2 + $0x40] sm:$0xff]  }
 0x2af   :  { %v7072_v36 = vpop.f32.mrf.mxu0 }
 0x2b0   :  { %v1351_v10 = vadd.f32 %v7072_v36, %v6226_v63  ;;  %v8158_v36 = vld [vmem:[%s12155_s2 + $0x48] sm:$0xff]  }
 0x2b1   :  { %v1342_v39 = vpop.f32.mrf.mxu0 }
 0x2b2   :  { %v1343_v50 = vadd.f32 %v6226_v63, %v1342_v39  ;;  %v8159_v39 = vld [vmem:[%s12155_s2 + $0x50] sm:$0xff]  }
 0x2b3   :  { %v7075_v9 = vpop.f32.mrf.mxu0 }
 0x2b4   :  { %v1364_v20 = vadd.f32 %v7075_v9, %v6226_v63  ;;  %v8160_v9 = vld [vmem:[%s12155_s2 + $0x58] sm:$0xff]  }
 0x2b5   :  { %v1355_v52 = vpop.f32.mrf.mxu0 }
 0x2b6   :  { %v1356_v43 = vadd.f32 %v6226_v63, %v1355_v52  ;;  %v8164_v52 = vld [vmem:[%s12155_s2 + $0x78] sm:$0xff]  }
 0x2b7   :  { %v7076_v3 = vpop.f32.mrf.mxu0 }
 0x2b8   :  { %v1367_v24 = vadd.f32 %v7076_v3, %v6226_v63 }
 0x2b9   :  { %v1358_v60 = vpop.f32.mrf.mxu0 }
 0x2ba   :  { %v1359_v54 = vadd.f32 %v6226_v63, %v1358_v60  ;;  %v8161_v63 = vld [vmem:[%s12155_s2 + $0x60] sm:$0xff]   ;;  %v8170_v60 = vld [vmem:[%s12156_s1 + $0x30] sm:$0xff]  }
 0x346   :  { %v7095_v51 = vpop.f32.mrf.mxu1 }
 0x347   :  { %v1501_v11 = vadd.f32 %v7095_v51, %v1348_v53  ;;  %v8162_v51 = vld [vmem:[%s12155_s2 + $0x68] sm:$0xff]   ;;  %v8163_v53 = vld [vmem:[%s12155_s2 + $0x70] sm:$0xff]  }
 0x348   :  { %v1468_v30 = vpop.f32.mrf.mxu1 }
 0x349   :  { %v1499_v59 = vadd.f32 %v1468_v30, %v1340_v4  ;;  %v9132_v45 = vadd.f32 %v8143_v1, %v1501_v11  ;;  %v8169_v1 = vld [vmem:[%s12156_s1 + $0x28] sm:$0xff]  }
 0x34a   :  { %v7096_v40 = vpop.f32.mrf.mxu1 }
 0x34b   :  { %v1502_v2 = vadd.f32 %v7096_v40, %v1351_v10  ;;  %v9122_v23 = vadd.f32 %v8141_v41, %v1499_v59  ;;  %12251 = vst [vmem:[#allocation9_spill] sm:$0xff] %v9132_v45  ;;  %v8166_v41 = vld [vmem:[%s12156_s1 + $0x10] sm:$0xff]  }
 0x34c   :  { %v1471_v22 = vpop.f32.mrf.mxu1 }
 0x34d   :  { %v1500_v35 = vadd.f32 %v1471_v22, %v1343_v50  ;;  %v9117_v48 = vadd.f32 %v8140_v15, %v1502_v2  ;;  %12249 = vst [vmem:[#allocation3_spill] sm:$0xff] %v9122_v23 }
 0x34e   :  { %v7099_v56 = vpop.f32.mrf.mxu1 }
 0x34f   :  { %12248 = vst [vmem:[#allocation2_spill] sm:$0xff] %v9117_v48  ;;  %v9127_v37 = vadd.f32 %v8142_v8, %v1500_v35  ;;  %v9140_v49 = vpack.c.bf16 %v9117_v48, %v9132_v45  ;;  %v1505_v31 = vadd.f32 %v7099_v56, %v1364_v20  ;;  %v8165_v56 = vld [vmem:[%s12156_s1 + $0x8] sm:$0xff]   ;;  %v8167_v8 = vld [vmem:[%s12156_s1 + $0x18] sm:$0xff]   ;;  %v8168_v20 = vld [vmem:[%s12156_s1 + $0x20] sm:$0xff]  }
 0x350   :  { %v1484_v38 = vpop.f32.mrf.mxu1 }
 0x351   :  { %12250 = vst [vmem:[#allocation4_spill] sm:$0xff] %v9127_v37  ;;  %v9136_v33 = vpack.c.bf16 %v9127_v37, %v9122_v23  ;;  %v1503_v13 = vadd.f32 %v1484_v38, %v1356_v43  ;;  %v9174_v14 = vadd.f32 %v8147_v57, %v1505_v31  ;;  %v8171_v38 = vld [vmem:[%s12156_s1 + $0x38] sm:$0xff]   ;;  %v8172_v43 = vld [vmem:[%s12156_s1 + $0x40] sm:$0xff]  }
 0x352   :  { %v7100_v7 = vpop.f32.mrf.mxu1 }
 0x353   :  { %v1506_v47 = vadd.f32 %v7100_v7, %v1367_v24  ;;  %7105 = vmatprep.mubr.msk.bf16.mxu0 %vm128_vm0, %v9136_v33  ;;  %7117 = vmatprep.mubr.msk.bf16.mxu1 %vm128_vm0, %v9136_v33  ;;  %v9164_v62 = vadd.f32 %v8145_v0, %v1503_v13  ;;  %12255 = vst [vmem:[#allocation10_spill] sm:$0xff] %v9174_v14  ;;  %v8173_v24 = vld [vmem:[%s12156_s1 + $0x48] sm:$0xff]   ;;  %v8176_v7 = vld [vmem:[%s12156_s1 + $0x60] sm:$0xff]   ;;  %v8179_v13 = vld [vmem:[%s12156_s1 + $0x78] sm:$0xff]  }
 0x354   :  { %v1487_v42 = vpop.f32.mrf.mxu1  ;;  %7106 = vmatmul.mubr.msk.bf16.vlgmr.msra.gmra.mxu0 %vm128_vm0, %v9140_v49  ;;  %7118 = vmatmul.mubr.msk.bf16.vlgmr.msra.gmra.mxu1 %vm128_vm0, %v9140_v49 }
 0x355   :  { %v1504_v21 = vadd.f32 %v1487_v42, %v1359_v54  ;;  %7126 = vmatpush3.bf16.msra.mxu0 %v8000_v17  ;;  %v9156_v16 = vadd.f32 %v8144_v12, %v1506_v47  ;;  %12253 = vst [vmem:[#allocation11_spill] sm:$0xff] %v9164_v62  ;;  %v8155_v17 = vld [vmem:[%s12155_s2 + $0x30] sm:$0xff]  }
 0x356   :  { %7127 = vmatprep.subr.bf16.mxu0 %v8001_v5  ;;  %v8178_v54 = vld [vmem:[%s12156_s1 + $0x70] sm:$0xff]  }
 0x357   :  { %12252 = vst [vmem:[#allocation5_spill] sm:$0xff] %v9156_v16  ;;  %v9169_v28 = vadd.f32 %v8146_v58, %v1504_v21  ;;  %v1518_v27 = vpack.c.bf16 %v9156_v16, %v9174_v14 }
 0x359   :  { %12254 = vst [vmem:[#allocation7_spill] sm:$0xff] %v9169_v28  ;;  %v1517_v46 = vpack.c.bf16 %v9169_v28, %v9164_v62  ;;  %7128 = vmatpush3.bf16.msra.mxu0 %v8001_v5  ;;  %v8177_v5 = vld [vmem:[%s12156_s1 + $0x68] sm:$0xff]  }
 0x35a   :  { %7201 = vmatprep.subr.bf16.mxu0 %v8002_v32 }
 0x35b   :  { %7109 = vmatprep.mubr.msk.bf16.mxu0 %vm128_vm0, %v1517_v46  ;;  %7121 = vmatprep.mubr.msk.bf16.mxu1 %vm128_vm0, %v1517_v46 }
 0x35c   :  { %7110 = vmatmul.mubr.msk.bf16.gmra.mxu0 %vm128_vm0, %v1518_v27  ;;  %7122 = vmatmul.mubr.msk.bf16.gmra.mxu1 %vm128_vm0, %v1518_v27 }
 0x35d   :  { %7129 = vmatprep.mubr.msk.bf16.mxu0 %vm128_vm0, %v8148_v61  ;;  %7169 = vmatprep.mubr.msk.bf16.mxu1 %vm683_vm1, %v8149_v29 }
 0x364   :  { %7130 = vmatmul.mubr.msk.bf16.vlgmr.msra.gmra.mxu0 %vm128_vm0, %v8150_v55 }
 0x365   :  { %7133 = vmatprep.mubr.msk.bf16.mxu0 %vm128_vm0, %v8151_v18  ;;  %7202 = vmatpush3.bf16.msra.mxu0 %v8002_v32  ;;  %v8004_v18 = vld [vmem:[%s12158_s8 + $0x78] sm:$0xff]  }
 0x366   :  { %7203 = vmatprep.subr.bf16.mxu0 %v8003_v6 }
 0x369   :  { %7204 = vmatpush3.bf16.msra.mxu0 %v8003_v6 }
 0x36c   :  { %7134 = vmatmul.mubr.msk.bf16.gmra.mxu0 %vm128_vm0, %v8152_v25  ;;  %v8005_v25 = vld [vmem:[%s12158_s8 + $0x70] sm:$0xff]  }
 0x36d   :  { %7137 = vmatprep.mubr.msk.bf16.mxu0 %vm128_vm0, %v8153_v19 }
 0x374   :  { %7138 = vmatmul.mubr.msk.bf16.gmra.mxu0 %vm128_vm0, %v8154_v44 }
 0x375   :  { %7141 = vmatprep.mubr.msk.bf16.mxu0 %vm128_vm0, %v8155_v17  ;;  %v8006_v17 = vld [vmem:[%s12158_s8 + $0x68] sm:$0xff]  }
 0x37c   :  { %7142 = vmatmul.mubr.msk.bf16.gmra.mxu0 %vm128_vm0, %v8156_v34 }
 0x37d   :  { %7145 = vmatprep.mubr.msk.bf16.mxu0 %vm128_vm0, %v8157_v26 }
 0x384   :  { %7146 = vmatmul.mubr.msk.bf16.gmra.mxu0 %vm128_vm0, %v8158_v36  ;;  %v8007_v36 = vld [vmem:[%s12158_s8 + $0x60] sm:$0xff]  }
 0x385   :  { %7149 = vmatprep.mubr.msk.bf16.mxu0 %vm128_vm0, %v8159_v39 }
 0x38c   :  { %7150 = vmatmul.mubr.msk.bf16.gmra.mxu0 %vm128_vm0, %v8160_v9 }
 0x38d   :  { %7153 = vmatprep.mubr.msk.bf16.mxu0 %vm128_vm0, %v8161_v63 }
 0x394   :  { %7154 = vmatmul.mubr.msk.bf16.gmra.mxu0 %vm128_vm0, %v8162_v51 }
 0x395   :  { %7157 = vmatprep.mubr.msk.bf16.mxu0 %vm128_vm0, %v8163_v53 }
 0x39c   :  { %7158 = vmatmul.mubr.msk.bf16.gmra.mxu0 %vm128_vm0, %v8164_v52 }
 0x39d   :  { %7205 = vmatprep.mubr.msk.bf16.mxu0 %vm128_vm0, %v9136_v33  ;;  %v8174_v33 = vld [vmem:[%s12156_s1 + $0x50] sm:$0xff]  }
 0x3a4   :  { %7206 = vmatmul.mubr.msk.bf16.vlgmr.msra.gmra.mxu0 %vm128_vm0, %v9140_v49  ;;  %v8175_v49 = vld [vmem:[%s12156_s1 + $0x58] sm:$0xff]  }
 0x3a5   :  { %7209 = vmatprep.mubr.msk.bf16.mxu0 %vm128_vm0, %v1517_v46 }
 0x3ac   :  { %7210 = vmatmul.mubr.msk.bf16.gmra.mxu0 %vm128_vm0, %v1518_v27 }
 0x414   :  { %v7107_v30 = vpop.f32.mrf.mxu0  ;;  %v7119_v58 = vpop.f32.mrf.mxu1 }
 0x416   :  { %v1582_v4 = vpop.f32.mrf.mxu0  ;;  %v1672_v46 = vpop.f32.mrf.mxu1 }
 0x418   :  { %v7108_v10 = vpop.f32.mrf.mxu0  ;;  %v7120_v61 = vpop.f32.mrf.mxu1 }
 0x419   :  { %v1704_v35 = vpack.c.bf16 %v7108_v10, %v7107_v30 }
 0x41a   :  { %v1585_v40 = vpop.f32.mrf.mxu0  ;;  %v1675_v6 = vpop.f32.mrf.mxu1 }
 0x41b   :  { %v1703_v15 = vpack.c.bf16 %v1585_v40, %v1582_v4 }
 0x41c   :  { %v7111_v50 = vpop.f32.mrf.mxu0  ;;  %v7123_v19 = vpop.f32.mrf.mxu1 }
 0x41e   :  { %v1598_v59 = vpop.f32.mrf.mxu0  ;;  %v1688_v34 = vpop.f32.mrf.mxu1 }
 0x420   :  { %v7112_v2 = vpop.f32.mrf.mxu0  ;;  %v7124_v39 = vpop.f32.mrf.mxu1 }
 0x421   :  { %v1706_v11 = vpack.c.bf16 %v7112_v2, %v7111_v50 }
 0x422   :  { %v1601_v3 = vpop.f32.mrf.mxu0  ;;  %v1691_v63 = vpop.f32.mrf.mxu1 }
 0x423   :  { %v1705_v22 = vpack.c.bf16 %v1601_v3, %v1598_v59  ;;  %7161 = vmatprep.subr.bf16.mxu1 %v1706_v11 }
 0x424   :  { %7162 = vmatpush3.bf16.msra.mxu1 %v1706_v11  ;;  %v7131_v47 = vpop.f32.mrf.mxu0 }
 0x425   :  { %7163 = vmatprep.subr.bf16.mxu1 %v1705_v22 }
 0x426   :  { %v1758_v31 = vpop.f32.mrf.mxu0 }
 0x428   :  { %7164 = vmatpush3.bf16.msra.mxu1 %v1705_v22  ;;  %v7132_v42 = vpop.f32.mrf.mxu0 }
 0x429   :  { %7165 = vmatprep.subr.bf16.mxu1 %v1704_v35 }
 0x42a   :  { %v1761_v21 = vpop.f32.mrf.mxu0 }
 0x42c   :  { %7166 = vmatpush3.bf16.msra.mxu1 %v1704_v35  ;;  %v7135_v12 = vpop.f32.mrf.mxu0  ;;  %v6256_v35 = vld [vmem:[%s12159_s6 + $0x1] ss:$0 sm:$0xff] }
 0x42d   :  { %7167 = vmatprep.subr.bf16.mxu1 %v1703_v15 }
 0x42e   :  { %v1774_v32 = vpop.f32.mrf.mxu0 }
 0x430   :  { %7168 = vmatpush3.bf16.msra.mxu1 %v1703_v15  ;;  %v7136_v0 = vpop.f32.mrf.mxu0 }
 0x431   :  { %7213 = vmatprep.subr.bf16.mxu1 %v8004_v18 }
 0x432   :  { %v1777_v57 = vpop.f32.mrf.mxu0 }
 0x433   :  { %7170 = vmatmul.mubr.msk.bf16.vlgmr.msra.gmra.mxu1 %vm683_vm1, %v8165_v56 }
 0x434   :  { %7173 = vmatprep.mubr.msk.bf16.mxu1 %vm683_vm1, %v8166_v41  ;;  %v7139_v27 = vpop.f32.mrf.mxu0  ;;  %7214 = vmatpush3.bf16.msra.mxu1 %v8004_v18  ;;  %v9362_v18 = vadd.f32 %v7123_v19, %v6256_v35 }
 0x435   :  { %7215 = vmatprep.subr.bf16.mxu1 %v8005_v25 }
 0x436   :  { %v1790_v29 = vpop.f32.mrf.mxu0  ;;  %12256 = vst [vmem:[#allocation6_spill] sm:$0xff] %v9362_v18 }
 0x438   :  { %v7140_v55 = vpop.f32.mrf.mxu0  ;;  %7216 = vmatpush3.bf16.msra.mxu1 %v8005_v25 }
 0x439   :  { %7217 = vmatprep.subr.bf16.mxu1 %v8006_v17 }
 0x43a   :  { %v9327_v44 = vpop.f32.mrf.mxu0 }
 0x43b   :  { %7174 = vmatmul.mubr.msk.bf16.gmra.mxu1 %vm683_vm1, %v8167_v8  ;;  %v9354_v8 = vadd.f32 %v7119_v58, %v6256_v35 }
 0x43c   :  { %7177 = vmatprep.mubr.msk.bf16.mxu1 %vm683_vm1, %v8168_v20  ;;  %v9332_v26 = vpop.f32.mrf.mxu0  ;;  %7218 = vmatpush3.bf16.msra.mxu1 %v8006_v17 }
 0x43d   :  { %7219 = vmatprep.subr.bf16.mxu1 %v8007_v36 }
 0x43e   :  { %v9337_v9 = vpop.f32.mrf.mxu0 }
 0x440   :  { %7220 = vmatpush3.bf16.msra.mxu1 %v8007_v36  ;;  %v9339_v51 = vpop.f32.mrf.mxu0 }
 0x442   :  { %v9341_v52 = vpop.f32.mrf.mxu0 }
 0x443   :  { %7178 = vmatmul.mubr.msk.bf16.gmra.mxu1 %vm683_vm1, %v8169_v1 }
 0x444   :  { %7181 = vmatprep.mubr.msk.bf16.mxu1 %vm683_vm1, %v8170_v60  ;;  %v9343_v10 = vpop.f32.mrf.mxu0  ;;  %v9356_v60 = vadd.f32 %v6256_v35, %v1672_v46  ;;  %v9366_v46 = vadd.f32 %v6256_v35, %v1688_v34 }
 0x446   :  { %v9345_v59 = vpop.f32.mrf.mxu0 }
 0x448   :  { %v9347_v3 = vpop.f32.mrf.mxu0 }
 0x44a   :  { %v9352_v56 = vpop.f32.mrf.mxu0 }
 0x44b   :  { %7182 = vmatmul.mubr.msk.bf16.gmra.mxu1 %vm683_vm1, %v8171_v38  ;;  %v9358_v38 = vadd.f32 %v7120_v61, %v6256_v35  ;;  %v9368_v61 = vadd.f32 %v7124_v39, %v6256_v35 }
 0x44c   :  { %7185 = vmatprep.mubr.msk.bf16.mxu1 %vm683_vm1, %v8172_v43  ;;  %v9364_v25 = vpop.f32.mrf.mxu0 }
 0x44e   :  { %v9396_v34 = vpop.f32.mrf.mxu0 }
 0x453   :  { %7186 = vmatmul.mubr.msk.bf16.gmra.mxu1 %vm683_vm1, %v8173_v24 }
 0x454   :  { %7189 = vmatprep.mubr.msk.bf16.mxu1 %vm683_vm1, %v8174_v33 }
 0x45b   :  { %7190 = vmatmul.mubr.msk.bf16.gmra.mxu1 %vm683_vm1, %v8175_v49 }
 0x45c   :  { %7193 = vmatprep.mubr.msk.bf16.mxu1 %vm683_vm1, %v8176_v7 }
 0x463   :  { %7194 = vmatmul.mubr.msk.bf16.gmra.mxu1 %vm683_vm1, %v8177_v5 }
 0x464   :  { %7197 = vmatprep.mubr.msk.bf16.mxu1 %vm683_vm1, %v8178_v54 }
 0x46b   :  { %7198 = vmatmul.mubr.msk.bf16.gmra.mxu1 %vm683_vm1, %v8179_v13  ;;  %v9360_v13 = vadd.f32 %v6256_v35, %v1675_v6 }
 0x4f3   :  { %v7171_v53 = vpop.f32.mrf.mxu1 }
 0x4f4   :  { %v1928_v20 = vadd.f32 %v7171_v53, %v7131_v47 }
 0x4f5   :  { %v1919_v30 = vpop.f32.mrf.mxu1 }
 0x4f6   :  { %v1920_v1 = vadd.f32 %v1919_v30, %v1758_v31 }
 0x4f7   :  { %v7172_v4 = vpop.f32.mrf.mxu1 }
 0x4f8   :  { %v1931_v43 = vadd.f32 %v7172_v4, %v7132_v42  ;;  %v9371_v42 = vadd.f32 %v1928_v20, %v9354_v8 }
 0x4f9   :  { %v1922_v40 = vpop.f32.mrf.mxu1 }
 0x4fa   :  { %v1923_v49 = vadd.f32 %v1922_v40, %v1761_v21  ;;  %v9374_v21 = vadd.f32 %v1920_v1, %v9356_v60  ;;  %v2056_v53 = vmul.f32 %v9371_v42, %v9371_v42 }
 0x4fb   :  { %v7175_v50 = vpop.f32.mrf.mxu1 }
 0x4fc   :  { %v1944_v7 = vadd.f32 %v7175_v50, %v7135_v12  ;;  %v9376_v12 = vadd.f32 %v6256_v35, %v1691_v63  ;;  %v2054_v30 = vmul.f32 %v9374_v21, %v9374_v21 }
 0x4fd   :  { %v1935_v2 = vpop.f32.mrf.mxu1 }
 0x4fe   :  { %v1936_v5 = vadd.f32 %v1935_v2, %v1774_v32  ;;  %v9379_v32 = vadd.f32 %v1931_v43, %v9358_v38  ;;  %v9388_v6 = vadd.f32 %v1944_v7, %v9362_v18 }
 0x4ff   :  { %v7176_v11 = vpop.f32.mrf.mxu1 }
 0x500   :  { %v1947_v54 = vadd.f32 %v7176_v11, %v7136_v0  ;;  %12257 = vst [vmem:[#allocation12_spill] sm:$0xff] %v9388_v6  ;;  %v9391_v19 = vadd.f32 %v1936_v5, %v9366_v46  ;;  %v2057_v40 = vmul.f32 %v9379_v32, %v9379_v32  ;;  %v2060_v35 = vmul.f32 %v9388_v6, %v9388_v6 }
 0x501   :  { %v1938_v22 = vpop.f32.mrf.mxu1 }
 0x502   :  { %v1939_v58 = vadd.f32 %v1938_v22, %v1777_v57  ;;  %12258 = vst [vmem:[#allocation8_spill] sm:$0xff] %v9391_v19  ;;  %v9394_v17 = vadd.f32 %v1947_v54, %v9368_v61 }
 0x503   :  { %v7179_v15 = vpop.f32.mrf.mxu1 }
 0x504   :  { %v1960_v24 = vadd.f32 %v7179_v15, %v7139_v27  ;;  %v9399_v36 = vadd.f32 %v1939_v58, %v9376_v12  ;;  %v2061_v15 = vmul.f32 %v9394_v17, %v9394_v17 }
 0x505   :  { %v1951_v41 = vpop.f32.mrf.mxu1 }
 0x506   :  { %v1952_v47 = vadd.f32 %v1951_v41, %v1790_v29  ;;  %v9382_v0 = vadd.f32 %v1960_v24, %v9354_v8  ;;  %v9385_v29 = vadd.f32 %v1923_v49, %v9360_v13  ;;  %v9426_v41 = vpop.f32.mrf.mxu0  ;;  %v9430_v20 = vmul.f32 %v9399_v36, %v9399_v36 }
 0x507   :  { %v7180_v33 = vpop.f32.mrf.mxu1 }
 0x508   :  { %v1963_v57 = vadd.f32 %v7180_v33, %v7140_v55  ;;  %v9402_v55 = vadd.f32 %v1952_v47, %v9356_v60  ;;  %v2096_v50 = vmul.f32 %v9382_v0, %v9382_v0  ;;  %v2055_v22 = vmul.f32 %v9385_v29, %v9385_v29 }
 0x509   :  { %v1954_v31 = vpop.f32.mrf.mxu1  ;;  %v2072_v33 = vadd.f32 %v9382_v0, %v9371_v42  ;;  %v2080_v7 = vmax.f32 %v9371_v42, %v9382_v0  ;;  %v2088_v5 = vmin.f32 %v9371_v42, %v9382_v0  ;;  %v9460_v0 = vpop.f32.mrf.mxu0 }
 0x50a   :  { %v1955_v39 = vadd.f32 %v1954_v31, %v9327_v44  ;;  %v9415_v2 = vadd.f32 %v1963_v57, %v9358_v38  ;;  %v2104_v54 = vadd.f32 %v2096_v50, %v2056_v53  ;;  %v2070_v57 = vadd.f32 %v9402_v55, %v9374_v21 }
 0x50b   :  { %v7183_v27 = vpop.f32.mrf.mxu1 }
 0x50c   :  { %v1976_v4 = vadd.f32 %v7183_v27, %v9332_v26  ;;  %v2058_v26 = vmul.f32 %v9391_v19, %v9391_v19  ;;  %v9435_v1 = vadd.f32 %v1955_v39, %v9360_v13  ;;  %v2097_v58 = vmul.f32 %v9415_v2, %v9415_v2 }
 0x50d   :  { %v1967_v63 = vpop.f32.mrf.mxu1  ;;  %v2073_v53 = vadd.f32 %v9415_v2, %v9379_v32 }
 0x50e   :  { %v1968_v44 = vadd.f32 %v1967_v63, %v9337_v9  ;;  %v2094_v9 = vmul.f32 %v9402_v55, %v9402_v55  ;;  %v9441_v49 = vadd.f32 %v1976_v4, %v9362_v18 }
 0x50f   :  { %v7184_v11 = vpop.f32.mrf.mxu1 }
 0x510   :  { %v1979_v43 = vadd.f32 %v7184_v11, %v9339_v51  ;;  %12259 = vst [vmem:[#allocation13_spill] sm:$0xff] %v9441_v49  ;;  %v9450_v47 = vadd.f32 %v1968_v44, %v9366_v46  ;;  %v2102_v63 = vadd.f32 %v2094_v9, %v2054_v30  ;;  %v2081_v11 = vmax.f32 %v9379_v32, %v9415_v2 }
 0x511   :  { %v1970_v24 = vpop.f32.mrf.mxu1  ;;  %v2089_v30 = vmin.f32 %v9379_v32, %v9415_v2  ;;  %v2105_v9 = vadd.f32 %v2097_v58, %v2057_v40  ;;  %v2087_v32 = vmin.f32 %v9385_v29, %v9435_v1  ;;  %v7155_v40 = vpop.f32.mrf.mxu0  ;;  %v2076_v58 = vadd.f32 %v9441_v49, %v9388_v6 }
 0x512   :  { %12260 = vst [vmem:[#allocation14_spill] sm:$0xff] %v9450_v47  ;;  %v1971_v51 = vadd.f32 %v1970_v24, %v9341_v52  ;;  %v2095_v52 = vmul.f32 %v9435_v1, %v9435_v1  ;;  %v9467_v4 = vadd.f32 %v1979_v43, %v9368_v61  ;;  %v2071_v24 = vadd.f32 %v9435_v1, %v9385_v29 }
 0x513   :  { %v7187_v31 = vpop.f32.mrf.mxu1  ;;  %v2098_v43 = vmul.f32 %v9450_v47, %v9450_v47  ;;  %v1854_v37 = vpop.f32.mrf.mxu0 }
 0x514   :  { %v1992_v27 = vadd.f32 %v7187_v31, %v9343_v10  ;;  %v2100_v10 = vmul.f32 %v9441_v49, %v9441_v49  ;;  %v9481_v31 = vadd.f32 %v1971_v51, %v9376_v12  ;;  %v2103_v2 = vadd.f32 %v2095_v52, %v2055_v22 }
 0x515   :  { %v1983_v50 = vpop.f32.mrf.mxu1  ;;  %v2101_v51 = vmul.f32 %v9467_v4, %v9467_v4  ;;  %v2106_v22 = vadd.f32 %v2098_v43, %v2058_v26 }
 0x516   :  { %v1984_v44 = vadd.f32 %v1983_v50, %v9345_v59  ;;  %v2112_v39 = vadd.f32 %v1992_v27, %v9354_v8  ;;  %v2079_v50 = vmax.f32 %v9385_v29, %v9435_v1  ;;  %v2108_v27 = vadd.f32 %v2100_v10, %v2060_v35 }
 0x517   :  { %v7188_v42 = vpop.f32.mrf.mxu1  ;;  %v2082_v29 = vmax.f32 %v9391_v19, %v9450_v47  ;;  %v2099_v1 = vmul.f32 %v9481_v31, %v9481_v31  ;;  %v2077_v35 = vadd.f32 %v9467_v4, %v9394_v17  ;;  %v2109_v23 = vadd.f32 %v2101_v51, %v2061_v15 }
 0x518   :  { %v1995_v59 = vadd.f32 %v7188_v42, %v9347_v3  ;;  %v2110_v14 = vadd.f32 %v1984_v44, %v9356_v60  ;;  %v2074_v3 = vadd.f32 %v9450_v47, %v9391_v19  ;;  %v2084_v42 = vmax.f32 %v9388_v6, %v9441_v49  ;;  %v7156_v49 = vpop.f32.mrf.mxu0 }
 0x519   :  { %v1986_v28 = vpop.f32.mrf.mxu1  ;;  %v2144_v10 = vmul.f32 %v2112_v39, %v2112_v39  ;;  %v2075_v26 = vadd.f32 %v9481_v31, %v9399_v36  ;;  %v9519_v51 = vmax.f32 %v2080_v7, %v2112_v39  ;;  %v9521_v47 = vmin.f32 %v2088_v5, %v2112_v39 }
 0x51a   :  { %v2113_v52 = vadd.f32 %v1995_v59, %v9358_v38  ;;  %v1987_v62 = vadd.f32 %v1986_v28, %v9352_v56  ;;  %v2142_v43 = vmul.f32 %v2110_v14, %v2110_v14  ;;  %v2120_v28 = vadd.f32 %v2112_v39, %v2072_v33 }
 0x51b   :  { %v7191_v44 = vpop.f32.mrf.mxu1  ;;  %v2152_v6 = vadd.f32 %v2144_v10, %v2104_v54  ;;  %v12262_v7 = vmin.f32 %v9374_v21, %v9402_v55 }
 0x51c   :  { %v2008_v16 = vadd.f32 %v7191_v44, %v9364_v25  ;;  %v2111_v59 = vadd.f32 %v1987_v62, %v9360_v13  ;;  %v2083_v25 = vmax.f32 %v9399_v36, %v9481_v31  ;;  %v2107_v44 = vadd.f32 %v2099_v1, %v9430_v20 }
 0x51d   :  { %v1999_v48 = vpop.f32.mrf.mxu1  ;;  %v2145_v45 = vmul.f32 %v2113_v52, %v2113_v52  ;;  %v2118_v62 = vadd.f32 %v2110_v14, %v2070_v57  ;;  %v12261_v20 = vmax.f32 %v9374_v21, %v9402_v55  ;;  %v9535_v5 = vmin.f32 %v12262_v7, %v2110_v14 }
 0x51e   :  { %v9513_v56 = vadd.f32 %v2008_v16, %v9362_v18  ;;  %v2000_v19 = vadd.f32 %v1999_v48, %v9396_v34  ;;  %v2150_v48 = vadd.f32 %v2142_v43, %v2102_v63  ;;  %v2143_v34 = vmul.f32 %v2111_v59, %v2111_v59 }
 0x51f   :  { %v7192_v15 = vpop.f32.mrf.mxu1  ;;  %v9530_v1 = vmax.f32 %v12261_v20, %v2110_v14  ;;  %v2121_v54 = vadd.f32 %v2113_v52, %v2073_v53  ;;  %v9542_v57 = vmax.f32 %v2081_v11, %v2113_v52  ;;  %v2153_v39 = vadd.f32 %v2145_v45, %v2105_v9  ;;  %v1857_v20 = vpop.f32.mrf.mxu0 }
 0x520   :  { %v9524_v33 = vadd.f32 %v2000_v19, %v9366_v46  ;;  %v2011_v16 = vadd.f32 %v7192_v15, %v9426_v41  ;;  %v2148_v19 = vmul.f32 %v9513_v56, %v9513_v56  ;;  %v9547_v15 = vmin.f32 %v2089_v30, %v2113_v52 }
 0x521   :  { %v2002_v18 = vpop.f32.mrf.mxu1  ;;  %v2119_v14 = vadd.f32 %v2111_v59, %v2071_v24  ;;  %v9549_v55 = vmax.f32 %v2079_v50, %v2111_v59  ;;  %v9551_v53 = vmin.f32 %v2087_v32, %v2111_v59  ;;  %v2124_v11 = vadd.f32 %v9513_v56, %v2076_v58  ;;  %v7159_v59 = vpop.f32.mrf.mxu0 }
 0x522   :  { %v9540_v41 = vadd.f32 %v2011_v16, %v9368_v61  ;;  %v2146_v63 = vmul.f32 %v9524_v33, %v9524_v33  ;;  %v2003_v10 = vadd.f32 %v2002_v18, %v9460_v0  ;;  %v2151_v16 = vadd.f32 %v2143_v34, %v2103_v2 }
 0x523   :  { %v7195_v43 = vpop.f32.mrf.mxu1  ;;  %v9559_v0 = vadd.f32 %v2148_v19, %v2108_v27  ;;  %v9565_v50 = vmax.f32 %v2084_v42, %v9513_v56  ;;  %v2122_v32 = vadd.f32 %v9524_v33, %v2074_v3  ;;  %v9573_v52 = vmax.f32 %v2082_v29, %v9524_v33 }
 0x524   :  { %v2024_v21 = vadd.f32 %v7195_v43, %v7155_v40  ;;  %v2149_v45 = vmul.f32 %v9540_v41, %v9540_v41  ;;  %v9557_v9 = vadd.f32 %v2003_v10, %v9376_v12  ;;  %v9568_v40 = vadd.f32 %v2146_v63, %v2106_v22 }
 0x525   :  { %v2015_v18 = vpop.f32.mrf.mxu1  ;;  %v9582_v3 = vadd.f32 %v9540_v41, %v2077_v35 }
 0x526   :  { %v9562_v30 = vadd.f32 %v2024_v21, %v9354_v8  ;;  %v2016_v24 = vadd.f32 %v2015_v18, %v1854_v37  ;;  %v2147_v2 = vmul.f32 %v9557_v9, %v9557_v9  ;;  %v9584_v22 = vadd.f32 %v2149_v45, %v2109_v23 }
 0x527   :  { %v7196_v58 = vpop.f32.mrf.mxu1  ;;  %v9587_v34 = vadd.f32 %v9557_v9, %v2075_v26  ;;  %v9606_v43 = vmax.f32 %v2083_v25, %v9557_v9 }
 0x528   :  { %v2168_v27 = vadd.f32 %v9562_v30, %v2120_v28  ;;  %v2192_v8 = vmul.f32 %v9562_v30, %v9562_v30  ;;  %v9579_v37 = vadd.f32 %v2016_v24, %v9356_v60  ;;  %v2027_v42 = vadd.f32 %v7196_v58, %v7156_v49 }
 0x529   :  { %v2018_v29 = vpop.f32.mrf.mxu1  ;;  %v12263_v28 = vmax.f32 %v9394_v17, %v9467_v4  ;;  %v9600_v23 = vadd.f32 %v2147_v2, %v2107_v44 }
 0x52a   :  { %v2200_v19 = vadd.f32 %v2192_v8, %v2152_v6  ;;  %v9595_v60 = vmul.f32 0.25, %v2168_v27  ;;  %v2166_v49 = vadd.f32 %v9579_v37, %v2118_v62  ;;  %v2190_v35 = vmul.f32 %v9579_v37, %v9579_v37  ;;  %v1870_v62 = vpop.f32.mrf.mxu0 }
 0x52b   :  { %v9593_v7 = vmax.f32 %v12263_v28, %v9540_v41  ;;  %v9603_v26 = vadd.f32 %v2027_v42, %v9358_v38  ;;  %v2019_v63 = vadd.f32 %v2018_v29, %v1857_v20  ;;  %v7199_v10 = vpop.f32.mrf.mxu1 }
 0x52c   :  { %v2216_v21 = vmul.f32 0.25, %v2200_v19  ;;  %v2224_v6 = vmul.f32 %v9595_v60, %v9595_v60  ;;  %v2198_v45 = vadd.f32 %v2190_v35, %v2150_v48  ;;  %v9610_v18 = vmul.f32 0.25, %v2166_v49  ;;  %v12264_v19 = vld [vmem:[#allocation6_spill] sm:$0xff] }
 0x52d   :  { %v2169_v24 = vadd.f32 %v9603_v26, %v2121_v54  ;;  %v2193_v44 = vmul.f32 %v9603_v26, %v9603_v26  ;;  %v9616_v38 = vadd.f32 %v2019_v63, %v9360_v13  ;;  %v2040_v20 = vadd.f32 %v7199_v10, %v7159_v59  ;;  %v2031_v2 = vpop.f32.mrf.mxu1 }
 0x52e   :  { %v2232_v25 = vsub.f32 %v2216_v21, %v2224_v6  ;;  %v2214_v58 = vmul.f32 0.25, %v2198_v45  ;;  %v2222_v27 = vmul.f32 %v9610_v18, %v9610_v18  ;;  %v2032_v8 = vadd.f32 %v2031_v2, %v1870_v62  ;;  %v7160_v62 = vpop.f32.mrf.mxu0 }
 0x52f   :  { %v2201_v48 = vadd.f32 %v2193_v44, %v2153_v39  ;;  %v9620_v42 = vmul.f32 0.25, %v2169_v24  ;;  %v2167_v29 = vadd.f32 %v9616_v38, %v2119_v14  ;;  %v2191_v54 = vmul.f32 %v9616_v38, %v9616_v38  ;;  %v7200_v14 = vpop.f32.mrf.mxu1 }
 0x530   :  { %v2230_v28 = vsub.f32 %v2214_v58, %v2222_v27  ;;  %v9626_v13 = vadd.f32 %v2040_v20, %v12264_v19  ;;  %v9629_v59 = vadd.f32 %v2032_v8, %v9366_v46  ;;  %v2176_v49 = vmax.f32 %v9519_v51, %v9562_v30 }
 0x531   :  { %v2217_v35 = vmul.f32 0.25, %v2201_v48  ;;  %v2225_v39 = vmul.f32 %v9620_v42, %v9620_v42  ;;  %v2199_v63 = vadd.f32 %v2191_v54, %v2151_v16  ;;  %v9635_v10 = vmul.f32 0.25, %v2167_v29 }
 0x532   :  { %v2240_v21 = vmax.f32 %v2232_v25, 0.0  ;;  %v2172_v6 = vadd.f32 %v9626_v13, %v2124_v11  ;;  %v2196_v45 = vmul.f32 %v9626_v13, %v9626_v13  ;;  %v2184_v46 = vmin.f32 %v9521_v47, %v9562_v30  ;;  %v8008_v47 = vld [vmem:[%s12158_s8 + $0x58] sm:$0xff]  }
 0x533   :  { %v2233_v24 = vsub.f32 %v2217_v35, %v2225_v39  ;;  %v2215_v51 = vmul.f32 0.25, %v2199_v63  ;;  %v2223_v44 = vmul.f32 %v9635_v10, %v9635_v10  ;;  %v2170_v16 = vadd.f32 %v9629_v59, %v2122_v32  ;;  %v2034_v32 = vpop.f32.mrf.mxu1  ;;  %7221 = vmatprep.subr.bf16.mxu1 %v8008_v47 }
 0x534   :  { %v2204_v20 = vadd.f32 %v2196_v45, %v9559_v0  ;;  %v9646_v2 = vmul.f32 0.25, %v2172_v6  ;;  %v2194_v11 = vmul.f32 %v9629_v59, %v9629_v59  ;;  %v2174_v25 = vmax.f32 %v9530_v1, %v9579_v37  ;;  %v1873_v1 = vpop.f32.mrf.mxu0  ;;  %7222 = vmatpush3.bf16.msra.mxu1 %v8008_v47 }
 0x535   :  { %v2238_v30 = vmax.f32 %v2230_v28, 0.0  ;;  %v2241_v58 = vmax.f32 %v2233_v24, 0.0  ;;  %v9655_v27 = vmul.f32 0.25, %v2170_v16  ;;  %v2043_v8 = vadd.f32 %v7200_v14, %v7160_v62 }
 0x536   :  { %v2220_v48 = vmul.f32 0.25, %v2204_v20  ;;  %v2228_v0 = vmul.f32 %v9646_v2, %v9646_v2  ;;  %v2202_v29 = vadd.f32 %v2194_v11, %v9568_v40  ;;  %v2177_v54 = vmax.f32 %v9542_v57, %v9603_v26 }
 0x537   :  { %v9662_v19 = vadd.f32 1e-05, %v2240_v21  ;;  %v2231_v35 = vsub.f32 %v2215_v51, %v2223_v44  ;;  %v9665_v28 = vadd.f32 %v2043_v8, %v9368_v61  ;;  %v2182_v39 = vmin.f32 %v9535_v5, %v9579_v37 }
 0x538   :  { %v2236_v63 = vsub.f32 %v2220_v48, %v2228_v0  ;;  %v2226_v14 = vmul.f32 %v9655_v27, %v9655_v27  ;;  %v7708_v40 = vpack.i.bf16 %v2177_v54, %v2176_v49  ;;  %v2035_v6 = vadd.f32 %v2034_v32, %v1873_v1 }
 0x539   :  { %v2218_v45 = vmul.f32 0.25, %v2202_v29  ;;  %v2173_v57 = vadd.f32 %v9665_v28, %v9582_v3  ;;  %v2197_v21 = vmul.f32 %v9665_v28, %v9665_v28  ;;  %v2175_v61 = vmax.f32 %v9549_v55, %v9616_v38  ;;  %v8009_v3 = vld [vmem:[%s12158_s8 + $0x50] sm:$0xff]   ;;  %v8010_v55 = vld [vmem:[%s12158_s8 + $0x48] sm:$0xff]  }
 0x53a   :  { %v9677_v62 = vadd.f32 1e-05, %v2238_v30  ;;  %v9679_v5 = vadd.f32 1e-05, %v2241_v58  ;;  %7709 = vrot.lane.b32.xlu1 %v7708_v40, %s8277_s26  ;;  %v9683_v37 = vadd.f32 %v2035_v6, %v9376_v12  ;;  %v2185_v49 = vmin.f32 %v9547_v15, %v9603_v26  ;;  %7223 = vmatprep.subr.bf16.mxu1 %v8009_v3  ;;  %v12266_v40 = vld [vmem:[#allocation12_spill] sm:$0xff] }
 0x53b   :  { %v2205_v24 = vadd.f32 %v2197_v21, %v9584_v22  ;;  %v9694_v51 = vmul.f32 0.25, %v2173_v57  ;;  %v7718_v44 = vpack.i.bf16 %v2175_v61, %v2174_v25  ;;  %v2183_v12 = vmin.f32 %v9551_v53, %v9616_v38  ;;  %7224 = vmatpush3.bf16.msra.mxu1 %v8009_v3  ;;  %v12267_v57 = vld [vmem:[#allocation14_spill] sm:$0xff]  ;;  %v12268_v21 = vld [vmem:[#allocation8_spill] sm:$0xff] }
 0x53c   :  { %v2239_v16 = vmax.f32 %v2231_v35, 0.0  ;;  %v2244_v20 = vmax.f32 %v2236_v63, 0.0  ;;  %v2171_v15 = vadd.f32 %v9683_v37, %v9587_v34  ;;  %v2195_v26 = vmul.f32 %v9683_v37, %v9683_v37  ;;  %7225 = vmatprep.subr.bf16.mxu1 %v8010_v55 }
 0x53d   :  { %v2234_v11 = vsub.f32 %v2218_v45, %v2226_v14  ;;  %v2221_v47 = vmul.f32 0.25, %v2205_v24  ;;  %v2229_v22 = vmul.f32 %v9694_v51, %v9694_v51  ;;  %7719 = vrot.lane.b32.xlu0 %v7718_v44, %s8277_s26  ;;  %v7713_v25 = vpack.i.bf16 %v2185_v49, %v2184_v46  ;;  %v12265_v14 = vld [vmem:[#allocation13_spill] sm:$0xff] }
 0x53e   :  { %v2203_v53 = vadd.f32 %v2195_v26, %v9600_v23  ;;  %v9706_v38 = vmul.f32 0.25, %v2171_v15  ;;  %v7723_v30 = vpack.i.bf16 %v2183_v12, %v2182_v39  ;;  %v2180_v34 = vmax.f32 %v9565_v50, %v9626_v13 }
 0x53f   :  { %v2237_v58 = vsub.f32 %v2221_v47, %v2229_v22  ;;  %7714 = vrot.lane.b32.xlu1 %v7713_v25, %s8276_s25  ;;  %v2181_v8 = vmax.f32 %v9593_v7, %v9665_v28  ;;  %v2178_v32 = vmax.f32 %v9573_v52, %v9629_v59  ;;  %v2179_v46 = vmax.f32 %v9606_v43, %v9683_v37 }
 0x540   :  { %v9717_v23 = vadd.f32 1e-05, %v2239_v16  ;;  %v2219_v48 = vmul.f32 0.25, %v2203_v53  ;;  %v2227_v0 = vmul.f32 %v9706_v38, %v9706_v38  ;;  %8076 = vrsqrt.f32 %v9662_v19  ;;  %7226 = vmatpush3.bf16.msra.mxu1 %v8010_v55  ;;  %v8011_v55 = vld [vmem:[%s12158_s8 + $0x40] sm:$0xff]  }
 0x541   :  { %v2242_v50 = vmax.f32 %v2234_v11, 0.0  ;;  %v2245_v29 = vmax.f32 %v2237_v58, 0.0  ;;  %7724 = vrot.lane.b32.xlu0 %v7723_v30, %s8276_s25  ;;  %v7728_v54 = vpack.i.bf16 %v2181_v8, %v2180_v34  ;;  %v7733_v7 = vpack.i.bf16 %v2179_v46, %v2178_v32  ;;  %7227 = vmatprep.subr.bf16.mxu1 %v8011_v55 }
 0x542   :  { %v2235_v1 = vsub.f32 %v2219_v48, %v2227_v0  ;;  %8078 = vrsqrt.f32 %v9679_v5  ;;  %v9724_v52 = vadd.f32 1e-05, %v2244_v20  ;;  %v2092_v6 = vmin.f32 %v12266_v40, %v12265_v14 }
 0x543   :  { %7729 = vrot.lane.b32.xlu1 %v7728_v54, %s8277_s26  ;;  %8080 = vrsqrt.f32 %v9677_v62  ;;  %v9728_v43 = vadd.f32 1e-05, %v2245_v29  ;;  %v9730_v39 = vadd.f32 1e-05, %v2242_v50  ;;  %v2093_v45 = vmin.f32 %v9394_v17, %v9467_v4 }
 0x544   :  { %v2243_v35 = vmax.f32 %v2235_v1, 0.0  ;;  %8082 = vrsqrt.f32 %v9717_v23  ;;  %v2090_v61 = vmin.f32 %v12268_v21, %v12267_v57  ;;  %v2091_v49 = vmin.f32 %v9399_v36, %v9481_v31  ;;  %7228 = vmatpush3.bf16.msra.mxu1 %v8011_v55 }
 0x545   :  { %7734 = vrot.lane.b32.xlu0 %v7733_v7, %s8277_s26  ;;  %8084 = vrsqrt.f32 %v9724_v52  ;;  %v2140_v3 = vmin.f32 %v2092_v6, %v9513_v56  ;;  %vm2270_vm5 = vcmp.eq.f32.partialorder %v9662_v19, inf  ;;  %v2141_v44 = vmin.f32 %v2093_v45, %v9540_v41 }
 0x546   :  { %v9734_v63 = vadd.f32 1e-05, %v2243_v35  ;;  %8086 = vrsqrt.f32 %v9728_v43  ;;  %v9755_v12 = vmin.f32 %v2090_v61, %v9524_v33  ;;  %v9758_v17 = vmin.f32 %v2091_v49, %v9557_v9  ;;  %v8012_v61 = vld [vmem:[%s12151_s3 + $0x28] sm:$0xff]  }
 0x547   :  { %8088 = vrsqrt.f32 %v9730_v39  ;;  %vm2272_vm6 = vcmp.eq.f32.partialorder %v9662_v19, 0.0  ;;  %v2273_v36 = vand.u32 2147483648, %v9662_v19  ;;  %vm2277_vm7 = vcmp.eq.f32.partialorder %v9679_v5, inf  ;;  %7237 = vmatprep.subr.bf16.mxu0 %v8012_v61 }
 0x548   :  { %8090 = vrsqrt.f32 %v9734_v63  ;;  %vm2279_vm8 = vcmp.eq.f32.partialorder %v9679_v5, 0.0  ;;  %v2280_v56 = vand.u32 2147483648, %v9679_v5  ;;  %vm2256_vm9 = vcmp.eq.f32.partialorder %v9677_v62, inf  ;;  %7238 = vmatpush3.bf16.msra.mxu0 %v8012_v61 }
 0x549   :  { %vm2258_vm10 = vcmp.eq.f32.partialorder %v9677_v62, 0.0  ;;  %v2259_v16 = vand.u32 2147483648, %v9677_v62  ;;  %v2189_v20 = vmin.f32 %v2141_v44, %v9665_v28  ;;  %vm2263_vm11 = vcmp.eq.f32.partialorder %v9717_v23, inf }
 0x54a   :  { %vm2265_vm12 = vcmp.eq.f32.partialorder %v9717_v23, 0.0  ;;  %v2266_v26 = vand.u32 2147483648, %v9717_v23  ;;  %v2188_v22 = vmin.f32 %v2140_v3, %v9626_v13  ;;  %v2186_v25 = vmin.f32 %v9755_v12, %v9629_v59 }
 0x54b   :  { %v2187_v28 = vmin.f32 %v9758_v17, %v9683_v37  ;;  %vm2298_vm13 = vcmp.eq.f32.partialorder %v9724_v52, inf  ;;  %vm2300_vm14 = vcmp.eq.f32.partialorder %v9724_v52, 0.0  ;;  %v2301_v37 = vand.u32 2147483648, %v9724_v52 }
 0x54c   :  { %v7753_v32 = vpack.i.bf16 %v2189_v20, %v2188_v22  ;;  %vm2305_vm15 = vcmp.eq.f32.partialorder %v9728_v43, inf  ;;  %vm2307_vm2 = vcmp.eq.f32.partialorder %v9728_v43, 0.0  ;;  %v2308_v1 = vand.u32 2147483648, %v9728_v43 }
 0x54d   :  { %v8077_v24 = vpop.eup %8076  ;;  %vm2284_vm3 = vcmp.eq.f32.partialorder %v9730_v39, inf  ;;  %v2294_v45 = vand.u32 2147483648, %v9734_v63 }
 0x54e   :  { %v2269_v4 = vmul.f32 %v8077_v24, %v9662_v19 }
 0x54f   :  { %v8079_v31 = vpop.eup %8078 }
 0x550   :  { %v8081_v33 = vpop.eup %8080  ;;  %v2271_v41 = vsel %vm2270_vm5, %v9662_v19, %v2269_v4  ;;  %v2276_v9 = vmul.f32 %v8079_v31, %v9679_v5  ;;  %vm2291_vm5 = vcmp.eq.f32.partialorder %v9734_v63, inf }
 0x551   :  { %v2255_v15 = vmul.f32 %v8081_v33, %v9677_v62  ;;  %v8083_v11 = vpop.eup %8082  ;;  %v2274_v53 = vsel %vm2272_vm6, %v2273_v36, %v2271_v41  ;;  %vm2293_vm6 = vcmp.eq.f32.partialorder %v9734_v63, 0.0 }
 0x552   :  { %v2278_v47 = vsel %vm2277_vm7, %v9679_v5, %v2276_v9  ;;  %v2262_v58 = vmul.f32 %v8083_v11, %v9717_v23  ;;  %v8085_v8 = vpop.eup %8084  ;;  %vm2286_vm7 = vcmp.eq.f32.partialorder %v9730_v39, 0.0 }
 0x553   :  { %v2281_v30 = vsel %vm2279_vm8, %v2280_v56, %v2278_v47  ;;  %v2257_v34 = vsel %vm2256_vm9, %v9677_v62, %v2255_v15  ;;  %v8087_v59 = vpop.eup %8086  ;;  %v2297_v5 = vmul.f32 %v8085_v8, %v9724_v52 }
 0x554   :  { %v7738_v13 = vpack.i.bf16 %v2281_v30, %v2274_v53  ;;  %v2264_v19 = vsel %vm2263_vm11, %v9717_v23, %v2262_v58  ;;  %v8089_v46 = vpop.eup %8088  ;;  %v2260_v48 = vsel %vm2258_vm10, %v2259_v16, %v2257_v34  ;;  %v2304_v50 = vmul.f32 %v8087_v59, %v9728_v43 }
 0x555   :  { %v2267_v0 = vsel %vm2265_vm12, %v2266_v26, %v2264_v19  ;;  %v8091_v29 = vpop.eup %8090  ;;  %v2299_v7 = vsel %vm2298_vm13, %v9724_v52, %v2297_v5  ;;  %v2283_v35 = vmul.f32 %v8089_v46, %v9730_v39  ;;  %v7748_v52 = vpack.i.bf16 %v2187_v28, %v2186_v25 }
 0x556   :  { %7739 = vrot.lane.b32.xlu1 %v7738_v13, %s8278_s29  ;;  %v7743_v54 = vpack.i.bf16 %v2267_v0, %v2260_v48  ;;  %v2306_v14 = vsel %vm2305_vm15, %v9728_v43, %v2304_v50  ;;  %v2290_v62 = vmul.f32 %v8091_v29, %v9734_v63  ;;  %v2302_v23 = vsel %vm2300_vm14, %v2301_v37, %v2299_v7 }
 0x557   :  { %v2309_v40 = vsel %vm2307_vm2, %v2308_v1, %v2306_v14  ;;  %v2285_v6 = vsel %vm2284_vm3, %v9730_v39, %v2283_v35  ;;  %v2287_v43 = vand.u32 2147483648, %v9730_v39 }
 0x558   :  { %7744 = vrot.lane.b32.xlu0 %v7743_v54, %s8278_s29  ;;  %v7763_v57 = vpack.i.bf16 %v2309_v40, %v2302_v23  ;;  %v2292_v21 = vsel %vm2291_vm5, %v9734_v63, %v2290_v62 }
 0x559   :  { %v2295_v49 = vsel %vm2293_vm6, %v2294_v45, %v2292_v21  ;;  %v2288_v3 = vsel %vm2286_vm7, %v2287_v43, %v2285_v6 }
 0x55a   :  { %7754 = vrot.lane.b32.xlu1 %v7753_v32, %s8276_s25  ;;  %v7758_v55 = vpack.i.bf16 %v2295_v49, %v2288_v3 }
 0x55c   :  { %7749 = vrot.lane.b32.xlu0 %v7748_v52, %s8276_s25 }
 0x55e   :  { %7764 = vrot.lane.b32.xlu1 %v7763_v57, %s8278_s29 }
 0x560   :  { %7759 = vrot.lane.b32.xlu0 %v7758_v55, %s8278_s29 }
 0x5ac   :  { %v7710_v24 = vpop.permute.xlu1 %7709 }
 0x5ad   :  { %v7712_v4 = vunpack.i.h.bf16 %v7710_v24  ;;  %v7711_v36 = vunpack.i.l.bf16 %v7710_v24  ;;  %v8013_v24 = vld [vmem:[%s12151_s3 + $0x20] sm:$0xff]  }
 0x5ae   :  { %7239 = vmatprep.subr.bf16.mxu0 %v8013_v24 }
 0x5af   :  { %v7720_v63 = vpop.permute.xlu0 %7719  ;;  %v2408_v11 = vsel %vm128_vm0, %v9595_v60, %v7711_v36  ;;  %v2409_v47 = vsel %vm128_vm0, %v9620_v42, %v7712_v4  ;;  %7240 = vmatpush3.bf16.msra.mxu0 %v8013_v24  ;;  %v8184_v24 = vld [vmem:[%s12155_s2 + $0x18] sm:$0xff]  }
 0x5b0   :  { %v7722_v31 = vunpack.i.h.bf16 %v7720_v63  ;;  %v7721_v39 = vunpack.i.l.bf16 %v7720_v63  ;;  %v8014_v63 = vld [vmem:[%s12153_s4 + $0x28] sm:$0xff]  }
 0x5b1   :  { %v7715_v44 = vpop.permute.xlu1 %7714  ;;  %7249 = vmatprep.subr.bf16.mxu1 %v8014_v63 }
 0x5b2   :  { %v7717_v33 = vunpack.i.h.bf16 %v7715_v44  ;;  %v7716_v41 = vunpack.i.l.bf16 %v7715_v44  ;;  %v2407_v22 = vsel %vm128_vm0, %v9635_v10, %v7722_v31  ;;  %v2406_v25 = vsel %vm128_vm0, %v9610_v18, %v7721_v39  ;;  %v8015_v44 = vld [vmem:[%s12153_s4 + $0x20] sm:$0xff]  }
 0x5b3   :  { %v7725_v12 = vpop.permute.xlu0 %7724 }
 0x5b4   :  { %v7727_v16 = vunpack.i.h.bf16 %v7725_v12  ;;  %v7726_v20 = vunpack.i.l.bf16 %v7725_v12  ;;  %v2416_v53 = vsel %vm683_vm1, %v2408_v11, %v7716_v41  ;;  %v2417_v30 = vsel %vm683_vm1, %v2409_v47, %v7717_v33  ;;  %v8016_v12 = vld [vmem:[%s12154_s5 + $0x28] sm:$0xff]   ;;  %v6306_v33 = vld [vmem:[%s12160_s9 + $0x1] ss:$0 sm:$0xff] }
 0x5b5   :  { %v7730_v17 = vpop.permute.xlu1 %7729  ;;  %7261 = vmatprep.subr.bf16.mxu0 %v8016_v12 }
 0x5b6   :  { %v2414_v13 = vsel %vm683_vm1, %v2406_v25, %v7726_v20  ;;  %v2415_v60 = vsel %vm683_vm1, %v2407_v22, %v7727_v16  ;;  %v7732_v10 = vunpack.i.h.bf16 %v7730_v17  ;;  %v7731_v19 = vunpack.i.l.bf16 %v7730_v17  ;;  %v7207_v17 = vpop.f32.mrf.mxu0 }
 0x5b7   :  { %v7735_v56 = vpop.permute.xlu0 %7734 }
 0x5b8   :  { %v7737_v5 = vunpack.i.h.bf16 %v7735_v56  ;;  %v7736_v37 = vunpack.i.l.bf16 %v7735_v56  ;;  %v2412_v62 = vsel %vm128_vm0, %v9646_v2, %v7731_v19  ;;  %v2413_v23 = vsel %vm128_vm0, %v9694_v51, %v7732_v10  ;;  %v2493_v4 = vpop.f32.mrf.mxu0 }
 0x5b9   :  { %v2494_v16 = vadd.f32 %v6306_v33, %v2493_v4  ;;  %v8189_v4 = vld [vmem:[%s12155_s2 + $0x40] sm:$0xff]  }
 0x5ba   :  { %v2411_v40 = vsel %vm128_vm0, %v9706_v38, %v7737_v5  ;;  %v2410_v6 = vsel %vm128_vm0, %v9655_v27, %v7736_v37  ;;  %v7208_v36 = vpop.f32.mrf.mxu0 }
 0x5bb   :  { %v2505_v20 = vadd.f32 %v7208_v36, %v6306_v33  ;;  %v8190_v36 = vld [vmem:[%s12155_s2 + $0x48] sm:$0xff]  }
 0x5bc   :  { %v2496_v31 = vpop.f32.mrf.mxu0 }
 0x5bd   :  { %v2497_v11 = vadd.f32 %v6306_v33, %v2496_v31  ;;  %v8191_v31 = vld [vmem:[%s12155_s2 + $0x50] sm:$0xff]  }
 0x5be   :  { %v7211_v39 = vpop.f32.mrf.mxu0 }
 0x5c0   :  { %v2509_v41 = vpop.f32.mrf.mxu0 }
 0x5c1   :  { %v2510_v5 = vadd.f32 %v6306_v33, %v2509_v41  ;;  %v8195_v41 = vld [vmem:[%s12155_s2 + $0x70] sm:$0xff]  }
 0x5c2   :  { %v7212_v25 = vpop.f32.mrf.mxu0 }
 0x5c3   :  { %v2521_v37 = vadd.f32 %v7212_v25, %v6306_v33 }
 0x5c4   :  { %v2512_v10 = vpop.f32.mrf.mxu0 }
 0x5c8   :  { %v7740_v9 = vpop.permute.xlu1 %7739 }
 0x5c9   :  { %v7742_v15 = vunpack.i.h.bf16 %v7740_v9  ;;  %v7741_v26 = vunpack.i.l.bf16 %v7740_v9 }
 0x5ca   :  { %v7745_v28 = vpop.permute.xlu0 %7744 }
 0x5cb   :  { %v7747_v34 = vunpack.i.h.bf16 %v7745_v28  ;;  %v7746_v58 = vunpack.i.l.bf16 %v7745_v28  ;;  %v2425_v42 = vsel %vm1269_vm4, %v2417_v30, %v7742_v15  ;;  %v2424_v32 = vsel %vm1269_vm4, %v2416_v53, %v7741_v26 }
 0x5cc   :  { %v7755_v8 = vpop.permute.xlu1 %7754  ;;  %v2431_v0 = vpack.c.bf16 %v2425_v42, %v2424_v32  ;;  %v2502_v15 = vadd.f32 %v7207_v17, %v6306_v33  ;;  %v12273_v42 = vld [vmem:[#allocation4_spill] sm:$0xff]  ;;  %v8188_v17 = vld [vmem:[%s12155_s2 + $0x38] sm:$0xff]  }
 0x5cd   :  { %v2422_v59 = vsel %vm1269_vm4, %v2414_v13, %v7746_v58  ;;  %v2423_v18 = vsel %vm1269_vm4, %v2415_v60, %v7747_v34  ;;  %v7757_v50 = vunpack.i.h.bf16 %v7755_v8  ;;  %v7756_v29 = vunpack.i.l.bf16 %v7755_v8  ;;  %v12269_v34 = vld [vmem:[#allocation2_spill] sm:$0xff]  ;;  %v12271_v13 = vld [vmem:[#allocation3_spill] sm:$0xff] }
 0x5ce   :  { %v7750_v46 = vpop.permute.xlu0 %7749  ;;  %v2430_v48 = vpack.c.bf16 %v2423_v18, %v2422_v59  ;;  %v12275_v59 = vld [vmem:[#allocation9_spill] sm:$0xff] }
 0x5cf   :  { %v7752_v7 = vunpack.i.h.bf16 %v7750_v46  ;;  %v7751_v1 = vunpack.i.l.bf16 %v7750_v46  ;;  %v2420_v57 = vsel %vm683_vm1, %v2412_v62, %v7756_v29  ;;  %v2421_v43 = vsel %vm683_vm1, %v2413_v23, %v7757_v50  ;;  %v8017_v29 = vld [vmem:[%s12154_s5 + $0x20] sm:$0xff]   ;;  %v12277_v23 = vld [vmem:[#allocation5_spill] sm:$0xff] }
 0x5d0   :  { %v7765_v54 = vpop.permute.xlu1 %7764  ;;  %7229 = vmatprep.mubr.bf16.mxu1 %v2430_v48  ;;  %v2518_v48 = vadd.f32 %v7211_v39, %v6306_v33  ;;  %v8192_v39 = vld [vmem:[%s12155_s2 + $0x58] sm:$0xff]  }
 0x5d1   :  { %v7767_v35 = vunpack.i.h.bf16 %v7765_v54  ;;  %v7766_v14 = vunpack.i.l.bf16 %v7765_v54  ;;  %7230 = vmatmul.mubr.bf16.vlgmr.msra.gmra.mxu1 %v2431_v0  ;;  %v2419_v52 = vsel %vm683_vm1, %v2411_v40, %v7752_v7  ;;  %v2418_v2 = vsel %vm683_vm1, %v2410_v6, %v7751_v1  ;;  %v8018_v6 = vld [vmem:[%s12157_s7 + $0x28] sm:$0xff]  }
 0x5d2   :  { %v7760_v45 = vpop.permute.xlu0 %7759  ;;  %7250 = vmatpush3.bf16.msra.mxu1 %v8014_v63  ;;  %v2513_v54 = vadd.f32 %v6306_v33, %v2512_v10  ;;  %v8185_v63 = vld [vmem:[%s12155_s2 + $0x20] sm:$0xff]   ;;  %v8194_v33 = vld [vmem:[%s12155_s2 + $0x68] sm:$0xff]  }
 0x5d3   :  { %v7762_v21 = vunpack.i.h.bf16 %v7760_v45  ;;  %v7761_v61 = vunpack.i.l.bf16 %v7760_v45  ;;  %v2428_v49 = vsel %vm1269_vm4, %v2420_v57, %v7766_v14  ;;  %v2429_v51 = vsel %vm1269_vm4, %v2421_v43, %v7767_v35  ;;  %7251 = vmatprep.subr.bf16.mxu1 %v8015_v44  ;;  %v12279_v45 = vld [vmem:[#allocation11_spill] sm:$0xff]  ;;  %v8200_v10 = vld [vmem:[%s12156_s1 + $0x20] sm:$0xff]  }
 0x5d4   :  { %v2433_v55 = vpack.c.bf16 %v2429_v51, %v2428_v49  ;;  %v12281_v43 = vld [vmem:[#allocation7_spill] sm:$0xff]  ;;  %v8180_v51 = vld [vmem:[%s12155_s2] sm:$0xff]  }
 0x5d5   :  { %v2426_v38 = vsel %vm1269_vm4, %v2418_v2, %v7761_v61  ;;  %v2427_v3 = vsel %vm1269_vm4, %v2419_v52, %v7762_v21  ;;  %v12283_v61 = vld [vmem:[#allocation10_spill] sm:$0xff] }
 0x5d6   :  { %v2432_v27 = vpack.c.bf16 %v2427_v3, %v2426_v38  ;;  %7252 = vmatpush3.bf16.msra.mxu1 %v8015_v44  ;;  %v8181_v38 = vld [vmem:[%s12156_s1] sm:$0xff]   ;;  %v8186_v44 = vld [vmem:[%s12155_s2 + $0x28] sm:$0xff]  }
 0x5d7   :  { %v8019_v3 = vld [vmem:[%s12157_s7 + $0x20] sm:$0xff]  }
 0x5d8   :  { %7233 = vmatprep.mubr.bf16.mxu1 %v2432_v27  ;;  %v8182_v27 = vld [vmem:[%s12155_s2 + $0x8] sm:$0xff]  }
 0x5d9   :  { %7234 = vmatmul.mubr.bf16.gmra.mxu1 %v2433_v55  ;;  %v8183_v55 = vld [vmem:[%s12155_s2 + $0x10] sm:$0xff]  }
 0x691   :  { %v7231_v56 = vpop.f32.mrf.mxu1 }
 0x692   :  { %v2656_v28 = vadd.f32 %v7231_v56, %v2502_v15  ;;  %v8193_v56 = vld [vmem:[%s12155_s2 + $0x60] sm:$0xff]  }
 0x693   :  { %v2623_v9 = vpop.f32.mrf.mxu1 }
 0x694   :  { %v2654_v47 = vadd.f32 %v2623_v9, %v2494_v16  ;;  %v9889_v18 = vadd.f32 %v2656_v28, %v12275_v59  ;;  %v8196_v9 = vld [vmem:[%s12155_s2 + $0x78] sm:$0xff]   ;;  %v8201_v59 = vld [vmem:[%s12156_s1 + $0x28] sm:$0xff]  }
 0x695   :  { %v7232_v26 = vpop.f32.mrf.mxu1 }
 0x696   :  { %v2657_v22 = vadd.f32 %v7232_v26, %v2505_v20  ;;  %v9883_v60 = vadd.f32 %v2654_v47, %v12271_v13  ;;  %12276 = vst [vmem:[#allocation14_spill] sm:$0xff] %v9889_v18  ;;  %v8198_v13 = vld [vmem:[%s12156_s1 + $0x10] sm:$0xff]  }
 0x697   :  { %v2626_v53 = vpop.f32.mrf.mxu1 }
 0x698   :  { %v2655_v30 = vadd.f32 %v2626_v53, %v2497_v11  ;;  %v9880_v58 = vadd.f32 %v2657_v22, %v12269_v34  ;;  %12272 = vst [vmem:[#allocation13_spill] sm:$0xff] %v9883_v60 }
 0x699   :  { %v7235_v8 = vpop.f32.mrf.mxu1 }
 0x69a   :  { %12270 = vst [vmem:[#allocation6_spill] sm:$0xff] %v9880_v58  ;;  %v9886_v32 = vadd.f32 %v2655_v30, %v12273_v42  ;;  %v9897_v0 = vpack.c.bf16 %v9880_v58, %v9889_v18  ;;  %v2660_v35 = vadd.f32 %v7235_v8, %v2518_v48  ;;  %v8197_v8 = vld [vmem:[%s12156_s1 + $0x8] sm:$0xff]   ;;  %v8199_v42 = vld [vmem:[%s12156_s1 + $0x18] sm:$0xff]   ;;  %v8206_v48 = vld [vmem:[%s12156_s1 + $0x50] sm:$0xff]  }
 0x69b   :  { %v2639_v19 = vpop.f32.mrf.mxu1 }
 0x69c   :  { %12274 = vst [vmem:[#allocation12_spill] sm:$0xff] %v9886_v32  ;;  %v9893_v46 = vpack.c.bf16 %v9886_v32, %v9883_v60  ;;  %v2658_v7 = vadd.f32 %v2639_v19, %v2510_v5  ;;  %v9923_v52 = vadd.f32 %v2660_v35, %v12283_v61  ;;  %v8202_v19 = vld [vmem:[%s12156_s1 + $0x30] sm:$0xff]   ;;  %v8203_v5 = vld [vmem:[%s12156_s1 + $0x38] sm:$0xff]  }
 0x69d   :  { %v7236_v50 = vpop.f32.mrf.mxu1 }
 0x69e   :  { %v2661_v1 = vadd.f32 %v7236_v50, %v2521_v37  ;;  %7241 = vmatprep.mubr.msk.bf16.mxu0 %vm128_vm0, %v9893_v46  ;;  %7253 = vmatprep.mubr.msk.bf16.mxu1 %vm128_vm0, %v9893_v46  ;;  %v9917_v57 = vadd.f32 %v2658_v7, %v12279_v45  ;;  %12284 = vst [vmem:[#allocation4_spill] sm:$0xff] %v9923_v52  ;;  %v8204_v37 = vld [vmem:[%s12156_s1 + $0x40] sm:$0xff]   ;;  %v8211_v7 = vld [vmem:[%s12156_s1 + $0x78] sm:$0xff]  }
 0x69f   :  { %v2642_v14 = vpop.f32.mrf.mxu1  ;;  %7242 = vmatmul.mubr.msk.bf16.vlgmr.msra.gmra.mxu0 %vm128_vm0, %v9897_v0  ;;  %7254 = vmatmul.mubr.msk.bf16.vlgmr.msra.gmra.mxu1 %vm128_vm0, %v9897_v0  ;;  %v8208_v50 = vld [vmem:[%s12156_s1 + $0x60] sm:$0xff]  }
 0x6a0   :  { %v2659_v62 = vadd.f32 %v2642_v14, %v2513_v54  ;;  %7262 = vmatpush3.bf16.msra.mxu0 %v8016_v12  ;;  %v9911_v40 = vadd.f32 %v2661_v1, %v12277_v23  ;;  %12280 = vst [vmem:[#allocation2_spill] sm:$0xff] %v9917_v57  ;;  %v8187_v12 = vld [vmem:[%s12155_s2 + $0x30] sm:$0xff]  }
 0x6a1   :  { %7263 = vmatprep.subr.bf16.mxu0 %v8017_v29  ;;  %v8210_v54 = vld [vmem:[%s12156_s1 + $0x70] sm:$0xff]  }
 0x6a2   :  { %12278 = vst [vmem:[#allocation8_spill] sm:$0xff] %v9911_v40  ;;  %v9920_v21 = vadd.f32 %v2659_v62, %v12281_v43  ;;  %v2673_v49 = vpack.c.bf16 %v9911_v40, %v9923_v52 }
 0x6a4   :  { %12282 = vst [vmem:[#allocation3_spill] sm:$0xff] %v9920_v21  ;;  %v2672_v2 = vpack.c.bf16 %v9920_v21, %v9917_v57  ;;  %7264 = vmatpush3.bf16.msra.mxu0 %v8017_v29  ;;  %v8209_v29 = vld [vmem:[%s12156_s1 + $0x68] sm:$0xff]  }
 0x6a5   :  { %7337 = vmatprep.subr.bf16.mxu0 %v8018_v6 }
 0x6a6   :  { %7245 = vmatprep.mubr.msk.bf16.mxu0 %vm128_vm0, %v2672_v2  ;;  %7257 = vmatprep.mubr.msk.bf16.mxu1 %vm128_vm0, %v2672_v2 }
 0x6a7   :  { %7246 = vmatmul.mubr.msk.bf16.gmra.mxu0 %vm128_vm0, %v2673_v49  ;;  %7258 = vmatmul.mubr.msk.bf16.gmra.mxu1 %vm128_vm0, %v2673_v49 }
 0x6a8   :  { %7265 = vmatprep.mubr.msk.bf16.mxu0 %vm128_vm0, %v8180_v51  ;;  %7305 = vmatprep.mubr.msk.bf16.mxu1 %vm683_vm1, %v8181_v38 }
 0x6af   :  { %7266 = vmatmul.mubr.msk.bf16.vlgmr.msra.gmra.mxu0 %vm128_vm0, %v8182_v27 }
 0x6b0   :  { %7269 = vmatprep.mubr.msk.bf16.mxu0 %vm128_vm0, %v8183_v55  ;;  %7338 = vmatpush3.bf16.msra.mxu0 %v8018_v6  ;;  %v8020_v55 = vld [vmem:[%s12158_s8 + $0xb8] sm:$0xff]  }
 0x6b1   :  { %7339 = vmatprep.subr.bf16.mxu0 %v8019_v3 }
 0x6b4   :  { %7340 = vmatpush3.bf16.msra.mxu0 %v8019_v3 }
 0x6b7   :  { %7270 = vmatmul.mubr.msk.bf16.gmra.mxu0 %vm128_vm0, %v8184_v24  ;;  %v8021_v24 = vld [vmem:[%s12158_s8 + $0xb0] sm:$0xff]  }
 0x6b8   :  { %7273 = vmatprep.mubr.msk.bf16.mxu0 %vm128_vm0, %v8185_v63 }
 0x6bf   :  { %7274 = vmatmul.mubr.msk.bf16.gmra.mxu0 %vm128_vm0, %v8186_v44 }
 0x6c0   :  { %7277 = vmatprep.mubr.msk.bf16.mxu0 %vm128_vm0, %v8187_v12  ;;  %v8022_v12 = vld [vmem:[%s12158_s8 + $0xa8] sm:$0xff]  }
 0x6c7   :  { %7278 = vmatmul.mubr.msk.bf16.gmra.mxu0 %vm128_vm0, %v8188_v17 }
 0x6c8   :  { %7281 = vmatprep.mubr.msk.bf16.mxu0 %vm128_vm0, %v8189_v4 }
 0x6cf   :  { %7282 = vmatmul.mubr.msk.bf16.gmra.mxu0 %vm128_vm0, %v8190_v36  ;;  %v8023_v36 = vld [vmem:[%s12158_s8 + $0xa0] sm:$0xff]  }
 0x6d0   :  { %7285 = vmatprep.mubr.msk.bf16.mxu0 %vm128_vm0, %v8191_v31 }
 0x6d7   :  { %7286 = vmatmul.mubr.msk.bf16.gmra.mxu0 %vm128_vm0, %v8192_v39 }
 0x6d8   :  { %7289 = vmatprep.mubr.msk.bf16.mxu0 %vm128_vm0, %v8193_v56 }
 0x6df   :  { %7290 = vmatmul.mubr.msk.bf16.gmra.mxu0 %vm128_vm0, %v8194_v33 }
 0x6e0   :  { %7293 = vmatprep.mubr.msk.bf16.mxu0 %vm128_vm0, %v8195_v41 }
 0x6e7   :  { %7294 = vmatmul.mubr.msk.bf16.gmra.mxu0 %vm128_vm0, %v8196_v9 }
 0x6e8   :  { %7341 = vmatprep.mubr.msk.bf16.mxu0 %vm128_vm0, %v9893_v46  ;;  %v8205_v46 = vld [vmem:[%s12156_s1 + $0x48] sm:$0xff]  }
 0x6ef   :  { %7342 = vmatmul.mubr.msk.bf16.vlgmr.msra.gmra.mxu0 %vm128_vm0, %v9897_v0  ;;  %v8207_v0 = vld [vmem:[%s12156_s1 + $0x58] sm:$0xff]  }
 0x6f0   :  { %7345 = vmatprep.mubr.msk.bf16.mxu0 %vm128_vm0, %v2672_v2 }
 0x6f7   :  { %7346 = vmatmul.mubr.msk.bf16.gmra.mxu0 %vm128_vm0, %v2673_v49 }
 0x75f   :  { %v7243_v16 = vpop.f32.mrf.mxu0  ;;  %v7255_v43 = vpop.f32.mrf.mxu1 }
 0x761   :  { %v2737_v20 = vpop.f32.mrf.mxu0  ;;  %v2827_v2 = vpop.f32.mrf.mxu1 }
 0x763   :  { %v7244_v15 = vpop.f32.mrf.mxu0  ;;  %v7256_v51 = vpop.f32.mrf.mxu1 }
 0x764   :  { %v2859_v30 = vpack.c.bf16 %v7244_v15, %v7243_v16 }
 0x765   :  { %v2740_v26 = vpop.f32.mrf.mxu0  ;;  %v2830_v3 = vpop.f32.mrf.mxu1 }
 0x766   :  { %v2858_v34 = vpack.c.bf16 %v2740_v26, %v2737_v20 }
 0x767   :  { %v7247_v11 = vpop.f32.mrf.mxu0  ;;  %v7259_v63 = vpop.f32.mrf.mxu1 }
 0x769   :  { %v2753_v47 = vpop.f32.mrf.mxu0  ;;  %v2843_v17 = vpop.f32.mrf.mxu1 }
 0x76b   :  { %v7248_v22 = vpop.f32.mrf.mxu0  ;;  %v7260_v31 = vpop.f32.mrf.mxu1 }
 0x76c   :  { %v2861_v25 = vpack.c.bf16 %v7248_v22, %v7247_v11 }
 0x76d   :  { %v2756_v28 = vpop.f32.mrf.mxu0  ;;  %v2846_v56 = vpop.f32.mrf.mxu1 }
 0x76e   :  { %v2860_v53 = vpack.c.bf16 %v2756_v28, %v2753_v47  ;;  %7297 = vmatprep.subr.bf16.mxu1 %v2861_v25 }
 0x76f   :  { %7298 = vmatpush3.bf16.msra.mxu1 %v2861_v25  ;;  %v7267_v1 = vpop.f32.mrf.mxu0 }
 0x770   :  { %7299 = vmatprep.subr.bf16.mxu1 %v2860_v53 }
 0x771   :  { %v2913_v35 = vpop.f32.mrf.mxu0 }
 0x773   :  { %7300 = vmatpush3.bf16.msra.mxu1 %v2860_v53  ;;  %v7268_v14 = vpop.f32.mrf.mxu0 }
 0x774   :  { %7301 = vmatprep.subr.bf16.mxu1 %v2859_v30 }
 0x775   :  { %v2916_v62 = vpop.f32.mrf.mxu0 }
 0x777   :  { %7302 = vmatpush3.bf16.msra.mxu1 %v2859_v30  ;;  %v7271_v23 = vpop.f32.mrf.mxu0  ;;  %v6352_v30 = vld [vmem:[%s12159_s6 + $0x2] ss:$0 sm:$0xff] }
 0x778   :  { %7303 = vmatprep.subr.bf16.mxu1 %v2858_v34 }
 0x779   :  { %v2929_v6 = vpop.f32.mrf.mxu0 }
 0x77b   :  { %7304 = vmatpush3.bf16.msra.mxu1 %v2858_v34  ;;  %v7272_v45 = vpop.f32.mrf.mxu0 }
 0x77c   :  { %7349 = vmatprep.subr.bf16.mxu1 %v8020_v55 }
 0x77d   :  { %v2932_v61 = vpop.f32.mrf.mxu0 }
 0x77e   :  { %7306 = vmatmul.mubr.msk.bf16.vlgmr.msra.gmra.mxu1 %vm683_vm1, %v8197_v8 }
 0x77f   :  { %7309 = vmatprep.mubr.msk.bf16.mxu1 %vm683_vm1, %v8198_v13  ;;  %v7275_v49 = vpop.f32.mrf.mxu0  ;;  %7350 = vmatpush3.bf16.msra.mxu1 %v8020_v55  ;;  %v10111_v55 = vadd.f32 %v7259_v63, %v6352_v30 }
 0x780   :  { %7351 = vmatprep.subr.bf16.mxu1 %v8021_v24 }
 0x781   :  { %v2945_v38 = vpop.f32.mrf.mxu0  ;;  %12285 = vst [vmem:[#allocation9_spill] sm:$0xff] %v10111_v55 }
 0x783   :  { %v7276_v27 = vpop.f32.mrf.mxu0  ;;  %7352 = vmatpush3.bf16.msra.mxu1 %v8021_v24 }
 0x784   :  { %7353 = vmatprep.subr.bf16.mxu1 %v8022_v12 }
 0x785   :  { %v10076_v44 = vpop.f32.mrf.mxu0 }
 0x786   :  { %7310 = vmatmul.mubr.msk.bf16.gmra.mxu1 %vm683_vm1, %v8199_v42  ;;  %v10103_v42 = vadd.f32 %v7255_v43, %v6352_v30 }
 0x787   :  { %7313 = vmatprep.mubr.msk.bf16.mxu1 %vm683_vm1, %v8200_v10  ;;  %v10081_v4 = vpop.f32.mrf.mxu0  ;;  %7354 = vmatpush3.bf16.msra.mxu1 %v8022_v12 }
 0x788   :  { %7355 = vmatprep.subr.bf16.mxu1 %v8023_v36 }
 0x789   :  { %v10086_v39 = vpop.f32.mrf.mxu0 }
 0x78b   :  { %7356 = vmatpush3.bf16.msra.mxu1 %v8023_v36  ;;  %v10088_v33 = vpop.f32.mrf.mxu0 }
 0x78d   :  { %v10090_v9 = vpop.f32.mrf.mxu0 }
 0x78e   :  { %7314 = vmatmul.mubr.msk.bf16.gmra.mxu1 %vm683_vm1, %v8201_v59 }
 0x78f   :  { %7317 = vmatprep.mubr.msk.bf16.mxu1 %vm683_vm1, %v8202_v19  ;;  %v10092_v15 = vpop.f32.mrf.mxu0  ;;  %v10105_v19 = vadd.f32 %v6352_v30, %v2827_v2  ;;  %v10115_v2 = vadd.f32 %v6352_v30, %v2843_v17 }
 0x791   :  { %v10094_v47 = vpop.f32.mrf.mxu0 }
 0x793   :  { %v10096_v28 = vpop.f32.mrf.mxu0 }
 0x795   :  { %v10101_v8 = vpop.f32.mrf.mxu0 }
 0x796   :  { %7318 = vmatmul.mubr.msk.bf16.gmra.mxu1 %vm683_vm1, %v8203_v5  ;;  %v10107_v5 = vadd.f32 %v7256_v51, %v6352_v30  ;;  %v10117_v51 = vadd.f32 %v7260_v31, %v6352_v30 }
 0x797   :  { %7321 = vmatprep.mubr.msk.bf16.mxu1 %vm683_vm1, %v8204_v37  ;;  %v10113_v24 = vpop.f32.mrf.mxu0 }
 0x799   :  { %v10145_v17 = vpop.f32.mrf.mxu0 }
 0x79e   :  { %7322 = vmatmul.mubr.msk.bf16.gmra.mxu1 %vm683_vm1, %v8205_v46 }
 0x79f   :  { %7325 = vmatprep.mubr.msk.bf16.mxu1 %vm683_vm1, %v8206_v48 }
 0x7a6   :  { %7326 = vmatmul.mubr.msk.bf16.gmra.mxu1 %vm683_vm1, %v8207_v0 }
 0x7a7   :  { %7329 = vmatprep.mubr.msk.bf16.mxu1 %vm683_vm1, %v8208_v50 }
 0x7ae   :  { %7330 = vmatmul.mubr.msk.bf16.gmra.mxu1 %vm683_vm1, %v8209_v29 }
 0x7af   :  { %7333 = vmatprep.mubr.msk.bf16.mxu1 %vm683_vm1, %v8210_v54 }
 0x7b6   :  { %7334 = vmatmul.mubr.msk.bf16.gmra.mxu1 %vm683_vm1, %v8211_v7  ;;  %v10109_v7 = vadd.f32 %v6352_v30, %v2830_v3 }
 0x83e   :  { %v7307_v41 = vpop.f32.mrf.mxu1 }
 0x83f   :  { %v3083_v10 = vadd.f32 %v7307_v41, %v7267_v1 }
 0x840   :  { %v3074_v16 = vpop.f32.mrf.mxu1 }
 0x841   :  { %v3075_v59 = vadd.f32 %v3074_v16, %v2913_v35 }
 0x842   :  { %v7308_v20 = vpop.f32.mrf.mxu1 }
 0x843   :  { %v3086_v37 = vadd.f32 %v7308_v20, %v7268_v14  ;;  %v10120_v14 = vadd.f32 %v3083_v10, %v10103_v42 }
 0x844   :  { %v3077_v26 = vpop.f32.mrf.mxu1 }
 0x845   :  { %v3078_v0 = vadd.f32 %v3077_v26, %v2916_v62  ;;  %v10123_v62 = vadd.f32 %v3075_v59, %v10105_v19  ;;  %v3211_v41 = vmul.f32 %v10120_v14, %v10120_v14 }
 0x846   :  { %v7311_v11 = vpop.f32.mrf.mxu1 }
 0x847   :  { %v3099_v50 = vadd.f32 %v7311_v11, %v7271_v23  ;;  %v10125_v23 = vadd.f32 %v6352_v30, %v2846_v56  ;;  %v3209_v16 = vmul.f32 %v10123_v62, %v10123_v62 }
 0x848   :  { %v3090_v22 = vpop.f32.mrf.mxu1 }
 0x849   :  { %v3091_v29 = vadd.f32 %v3090_v22, %v2929_v6  ;;  %v10128_v6 = vadd.f32 %v3086_v37, %v10107_v5  ;;  %v10137_v3 = vadd.f32 %v3099_v50, %v10111_v55 }
 0x84a   :  { %v7312_v25 = vpop.f32.mrf.mxu1 }
 0x84b   :  { %v3102_v54 = vadd.f32 %v7312_v25, %v7272_v45  ;;  %12286 = vst [vmem:[#allocation5_spill] sm:$0xff] %v10137_v3  ;;  %v10140_v63 = vadd.f32 %v3091_v29, %v10115_v2  ;;  %v3212_v26 = vmul.f32 %v10128_v6, %v10128_v6  ;;  %v3215_v30 = vmul.f32 %v10137_v3, %v10137_v3 }
 0x84c   :  { %v3093_v53 = vpop.f32.mrf.mxu1 }
 0x84d   :  { %v3094_v43 = vadd.f32 %v3093_v53, %v2932_v61  ;;  %12287 = vst [vmem:[#allocation11_spill] sm:$0xff] %v10140_v63  ;;  %v10143_v12 = vadd.f32 %v3102_v54, %v10117_v51 }
 0x84e   :  { %v7315_v34 = vpop.f32.mrf.mxu1 }
 0x84f   :  { %v3115_v46 = vadd.f32 %v7315_v34, %v7275_v49  ;;  %v10148_v36 = vadd.f32 %v3094_v43, %v10125_v23  ;;  %v3216_v34 = vmul.f32 %v10143_v12, %v10143_v12 }
 0x850   :  { %v3106_v13 = vpop.f32.mrf.mxu1 }
 0x851   :  { %v3107_v1 = vadd.f32 %v3106_v13, %v2945_v38  ;;  %v10131_v45 = vadd.f32 %v3115_v46, %v10103_v42  ;;  %v10134_v38 = vadd.f32 %v3078_v0, %v10109_v7  ;;  %v10175_v13 = vpop.f32.mrf.mxu0  ;;  %v10179_v10 = vmul.f32 %v10148_v36, %v10148_v36 }
 0x852   :  { %v7316_v48 = vpop.f32.mrf.mxu1 }
 0x853   :  { %v3118_v61 = vadd.f32 %v7316_v48, %v7276_v27  ;;  %v10151_v27 = vadd.f32 %v3107_v1, %v10105_v19  ;;  %v3251_v11 = vmul.f32 %v10131_v45, %v10131_v45  ;;  %v3210_v53 = vmul.f32 %v10134_v38, %v10134_v38 }
 0x854   :  { %v3109_v35 = vpop.f32.mrf.mxu1  ;;  %v3227_v48 = vadd.f32 %v10131_v45, %v10120_v14  ;;  %v3235_v50 = vmax.f32 %v10120_v14, %v10131_v45  ;;  %v3243_v29 = vmin.f32 %v10120_v14, %v10131_v45  ;;  %v10209_v45 = vpop.f32.mrf.mxu0 }
 0x855   :  { %v3110_v31 = vadd.f32 %v3109_v35, %v10076_v44  ;;  %v10164_v22 = vadd.f32 %v3118_v61, %v10107_v5  ;;  %v3259_v54 = vadd.f32 %v3251_v11, %v3211_v41  ;;  %v3225_v61 = vadd.f32 %v10151_v27, %v10123_v62 }
 0x856   :  { %v7319_v49 = vpop.f32.mrf.mxu1 }
 0x857   :  { %v3131_v20 = vadd.f32 %v7319_v49, %v10081_v4  ;;  %v3213_v4 = vmul.f32 %v10140_v63, %v10140_v63  ;;  %v10184_v59 = vadd.f32 %v3110_v31, %v10109_v7  ;;  %v3252_v43 = vmul.f32 %v10164_v22, %v10164_v22 }
 0x858   :  { %v3122_v56 = vpop.f32.mrf.mxu1  ;;  %v3228_v41 = vadd.f32 %v10164_v22, %v10128_v6 }
 0x859   :  { %v3123_v44 = vadd.f32 %v3122_v56, %v10086_v39  ;;  %v3249_v39 = vmul.f32 %v10151_v27, %v10151_v27  ;;  %v10190_v0 = vadd.f32 %v3131_v20, %v10111_v55 }
 0x85a   :  { %v7320_v25 = vpop.f32.mrf.mxu1 }
 0x85b   :  { %v3134_v37 = vadd.f32 %v7320_v25, %v10088_v33  ;;  %12288 = vst [vmem:[#allocation7_spill] sm:$0xff] %v10190_v0  ;;  %v10199_v1 = vadd.f32 %v3123_v44, %v10115_v2  ;;  %v3257_v56 = vadd.f32 %v3249_v39, %v3209_v16  ;;  %v3236_v25 = vmax.f32 %v10128_v6, %v10164_v22 }
 0x85c   :  { %v3125_v46 = vpop.f32.mrf.mxu1  ;;  %v3244_v16 = vmin.f32 %v10128_v6, %v10164_v22  ;;  %v3260_v39 = vadd.f32 %v3252_v43, %v3212_v26  ;;  %v3242_v6 = vmin.f32 %v10134_v38, %v10184_v59  ;;  %v7291_v26 = vpop.f32.mrf.mxu0  ;;  %v3231_v43 = vadd.f32 %v10190_v0, %v10137_v3 }
 0x85d   :  { %12289 = vst [vmem:[#allocation10_spill] sm:$0xff] %v10199_v1  ;;  %v3126_v33 = vadd.f32 %v3125_v46, %v10090_v9  ;;  %v3250_v9 = vmul.f32 %v10184_v59, %v10184_v59  ;;  %v10216_v20 = vadd.f32 %v3134_v37, %v10117_v51  ;;  %v3226_v46 = vadd.f32 %v10184_v59, %v10134_v38 }
 0x85e   :  { %v7323_v35 = vpop.f32.mrf.mxu1  ;;  %v3253_v37 = vmul.f32 %v10199_v1, %v10199_v1  ;;  %v3009_v32 = vpop.f32.mrf.mxu0 }
 0x85f   :  { %v3147_v49 = vadd.f32 %v7323_v35, %v10092_v15  ;;  %v3255_v15 = vmul.f32 %v10190_v0, %v10190_v0  ;;  %v10230_v35 = vadd.f32 %v3126_v33, %v10125_v23  ;;  %v3258_v22 = vadd.f32 %v3250_v9, %v3210_v53 }
 0x860   :  { %v3138_v11 = vpop.f32.mrf.mxu1  ;;  %v3256_v33 = vmul.f32 %v10216_v20, %v10216_v20  ;;  %v3261_v53 = vadd.f32 %v3253_v37, %v3213_v4 }
 0x861   :  { %v3139_v44 = vadd.f32 %v3138_v11, %v10094_v47  ;;  %v3267_v31 = vadd.f32 %v3147_v49, %v10103_v42  ;;  %v3234_v11 = vmax.f32 %v10134_v38, %v10184_v59  ;;  %v3263_v49 = vadd.f32 %v3255_v15, %v3215_v30 }
 0x862   :  { %v7324_v14 = vpop.f32.mrf.mxu1  ;;  %v3237_v38 = vmax.f32 %v10140_v63, %v10199_v1  ;;  %v3254_v59 = vmul.f32 %v10230_v35, %v10230_v35  ;;  %v3232_v30 = vadd.f32 %v10216_v20, %v10143_v12  ;;  %v3264_v60 = vadd.f32 %v3256_v33, %v3216_v34 }
 0x863   :  { %v3150_v47 = vadd.f32 %v7324_v14, %v10096_v28  ;;  %v3265_v52 = vadd.f32 %v3139_v44, %v10105_v19  ;;  %v3229_v28 = vadd.f32 %v10199_v1, %v10140_v63  ;;  %v3239_v14 = vmax.f32 %v10137_v3, %v10190_v0  ;;  %v7292_v0 = vpop.f32.mrf.mxu0 }
 0x864   :  { %v3141_v21 = vpop.f32.mrf.mxu1  ;;  %v3299_v15 = vmul.f32 %v3267_v31, %v3267_v31  ;;  %v3230_v4 = vadd.f32 %v10230_v35, %v10148_v36  ;;  %v10268_v33 = vmax.f32 %v3235_v50, %v3267_v31  ;;  %v10270_v1 = vmin.f32 %v3243_v29, %v3267_v31 }
 0x865   :  { %v3268_v9 = vadd.f32 %v3150_v47, %v10107_v5  ;;  %v3142_v57 = vadd.f32 %v3141_v21, %v10101_v8  ;;  %v3297_v37 = vmul.f32 %v3265_v52, %v3265_v52  ;;  %v3275_v21 = vadd.f32 %v3267_v31, %v3227_v48 }
 0x866   :  { %v7327_v44 = vpop.f32.mrf.mxu1  ;;  %v3307_v3 = vadd.f32 %v3299_v15, %v3259_v54  ;;  %v12291_v50 = vmin.f32 %v10123_v62, %v10151_v27 }
 0x867   :  { %v3163_v40 = vadd.f32 %v7327_v44, %v10113_v24  ;;  %v3266_v47 = vadd.f32 %v3142_v57, %v10109_v7  ;;  %v3238_v24 = vmax.f32 %v10148_v36, %v10230_v35  ;;  %v3262_v44 = vadd.f32 %v3254_v59, %v10179_v10 }
 0x868   :  { %v3154_v58 = vpop.f32.mrf.mxu1  ;;  %v3300_v18 = vmul.f32 %v3268_v9, %v3268_v9  ;;  %v3273_v57 = vadd.f32 %v3265_v52, %v3225_v61  ;;  %v12290_v10 = vmax.f32 %v10123_v62, %v10151_v27  ;;  %v10284_v29 = vmin.f32 %v12291_v50, %v3265_v52 }
 0x869   :  { %v10262_v8 = vadd.f32 %v3163_v40, %v10111_v55  ;;  %v3155_v63 = vadd.f32 %v3154_v58, %v10145_v17  ;;  %v3305_v58 = vadd.f32 %v3297_v37, %v3257_v56  ;;  %v3298_v17 = vmul.f32 %v3266_v47, %v3266_v47 }
 0x86a   :  { %v7328_v34 = vpop.f32.mrf.mxu1  ;;  %v10279_v59 = vmax.f32 %v12290_v10, %v3265_v52  ;;  %v3276_v54 = vadd.f32 %v3268_v9, %v3228_v41  ;;  %v10291_v61 = vmax.f32 %v3236_v25, %v3268_v9  ;;  %v3308_v31 = vadd.f32 %v3300_v18, %v3260_v39  ;;  %v3012_v10 = vpop.f32.mrf.mxu0 }
 0x86b   :  { %v10273_v48 = vadd.f32 %v3155_v63, %v10115_v2  ;;  %v3166_v40 = vadd.f32 %v7328_v34, %v10175_v13  ;;  %v3303_v63 = vmul.f32 %v10262_v8, %v10262_v8  ;;  %v10296_v34 = vmin.f32 %v3244_v16, %v3268_v9 }
 0x86c   :  { %v3157_v55 = vpop.f32.mrf.mxu1  ;;  %v3274_v52 = vadd.f32 %v3266_v47, %v3226_v46  ;;  %v10298_v27 = vmax.f32 %v3234_v11, %v3266_v47  ;;  %v10300_v41 = vmin.f32 %v3242_v6, %v3266_v47  ;;  %v3279_v25 = vadd.f32 %v10262_v8, %v3231_v43  ;;  %v7295_v47 = vpop.f32.mrf.mxu0 }
 0x86d   :  { %v10289_v13 = vadd.f32 %v3166_v40, %v10117_v51  ;;  %v3301_v56 = vmul.f32 %v10273_v48, %v10273_v48  ;;  %v3158_v15 = vadd.f32 %v3157_v55, %v10209_v45  ;;  %v3306_v40 = vadd.f32 %v3298_v17, %v3258_v22 }
 0x86e   :  { %v7331_v37 = vpop.f32.mrf.mxu1  ;;  %v10308_v45 = vadd.f32 %v3303_v63, %v3263_v49  ;;  %v10314_v11 = vmax.f32 %v3239_v14, %v10262_v8  ;;  %v3277_v6 = vadd.f32 %v10273_v48, %v3229_v28  ;;  %v10322_v9 = vmax.f32 %v3237_v38, %v10273_v48 }
 0x86f   :  { %v3179_v62 = vadd.f32 %v7331_v37, %v7291_v26  ;;  %v3304_v18 = vmul.f32 %v10289_v13, %v10289_v13  ;;  %v10306_v39 = vadd.f32 %v3158_v15, %v10125_v23  ;;  %v10317_v26 = vadd.f32 %v3301_v56, %v3261_v53 }
 0x870   :  { %v3170_v55 = vpop.f32.mrf.mxu1  ;;  %v10331_v28 = vadd.f32 %v10289_v13, %v3232_v30 }
 0x871   :  { %v10311_v16 = vadd.f32 %v3179_v62, %v10103_v42  ;;  %v3171_v46 = vadd.f32 %v3170_v55, %v3009_v32  ;;  %v3302_v22 = vmul.f32 %v10306_v39, %v10306_v39  ;;  %v10333_v53 = vadd.f32 %v3304_v18, %v3264_v60 }
 0x872   :  { %v7332_v43 = vpop.f32.mrf.mxu1  ;;  %v10336_v17 = vadd.f32 %v10306_v39, %v3230_v4  ;;  %v10355_v37 = vmax.f32 %v3238_v24, %v10306_v39 }
 0x873   :  { %v3323_v49 = vadd.f32 %v10311_v16, %v3275_v21  ;;  %v3347_v42 = vmul.f32 %v10311_v16, %v10311_v16  ;;  %v10328_v32 = vadd.f32 %v3171_v46, %v10105_v19  ;;  %v3182_v14 = vadd.f32 %v7332_v43, %v7292_v0 }
 0x874   :  { %v3173_v38 = vpop.f32.mrf.mxu1  ;;  %v12292_v21 = vmax.f32 %v10143_v12, %v10216_v20  ;;  %v10349_v60 = vadd.f32 %v3302_v22, %v3262_v44 }
 0x875   :  { %v3355_v63 = vadd.f32 %v3347_v42, %v3307_v3  ;;  %v10344_v19 = vmul.f32 0.25, %v3323_v49  ;;  %v3321_v0 = vadd.f32 %v10328_v32, %v3273_v57  ;;  %v3345_v30 = vmul.f32 %v10328_v32, %v10328_v32  ;;  %v3025_v57 = vpop.f32.mrf.mxu0 }
 0x876   :  { %v10342_v50 = vmax.f32 %v12292_v21, %v10289_v13  ;;  %v10352_v4 = vadd.f32 %v3182_v14, %v10107_v5  ;;  %v3174_v56 = vadd.f32 %v3173_v38, %v3012_v10  ;;  %v7335_v15 = vpop.f32.mrf.mxu1 }
 0x877   :  { %v3371_v62 = vmul.f32 0.25, %v3355_v63  ;;  %v3379_v3 = vmul.f32 %v10344_v19, %v10344_v19  ;;  %v3353_v18 = vadd.f32 %v3345_v30, %v3305_v58  ;;  %v10359_v55 = vmul.f32 0.25, %v3321_v0  ;;  %v12293_v63 = vld [vmem:[#allocation9_spill] sm:$0xff] }
 0x878   :  { %v3324_v46 = vadd.f32 %v10352_v4, %v3276_v54  ;;  %v3348_v44 = vmul.f32 %v10352_v4, %v10352_v4  ;;  %v10365_v5 = vadd.f32 %v3174_v56, %v10109_v7  ;;  %v3195_v10 = vadd.f32 %v7335_v15, %v7295_v47  ;;  %v3186_v22 = vpop.f32.mrf.mxu1 }
 0x879   :  { %v3387_v24 = vsub.f32 %v3371_v62, %v3379_v3  ;;  %v3369_v43 = vmul.f32 0.25, %v3353_v18  ;;  %v3377_v49 = vmul.f32 %v10359_v55, %v10359_v55  ;;  %v3187_v42 = vadd.f32 %v3186_v22, %v3025_v57  ;;  %v7296_v57 = vpop.f32.mrf.mxu0 }
 0x87a   :  { %v3356_v58 = vadd.f32 %v3348_v44, %v3308_v31  ;;  %v10369_v14 = vmul.f32 0.25, %v3324_v46  ;;  %v3322_v38 = vadd.f32 %v10365_v5, %v3274_v52  ;;  %v3346_v54 = vmul.f32 %v10365_v5, %v10365_v5  ;;  %v7336_v52 = vpop.f32.mrf.mxu1 }
 0x87b   :  { %v3385_v21 = vsub.f32 %v3369_v43, %v3377_v49  ;;  %v10375_v7 = vadd.f32 %v3195_v10, %v12293_v63  ;;  %v10378_v47 = vadd.f32 %v3187_v42, %v10115_v2  ;;  %v3331_v0 = vmax.f32 %v10268_v33, %v10311_v16 }
 0x87c   :  { %v3372_v30 = vmul.f32 0.25, %v3356_v58  ;;  %v3380_v31 = vmul.f32 %v10369_v14, %v10369_v14  ;;  %v3354_v56 = vadd.f32 %v3346_v54, %v3306_v40  ;;  %v10384_v15 = vmul.f32 0.25, %v3322_v38 }
 0x87d   :  { %v3395_v62 = vmax.f32 %v3387_v24, 0.0  ;;  %v3327_v3 = vadd.f32 %v10375_v7, %v3279_v25  ;;  %v3351_v18 = vmul.f32 %v10375_v7, %v10375_v7  ;;  %v3339_v2 = vmin.f32 %v10270_v1, %v10311_v16  ;;  %v8024_v1 = vld [vmem:[%s12158_s8 + $0x98] sm:$0xff]  }
 0x87e   :  { %v3388_v46 = vsub.f32 %v3372_v30, %v3380_v31  ;;  %v3370_v33 = vmul.f32 0.25, %v3354_v56  ;;  %v3378_v44 = vmul.f32 %v10384_v15, %v10384_v15  ;;  %v3325_v40 = vadd.f32 %v10378_v47, %v3277_v6  ;;  %v3189_v6 = vpop.f32.mrf.mxu1  ;;  %7357 = vmatprep.subr.bf16.mxu1 %v8024_v1 }
 0x87f   :  { %v3359_v10 = vadd.f32 %v3351_v18, %v10308_v45  ;;  %v10395_v22 = vmul.f32 0.25, %v3327_v3  ;;  %v3349_v25 = vmul.f32 %v10378_v47, %v10378_v47  ;;  %v3329_v24 = vmax.f32 %v10279_v59, %v10328_v32  ;;  %v3028_v59 = vpop.f32.mrf.mxu0  ;;  %7358 = vmatpush3.bf16.msra.mxu1 %v8024_v1 }
 0x880   :  { %v3393_v16 = vmax.f32 %v3385_v21, 0.0  ;;  %v3396_v43 = vmax.f32 %v3388_v46, 0.0  ;;  %v10404_v49 = vmul.f32 0.25, %v3325_v40  ;;  %v3198_v42 = vadd.f32 %v7336_v52, %v7296_v57 }
 0x881   :  { %v3375_v58 = vmul.f32 0.25, %v3359_v10  ;;  %v3383_v45 = vmul.f32 %v10395_v22, %v10395_v22  ;;  %v3357_v38 = vadd.f32 %v3349_v25, %v10317_v26  ;;  %v3332_v54 = vmax.f32 %v10291_v61, %v10352_v4 }
 0x882   :  { %v10411_v63 = vadd.f32 1e-05, %v3395_v62  ;;  %v3386_v30 = vsub.f32 %v3370_v33, %v3378_v44  ;;  %v10414_v21 = vadd.f32 %v3198_v42, %v10117_v51  ;;  %v3337_v31 = vmin.f32 %v10284_v29, %v10328_v32 }
 0x883   :  { %v3391_v56 = vsub.f32 %v3375_v58, %v3383_v45  ;;  %v3381_v52 = vmul.f32 %v10404_v49, %v10404_v49  ;;  %v7768_v26 = vpack.i.bf16 %v3332_v54, %v3331_v0  ;;  %v3190_v3 = vadd.f32 %v3189_v6, %v3028_v59 }
 0x884   :  { %v3373_v18 = vmul.f32 0.25, %v3357_v38  ;;  %v3328_v61 = vadd.f32 %v10414_v21, %v10331_v28  ;;  %v3352_v62 = vmul.f32 %v10414_v21, %v10414_v21  ;;  %v3330_v51 = vmax.f32 %v10298_v27, %v10365_v5  ;;  %v8025_v28 = vld [vmem:[%s12158_s8 + $0x90] sm:$0xff]   ;;  %v8026_v27 = vld [vmem:[%s12158_s8 + $0x88] sm:$0xff]  }
 0x885   :  { %v10426_v57 = vadd.f32 1e-05, %v3393_v16  ;;  %v10428_v29 = vadd.f32 1e-05, %v3396_v43  ;;  %7769 = vrot.lane.b32.xlu1 %v7768_v26, %s8277_s26  ;;  %v10432_v32 = vadd.f32 %v3190_v3, %v10125_v23  ;;  %v3340_v0 = vmin.f32 %v10296_v34, %v10352_v4  ;;  %7359 = vmatprep.subr.bf16.mxu1 %v8025_v28  ;;  %v12295_v26 = vld [vmem:[#allocation5_spill] sm:$0xff] }
 0x886   :  { %v3360_v46 = vadd.f32 %v3352_v62, %v10333_v53  ;;  %v10443_v33 = vmul.f32 0.25, %v3328_v61  ;;  %v7778_v44 = vpack.i.bf16 %v3330_v51, %v3329_v24  ;;  %v3338_v23 = vmin.f32 %v10300_v41, %v10365_v5  ;;  %7360 = vmatpush3.bf16.msra.mxu1 %v8025_v28  ;;  %v12296_v61 = vld [vmem:[#allocation10_spill] sm:$0xff]  ;;  %v12297_v62 = vld [vmem:[#allocation11_spill] sm:$0xff] }
 0x887   :  { %v3394_v40 = vmax.f32 %v3386_v30, 0.0  ;;  %v3399_v10 = vmax.f32 %v3391_v56, 0.0  ;;  %v3326_v34 = vadd.f32 %v10432_v32, %v10336_v17  ;;  %v3350_v4 = vmul.f32 %v10432_v32, %v10432_v32  ;;  %7361 = vmatprep.subr.bf16.mxu1 %v8026_v27 }
 0x888   :  { %v3389_v25 = vsub.f32 %v3373_v18, %v3381_v52  ;;  %v3376_v1 = vmul.f32 0.25, %v3360_v46  ;;  %v3384_v53 = vmul.f32 %v10443_v33, %v10443_v33  ;;  %7779 = vrot.lane.b32.xlu0 %v7778_v44, %s8277_s26  ;;  %v7773_v24 = vpack.i.bf16 %v3340_v0, %v3339_v2  ;;  %v12294_v52 = vld [vmem:[#allocation7_spill] sm:$0xff] }
 0x889   :  { %v3358_v41 = vadd.f32 %v3350_v4, %v10349_v60  ;;  %v10455_v5 = vmul.f32 0.25, %v3326_v34  ;;  %v7783_v16 = vpack.i.bf16 %v3338_v23, %v3337_v31  ;;  %v3335_v17 = vmax.f32 %v10314_v11, %v10375_v7 }
 0x88a   :  { %v3392_v43 = vsub.f32 %v3376_v1, %v3384_v53  ;;  %7774 = vrot.lane.b32.xlu1 %v7773_v24, %s8276_s25  ;;  %v3336_v42 = vmax.f32 %v10342_v50, %v10414_v21  ;;  %v3333_v6 = vmax.f32 %v10322_v9, %v10378_v47  ;;  %v3334_v2 = vmax.f32 %v10355_v37, %v10432_v32 }
 0x88b   :  { %v10466_v60 = vadd.f32 1e-05, %v3394_v40  ;;  %v3374_v58 = vmul.f32 0.25, %v3358_v41  ;;  %v3382_v45 = vmul.f32 %v10455_v5, %v10455_v5  ;;  %8092 = vrsqrt.f32 %v10411_v63  ;;  %7362 = vmatpush3.bf16.msra.mxu1 %v8026_v27  ;;  %v8027_v27 = vld [vmem:[%s12158_s8 + $0x80] sm:$0xff]  }
 0x88c   :  { %v3397_v11 = vmax.f32 %v3389_v25, 0.0  ;;  %v3400_v38 = vmax.f32 %v3392_v43, 0.0  ;;  %7784 = vrot.lane.b32.xlu0 %v7783_v16, %s8276_s25  ;;  %v7788_v54 = vpack.i.bf16 %v3336_v42, %v3335_v17  ;;  %v7793_v50 = vpack.i.bf16 %v3334_v2, %v3333_v6  ;;  %7363 = vmatprep.subr.bf16.mxu1 %v8027_v27 }
 0x88d   :  { %v3390_v59 = vsub.f32 %v3374_v58, %v3382_v45  ;;  %8094 = vrsqrt.f32 %v10428_v29  ;;  %v10473_v9 = vadd.f32 1e-05, %v3399_v10  ;;  %v3247_v3 = vmin.f32 %v12295_v26, %v12294_v52 }
 0x88e   :  { %7789 = vrot.lane.b32.xlu1 %v7788_v54, %s8277_s26  ;;  %8096 = vrsqrt.f32 %v10426_v57  ;;  %v10477_v37 = vadd.f32 1e-05, %v3400_v38  ;;  %v10479_v31 = vadd.f32 1e-05, %v3397_v11  ;;  %v3248_v18 = vmin.f32 %v10143_v12, %v10216_v20 }
 0x88f   :  { %v3398_v30 = vmax.f32 %v3390_v59, 0.0  ;;  %8098 = vrsqrt.f32 %v10466_v60  ;;  %v3245_v51 = vmin.f32 %v12297_v62, %v12296_v61  ;;  %v3246_v0 = vmin.f32 %v10148_v36, %v10230_v35  ;;  %7364 = vmatpush3.bf16.msra.mxu1 %v8027_v27 }
 0x890   :  { %7794 = vrot.lane.b32.xlu0 %v7793_v50, %s8277_s26  ;;  %8100 = vrsqrt.f32 %v10473_v9  ;;  %v3295_v28 = vmin.f32 %v3247_v3, %v10262_v8  ;;  %vm3425_vm8 = vcmp.eq.f32.partialorder %v10411_v63, inf  ;;  %v3296_v44 = vmin.f32 %v3248_v18, %v10289_v13 }
 0x891   :  { %v10483_v56 = vadd.f32 1e-05, %v3398_v30  ;;  %8102 = vrsqrt.f32 %v10477_v37  ;;  %v10504_v23 = vmin.f32 %v3245_v51, %v10273_v48  ;;  %v10507_v12 = vmin.f32 %v3246_v0, %v10306_v39  ;;  %v8028_v51 = vld [vmem:[%s12151_s3 + $0x38] sm:$0xff]  }
 0x892   :  { %8104 = vrsqrt.f32 %v10479_v31  ;;  %vm3427_vm9 = vcmp.eq.f32.partialorder %v10411_v63, 0.0  ;;  %v3428_v36 = vand.u32 2147483648, %v10411_v63  ;;  %vm3432_vm10 = vcmp.eq.f32.partialorder %v10428_v29, inf  ;;  %7373 = vmatprep.subr.bf16.mxu0 %v8028_v51 }
 0x893   :  { %8106 = vrsqrt.f32 %v10483_v56  ;;  %vm3434_vm11 = vcmp.eq.f32.partialorder %v10428_v29, 0.0  ;;  %v3435_v8 = vand.u32 2147483648, %v10428_v29  ;;  %vm3411_vm12 = vcmp.eq.f32.partialorder %v10426_v57, inf  ;;  %7374 = vmatpush3.bf16.msra.mxu0 %v8028_v51 }
 0x894   :  { %vm3413_vm13 = vcmp.eq.f32.partialorder %v10426_v57, 0.0  ;;  %v3414_v40 = vand.u32 2147483648, %v10426_v57  ;;  %v3344_v10 = vmin.f32 %v3296_v44, %v10414_v21  ;;  %vm3418_vm14 = vcmp.eq.f32.partialorder %v10466_v60, inf }
 0x895   :  { %vm3420_vm15 = vcmp.eq.f32.partialorder %v10466_v60, 0.0  ;;  %v3421_v4 = vand.u32 2147483648, %v10466_v60  ;;  %v3343_v53 = vmin.f32 %v3295_v28, %v10375_v7  ;;  %v3341_v24 = vmin.f32 %v10504_v23, %v10378_v47 }
 0x896   :  { %v3342_v21 = vmin.f32 %v10507_v12, %v10432_v32  ;;  %vm3453_vm2 = vcmp.eq.f32.partialorder %v10473_v9, inf  ;;  %vm3455_vm3 = vcmp.eq.f32.partialorder %v10473_v9, 0.0  ;;  %v3456_v32 = vand.u32 2147483648, %v10473_v9 }
 0x897   :  { %v7813_v6 = vpack.i.bf16 %v3344_v10, %v3343_v53  ;;  %vm3460_vm5 = vcmp.eq.f32.partialorder %v10477_v37, inf  ;;  %vm3462_vm6 = vcmp.eq.f32.partialorder %v10477_v37, 0.0  ;;  %v3463_v59 = vand.u32 2147483648, %v10477_v37 }
 0x898   :  { %v8093_v46 = vpop.eup %8092  ;;  %vm3439_vm7 = vcmp.eq.f32.partialorder %v10479_v31, inf  ;;  %v3449_v18 = vand.u32 2147483648, %v10483_v56 }
 0x899   :  { %v3424_v20 = vmul.f32 %v8093_v46, %v10411_v63 }
 0x89a   :  { %v8095_v35 = vpop.eup %8094 }
 0x89b   :  { %v8097_v48 = vpop.eup %8096  ;;  %v3426_v13 = vsel %vm3425_vm8, %v10411_v63, %v3424_v20  ;;  %v3431_v39 = vmul.f32 %v8095_v35, %v10428_v29  ;;  %vm3446_vm8 = vcmp.eq.f32.partialorder %v10483_v56, inf }
 0x89c   :  { %v3410_v34 = vmul.f32 %v8097_v48, %v10426_v57  ;;  %v8099_v25 = vpop.eup %8098  ;;  %v3429_v41 = vsel %vm3427_vm9, %v3428_v36, %v3426_v13  ;;  %vm3448_vm9 = vcmp.eq.f32.partialorder %v10483_v56, 0.0 }
 0x89d   :  { %v3433_v1 = vsel %vm3432_vm10, %v10428_v29, %v3431_v39  ;;  %v3417_v43 = vmul.f32 %v8099_v25, %v10466_v60  ;;  %v8101_v42 = vpop.eup %8100  ;;  %vm3441_vm10 = vcmp.eq.f32.partialorder %v10479_v31, 0.0 }
 0x89e   :  { %v3436_v16 = vsel %vm3434_vm11, %v3435_v8, %v3433_v1  ;;  %v3412_v17 = vsel %vm3411_vm12, %v10426_v57, %v3410_v34  ;;  %v8103_v47 = vpop.eup %8102  ;;  %v3452_v29 = vmul.f32 %v8101_v42, %v10473_v9 }
 0x89f   :  { %v7798_v7 = vpack.i.bf16 %v3436_v16, %v3429_v41  ;;  %v3419_v63 = vsel %vm3418_vm14, %v10466_v60, %v3417_v43  ;;  %v8105_v2 = vpop.eup %8104  ;;  %v3415_v58 = vsel %vm3413_vm13, %v3414_v40, %v3412_v17  ;;  %v3459_v11 = vmul.f32 %v8103_v47, %v10477_v37 }
 0x8a0   :  { %v3422_v45 = vsel %vm3420_vm15, %v3421_v4, %v3419_v63  ;;  %v8107_v38 = vpop.eup %8106  ;;  %v3454_v50 = vsel %vm3453_vm2, %v10473_v9, %v3452_v29  ;;  %v3438_v30 = vmul.f32 %v8105_v2, %v10479_v31  ;;  %v7808_v9 = vpack.i.bf16 %v3342_v21, %v3341_v24 }
 0x8a1   :  { %7799 = vrot.lane.b32.xlu1 %v7798_v7, %s8278_s29  ;;  %v7803_v54 = vpack.i.bf16 %v3422_v45, %v3415_v58  ;;  %v3461_v52 = vsel %vm3460_vm5, %v10477_v37, %v3459_v11  ;;  %v3445_v57 = vmul.f32 %v8107_v38, %v10483_v56  ;;  %v3457_v60 = vsel %vm3455_vm3, %v3456_v32, %v3454_v50 }
 0x8a2   :  { %v3464_v26 = vsel %vm3462_vm6, %v3463_v59, %v3461_v52  ;;  %v3440_v3 = vsel %vm3439_vm7, %v10479_v31, %v3438_v30  ;;  %v3442_v37 = vand.u32 2147483648, %v10479_v31 }
 0x8a3   :  { %7804 = vrot.lane.b32.xlu0 %v7803_v54, %s8278_s29  ;;  %v7823_v61 = vpack.i.bf16 %v3464_v26, %v3457_v60  ;;  %v3447_v62 = vsel %vm3446_vm8, %v10483_v56, %v3445_v57 }
 0x8a4   :  { %v3450_v0 = vsel %vm3448_vm9, %v3449_v18, %v3447_v62  ;;  %v3443_v28 = vsel %vm3441_vm10, %v3442_v37, %v3440_v3 }
 0x8a5   :  { %7814 = vrot.lane.b32.xlu1 %v7813_v6, %s8276_s25  ;;  %v7818_v27 = vpack.i.bf16 %v3450_v0, %v3443_v28 }
 0x8a7   :  { %7809 = vrot.lane.b32.xlu0 %v7808_v9, %s8276_s25 }
 0x8a9   :  { %7824 = vrot.lane.b32.xlu1 %v7823_v61, %s8278_s29 }
 0x8ab   :  { %7819 = vrot.lane.b32.xlu0 %v7818_v27, %s8278_s29 }
 0x8f7   :  { %v7770_v46 = vpop.permute.xlu1 %7769 }
 0x8f8   :  { %v7772_v20 = vunpack.i.h.bf16 %v7770_v46  ;;  %v7771_v36 = vunpack.i.l.bf16 %v7770_v46  ;;  %v8029_v46 = vld [vmem:[%s12151_s3 + $0x30] sm:$0xff]  }
 0x8f9   :  { %7375 = vmatprep.subr.bf16.mxu0 %v8029_v46 }
 0x8fa   :  { %v7780_v56 = vpop.permute.xlu0 %7779  ;;  %v3563_v25 = vsel %vm128_vm0, %v10344_v19, %v7771_v36  ;;  %v3564_v1 = vsel %vm128_vm0, %v10369_v14, %v7772_v20  ;;  %7376 = vmatpush3.bf16.msra.mxu0 %v8029_v46  ;;  %v8216_v46 = vld [vmem:[%s12155_s2 + $0x18] sm:$0xff]  }
 0x8fb   :  { %v7782_v35 = vunpack.i.h.bf16 %v7780_v56  ;;  %v7781_v31 = vunpack.i.l.bf16 %v7780_v56  ;;  %v8030_v56 = vld [vmem:[%s12153_s4 + $0x38] sm:$0xff]  }
 0x8fc   :  { %v7775_v44 = vpop.permute.xlu1 %7774  ;;  %7385 = vmatprep.subr.bf16.mxu1 %v8030_v56 }
 0x8fd   :  { %v7777_v48 = vunpack.i.h.bf16 %v7775_v44  ;;  %v7776_v13 = vunpack.i.l.bf16 %v7775_v44  ;;  %v3562_v53 = vsel %vm128_vm0, %v10384_v15, %v7782_v35  ;;  %v3561_v24 = vsel %vm128_vm0, %v10359_v55, %v7781_v31  ;;  %v8031_v44 = vld [vmem:[%s12153_s4 + $0x30] sm:$0xff]  }
 0x8fe   :  { %v7785_v23 = vpop.permute.xlu0 %7784 }
 0x8ff   :  { %v7787_v40 = vunpack.i.h.bf16 %v7785_v23  ;;  %v7786_v10 = vunpack.i.l.bf16 %v7785_v23  ;;  %v3571_v41 = vsel %vm683_vm1, %v3563_v25, %v7776_v13  ;;  %v3572_v16 = vsel %vm683_vm1, %v3564_v1, %v7777_v48  ;;  %v8032_v23 = vld [vmem:[%s12154_s5 + $0x38] sm:$0xff]   ;;  %v6402_v48 = vld [vmem:[%s12160_s9 + $0x2] ss:$0 sm:$0xff] }
 0x900   :  { %v7790_v12 = vpop.permute.xlu1 %7789  ;;  %7397 = vmatprep.subr.bf16.mxu0 %v8032_v23 }
 0x901   :  { %v3569_v7 = vsel %vm683_vm1, %v3561_v24, %v7786_v10  ;;  %v3570_v19 = vsel %vm683_vm1, %v3562_v53, %v7787_v40  ;;  %v7792_v15 = vunpack.i.h.bf16 %v7790_v12  ;;  %v7791_v63 = vunpack.i.l.bf16 %v7790_v12  ;;  %v7343_v12 = vpop.f32.mrf.mxu0 }
 0x902   :  { %v7795_v8 = vpop.permute.xlu0 %7794 }
 0x903   :  { %v7797_v29 = vunpack.i.h.bf16 %v7795_v8  ;;  %v7796_v32 = vunpack.i.l.bf16 %v7795_v8  ;;  %v3567_v57 = vsel %vm128_vm0, %v10395_v22, %v7791_v63  ;;  %v3568_v60 = vsel %vm128_vm0, %v10443_v33, %v7792_v15  ;;  %v3648_v20 = vpop.f32.mrf.mxu0 }
 0x904   :  { %v3649_v40 = vadd.f32 %v6402_v48, %v3648_v20  ;;  %v8221_v20 = vld [vmem:[%s12155_s2 + $0x40] sm:$0xff]  }
 0x905   :  { %v3566_v26 = vsel %vm128_vm0, %v10455_v5, %v7797_v29  ;;  %v3565_v3 = vsel %vm128_vm0, %v10404_v49, %v7796_v32  ;;  %v7344_v36 = vpop.f32.mrf.mxu0 }
 0x906   :  { %v3660_v10 = vadd.f32 %v7344_v36, %v6402_v48  ;;  %v8222_v36 = vld [vmem:[%s12155_s2 + $0x48] sm:$0xff]  }
 0x907   :  { %v3651_v35 = vpop.f32.mrf.mxu0 }
 0x908   :  { %v3652_v25 = vadd.f32 %v6402_v48, %v3651_v35  ;;  %v8223_v35 = vld [vmem:[%s12155_s2 + $0x50] sm:$0xff]  }
 0x909   :  { %v7347_v31 = vpop.f32.mrf.mxu0 }
 0x90b   :  { %v3664_v13 = vpop.f32.mrf.mxu0 }
 0x90c   :  { %v3665_v29 = vadd.f32 %v6402_v48, %v3664_v13  ;;  %v8227_v13 = vld [vmem:[%s12155_s2 + $0x70] sm:$0xff]  }
 0x90d   :  { %v7348_v24 = vpop.f32.mrf.mxu0 }
 0x90e   :  { %v3676_v32 = vadd.f32 %v7348_v24, %v6402_v48 }
 0x90f   :  { %v3667_v15 = vpop.f32.mrf.mxu0 }
 0x913   :  { %v7800_v39 = vpop.permute.xlu1 %7799 }
 0x914   :  { %v7802_v34 = vunpack.i.h.bf16 %v7800_v39  ;;  %v7801_v4 = vunpack.i.l.bf16 %v7800_v39 }
 0x915   :  { %v7805_v21 = vpop.permute.xlu0 %7804 }
 0x916   :  { %v7807_v17 = vunpack.i.h.bf16 %v7805_v21  ;;  %v7806_v43 = vunpack.i.l.bf16 %v7805_v21  ;;  %v3580_v14 = vsel %vm1269_vm4, %v3572_v16, %v7802_v34  ;;  %v3579_v6 = vsel %vm1269_vm4, %v3571_v41, %v7801_v4 }
 0x917   :  { %v7815_v42 = vpop.permute.xlu1 %7814  ;;  %v3586_v45 = vpack.c.bf16 %v3580_v14, %v3579_v6  ;;  %v3657_v34 = vadd.f32 %v7343_v12, %v6402_v48  ;;  %v12302_v14 = vld [vmem:[#allocation12_spill] sm:$0xff]  ;;  %v8220_v12 = vld [vmem:[%s12155_s2 + $0x38] sm:$0xff]  }
 0x918   :  { %v3577_v47 = vsel %vm1269_vm4, %v3569_v7, %v7806_v43  ;;  %v3578_v55 = vsel %vm1269_vm4, %v3570_v19, %v7807_v17  ;;  %v7817_v11 = vunpack.i.h.bf16 %v7815_v42  ;;  %v7816_v38 = vunpack.i.l.bf16 %v7815_v42  ;;  %v12298_v17 = vld [vmem:[#allocation6_spill] sm:$0xff]  ;;  %v12300_v7 = vld [vmem:[#allocation13_spill] sm:$0xff] }
 0x919   :  { %v7810_v2 = vpop.permute.xlu0 %7809  ;;  %v3585_v58 = vpack.c.bf16 %v3578_v55, %v3577_v47  ;;  %v12304_v47 = vld [vmem:[#allocation14_spill] sm:$0xff] }
 0x91a   :  { %v7812_v50 = vunpack.i.h.bf16 %v7810_v2  ;;  %v7811_v59 = vunpack.i.l.bf16 %v7810_v2  ;;  %v3575_v61 = vsel %vm683_vm1, %v3567_v57, %v7816_v38  ;;  %v3576_v37 = vsel %vm683_vm1, %v3568_v60, %v7817_v11  ;;  %v8033_v38 = vld [vmem:[%s12154_s5 + $0x30] sm:$0xff]  }
 0x91b   :  { %v7825_v54 = vpop.permute.xlu1 %7824  ;;  %7365 = vmatprep.mubr.bf16.mxu1 %v3585_v58  ;;  %v3673_v58 = vadd.f32 %v7347_v31, %v6402_v48  ;;  %v12306_v60 = vld [vmem:[#allocation8_spill] sm:$0xff]  ;;  %v8224_v31 = vld [vmem:[%s12155_s2 + $0x58] sm:$0xff]  }
 0x91c   :  { %v7827_v30 = vunpack.i.h.bf16 %v7825_v54  ;;  %v7826_v52 = vunpack.i.l.bf16 %v7825_v54  ;;  %7366 = vmatmul.mubr.bf16.vlgmr.msra.gmra.mxu1 %v3586_v45  ;;  %v3574_v9 = vsel %vm683_vm1, %v3566_v26, %v7812_v50  ;;  %v3573_v22 = vsel %vm683_vm1, %v3565_v3, %v7811_v59  ;;  %v8034_v3 = vld [vmem:[%s12157_s7 + $0x38] sm:$0xff]  }
 0x91d   :  { %v7820_v18 = vpop.permute.xlu0 %7819  ;;  %7386 = vmatpush3.bf16.msra.mxu1 %v8030_v56  ;;  %v3668_v54 = vadd.f32 %v6402_v48, %v3667_v15  ;;  %v8217_v56 = vld [vmem:[%s12155_s2 + $0x20] sm:$0xff]   ;;  %v8226_v48 = vld [vmem:[%s12155_s2 + $0x68] sm:$0xff]  }
 0x91e   :  { %v7822_v62 = vunpack.i.h.bf16 %v7820_v18  ;;  %v7821_v51 = vunpack.i.l.bf16 %v7820_v18  ;;  %v3584_v0 = vsel %vm1269_vm4, %v3576_v37, %v7827_v30  ;;  %v3583_v33 = vsel %vm1269_vm4, %v3575_v61, %v7826_v52  ;;  %7387 = vmatprep.subr.bf16.mxu1 %v8031_v44  ;;  %v12308_v18 = vld [vmem:[#allocation2_spill] sm:$0xff]  ;;  %v12310_v37 = vld [vmem:[#allocation3_spill] sm:$0xff] }
 0x91f   :  { %v3588_v27 = vpack.c.bf16 %v3584_v0, %v3583_v33  ;;  %v8212_v33 = vld [vmem:[%s12155_s2] sm:$0xff]  }
 0x920   :  { %v3581_v5 = vsel %vm1269_vm4, %v3573_v22, %v7821_v51  ;;  %v3582_v28 = vsel %vm1269_vm4, %v3574_v9, %v7822_v62  ;;  %v12312_v51 = vld [vmem:[#allocation4_spill] sm:$0xff]  ;;  %v8232_v15 = vld [vmem:[%s12156_s1 + $0x20] sm:$0xff]  }
 0x921   :  { %v3587_v49 = vpack.c.bf16 %v3582_v28, %v3581_v5  ;;  %7388 = vmatpush3.bf16.msra.mxu1 %v8031_v44  ;;  %v8213_v5 = vld [vmem:[%s12156_s1] sm:$0xff]   ;;  %v8035_v28 = vld [vmem:[%s12157_s7 + $0x30] sm:$0xff]   ;;  %v8218_v44 = vld [vmem:[%s12155_s2 + $0x28] sm:$0xff]  }
 0x923   :  { %7369 = vmatprep.mubr.bf16.mxu1 %v3587_v49  ;;  %v8214_v49 = vld [vmem:[%s12155_s2 + $0x8] sm:$0xff]  }
 0x924   :  { %7370 = vmatmul.mubr.bf16.gmra.mxu1 %v3588_v27  ;;  %v8215_v27 = vld [vmem:[%s12155_s2 + $0x10] sm:$0xff]  }
 0x9dc   :  { %v7367_v8 = vpop.f32.mrf.mxu1 }
 0x9dd   :  { %v3811_v21 = vadd.f32 %v7367_v8, %v3657_v34  ;;  %v8225_v8 = vld [vmem:[%s12155_s2 + $0x60] sm:$0xff]  }
 0x9de   :  { %v3778_v39 = vpop.f32.mrf.mxu1 }
 0x9df   :  { %v3809_v1 = vadd.f32 %v3778_v39, %v3649_v40  ;;  %v10638_v55 = vadd.f32 %v3811_v21, %v12304_v47  ;;  %v8228_v39 = vld [vmem:[%s12155_s2 + $0x78] sm:$0xff]   ;;  %v8233_v47 = vld [vmem:[%s12156_s1 + $0x28] sm:$0xff]  }
 0x9e0   :  { %v7368_v4 = vpop.f32.mrf.mxu1 }
 0x9e1   :  { %v3812_v53 = vadd.f32 %v7368_v4, %v3660_v10  ;;  %v10632_v19 = vadd.f32 %v3809_v1, %v12300_v7  ;;  %12305 = vst [vmem:[#allocation10_spill] sm:$0xff] %v10638_v55  ;;  %v8230_v7 = vld [vmem:[%s12156_s1 + $0x10] sm:$0xff]  }
 0x9e2   :  { %v3781_v41 = vpop.f32.mrf.mxu1 }
 0x9e3   :  { %v3810_v16 = vadd.f32 %v3781_v41, %v3652_v25  ;;  %v10629_v43 = vadd.f32 %v3812_v53, %v12298_v17  ;;  %12301 = vst [vmem:[#allocation7_spill] sm:$0xff] %v10632_v19 }
 0x9e4   :  { %v7371_v42 = vpop.f32.mrf.mxu1 }
 0x9e5   :  { %12299 = vst [vmem:[#allocation9_spill] sm:$0xff] %v10629_v43  ;;  %v10635_v6 = vadd.f32 %v3810_v16, %v12302_v14  ;;  %v10646_v45 = vpack.c.bf16 %v10629_v43, %v10638_v55  ;;  %v3815_v30 = vadd.f32 %v7371_v42, %v3673_v58  ;;  %v8229_v42 = vld [vmem:[%s12156_s1 + $0x8] sm:$0xff]   ;;  %v8231_v14 = vld [vmem:[%s12156_s1 + $0x18] sm:$0xff]   ;;  %v8238_v58 = vld [vmem:[%s12156_s1 + $0x50] sm:$0xff]  }
 0x9e6   :  { %v3794_v63 = vpop.f32.mrf.mxu1 }
 0x9e7   :  { %12303 = vst [vmem:[#allocation5_spill] sm:$0xff] %v10635_v6  ;;  %v10642_v2 = vpack.c.bf16 %v10635_v6, %v10632_v19  ;;  %v3813_v50 = vadd.f32 %v3794_v63, %v3665_v29  ;;  %v10672_v9 = vadd.f32 %v3815_v30, %v12312_v51  ;;  %v8234_v63 = vld [vmem:[%s12156_s1 + $0x30] sm:$0xff]   ;;  %v8235_v29 = vld [vmem:[%s12156_s1 + $0x38] sm:$0xff]  }
 0x9e8   :  { %v7372_v11 = vpop.f32.mrf.mxu1 }
 0x9e9   :  { %v3816_v59 = vadd.f32 %v7372_v11, %v3676_v32  ;;  %7377 = vmatprep.mubr.msk.bf16.mxu0 %vm128_vm0, %v10642_v2  ;;  %7389 = vmatprep.mubr.msk.bf16.mxu1 %vm128_vm0, %v10642_v2  ;;  %v10666_v61 = vadd.f32 %v3813_v50, %v12308_v18  ;;  %12313 = vst [vmem:[#allocation12_spill] sm:$0xff] %v10672_v9  ;;  %v8236_v32 = vld [vmem:[%s12156_s1 + $0x40] sm:$0xff]   ;;  %v8243_v50 = vld [vmem:[%s12156_s1 + $0x78] sm:$0xff]  }
 0x9ea   :  { %v3797_v52 = vpop.f32.mrf.mxu1  ;;  %7378 = vmatmul.mubr.msk.bf16.vlgmr.msra.gmra.mxu0 %vm128_vm0, %v10646_v45  ;;  %7390 = vmatmul.mubr.msk.bf16.vlgmr.msra.gmra.mxu1 %vm128_vm0, %v10646_v45  ;;  %v8240_v11 = vld [vmem:[%s12156_s1 + $0x60] sm:$0xff]  }
 0x9eb   :  { %v3814_v57 = vadd.f32 %v3797_v52, %v3668_v54  ;;  %7398 = vmatpush3.bf16.msra.mxu0 %v8032_v23  ;;  %v10660_v26 = vadd.f32 %v3816_v59, %v12306_v60  ;;  %12309 = vst [vmem:[#allocation6_spill] sm:$0xff] %v10666_v61  ;;  %v8219_v23 = vld [vmem:[%s12155_s2 + $0x30] sm:$0xff]  }
 0x9ec   :  { %7399 = vmatprep.subr.bf16.mxu0 %v8033_v38  ;;  %v8242_v54 = vld [vmem:[%s12156_s1 + $0x70] sm:$0xff]  }
 0x9ed   :  { %12307 = vst [vmem:[#allocation11_spill] sm:$0xff] %v10660_v26  ;;  %v10669_v62 = vadd.f32 %v3814_v57, %v12310_v37  ;;  %v3828_v0 = vpack.c.bf16 %v10660_v26, %v10672_v9 }
 0x9ef   :  { %12311 = vst [vmem:[#allocation13_spill] sm:$0xff] %v10669_v62  ;;  %v3827_v22 = vpack.c.bf16 %v10669_v62, %v10666_v61  ;;  %7400 = vmatpush3.bf16.msra.mxu0 %v8033_v38  ;;  %v8241_v38 = vld [vmem:[%s12156_s1 + $0x68] sm:$0xff]  }
 0x9f0   :  { %7473 = vmatprep.subr.bf16.mxu0 %v8034_v3 }
 0x9f1   :  { %7381 = vmatprep.mubr.msk.bf16.mxu0 %vm128_vm0, %v3827_v22  ;;  %7393 = vmatprep.mubr.msk.bf16.mxu1 %vm128_vm0, %v3827_v22 }
 0x9f2   :  { %7382 = vmatmul.mubr.msk.bf16.gmra.mxu0 %vm128_vm0, %v3828_v0  ;;  %7394 = vmatmul.mubr.msk.bf16.gmra.mxu1 %vm128_vm0, %v3828_v0 }
 0x9f3   :  { %7401 = vmatprep.mubr.msk.bf16.mxu0 %vm128_vm0, %v8212_v33  ;;  %7441 = vmatprep.mubr.msk.bf16.mxu1 %vm683_vm1, %v8213_v5 }
 0x9fa   :  { %7402 = vmatmul.mubr.msk.bf16.vlgmr.msra.gmra.mxu0 %vm128_vm0, %v8214_v49 }
 0x9fb   :  { %7405 = vmatprep.mubr.msk.bf16.mxu0 %vm128_vm0, %v8215_v27  ;;  %7474 = vmatpush3.bf16.msra.mxu0 %v8034_v3  ;;  %v8036_v27 = vld [vmem:[%s12158_s8 + $0xf8] sm:$0xff]  }
 0x9fc   :  { %7475 = vmatprep.subr.bf16.mxu0 %v8035_v28 }
 0x9ff   :  { %7476 = vmatpush3.bf16.msra.mxu0 %v8035_v28 }
 0xa02   :  { %7406 = vmatmul.mubr.msk.bf16.gmra.mxu0 %vm128_vm0, %v8216_v46  ;;  %v8037_v46 = vld [vmem:[%s12158_s8 + $0xf0] sm:$0xff]  }
 0xa03   :  { %7409 = vmatprep.mubr.msk.bf16.mxu0 %vm128_vm0, %v8217_v56 }
 0xa0a   :  { %7410 = vmatmul.mubr.msk.bf16.gmra.mxu0 %vm128_vm0, %v8218_v44 }
 0xa0b   :  { %7413 = vmatprep.mubr.msk.bf16.mxu0 %vm128_vm0, %v8219_v23  ;;  %v8038_v23 = vld [vmem:[%s12158_s8 + $0xe8] sm:$0xff]  }
 0xa12   :  { %7414 = vmatmul.mubr.msk.bf16.gmra.mxu0 %vm128_vm0, %v8220_v12 }
 0xa13   :  { %7417 = vmatprep.mubr.msk.bf16.mxu0 %vm128_vm0, %v8221_v20 }
 0xa1a   :  { %7418 = vmatmul.mubr.msk.bf16.gmra.mxu0 %vm128_vm0, %v8222_v36  ;;  %v8039_v36 = vld [vmem:[%s12158_s8 + $0xe0] sm:$0xff]  }
 0xa1b   :  { %7421 = vmatprep.mubr.msk.bf16.mxu0 %vm128_vm0, %v8223_v35 }
 0xa22   :  { %7422 = vmatmul.mubr.msk.bf16.gmra.mxu0 %vm128_vm0, %v8224_v31 }
 0xa23   :  { %7425 = vmatprep.mubr.msk.bf16.mxu0 %vm128_vm0, %v8225_v8 }
 0xa2a   :  { %7426 = vmatmul.mubr.msk.bf16.gmra.mxu0 %vm128_vm0, %v8226_v48 }
 0xa2b   :  { %7429 = vmatprep.mubr.msk.bf16.mxu0 %vm128_vm0, %v8227_v13 }
 0xa32   :  { %7430 = vmatmul.mubr.msk.bf16.gmra.mxu0 %vm128_vm0, %v8228_v39 }
 0xa33   :  { %7477 = vmatprep.mubr.msk.bf16.mxu0 %vm128_vm0, %v10642_v2  ;;  %v8237_v2 = vld [vmem:[%s12156_s1 + $0x48] sm:$0xff]  }
 0xa3a   :  { %7478 = vmatmul.mubr.msk.bf16.vlgmr.msra.gmra.mxu0 %vm128_vm0, %v10646_v45  ;;  %v8239_v45 = vld [vmem:[%s12156_s1 + $0x58] sm:$0xff]  }
 0xa3b   :  { %7481 = vmatprep.mubr.msk.bf16.mxu0 %vm128_vm0, %v3827_v22 }
 0xa42   :  { %7482 = vmatmul.mubr.msk.bf16.gmra.mxu0 %vm128_vm0, %v3828_v0 }
 0xaaa   :  { %v7379_v40 = vpop.f32.mrf.mxu0  ;;  %v7391_v37 = vpop.f32.mrf.mxu1 }
 0xaac   :  { %v3892_v10 = vpop.f32.mrf.mxu0  ;;  %v3982_v22 = vpop.f32.mrf.mxu1 }
 0xaae   :  { %v7380_v34 = vpop.f32.mrf.mxu0  ;;  %v7392_v33 = vpop.f32.mrf.mxu1 }
 0xaaf   :  { %v4014_v16 = vpack.c.bf16 %v7380_v34, %v7379_v40 }
 0xab0   :  { %v3895_v4 = vpop.f32.mrf.mxu0  ;;  %v3985_v28 = vpop.f32.mrf.mxu1 }
 0xab1   :  { %v4013_v17 = vpack.c.bf16 %v3895_v4, %v3892_v10 }
 0xab2   :  { %v7383_v25 = vpop.f32.mrf.mxu0  ;;  %v7395_v56 = vpop.f32.mrf.mxu1 }
 0xab4   :  { %v3908_v1 = vpop.f32.mrf.mxu0  ;;  %v3998_v12 = vpop.f32.mrf.mxu1 }
 0xab6   :  { %v7384_v53 = vpop.f32.mrf.mxu0  ;;  %v7396_v35 = vpop.f32.mrf.mxu1 }
 0xab7   :  { %v4016_v24 = vpack.c.bf16 %v7384_v53, %v7383_v25 }
 0xab8   :  { %v3911_v21 = vpop.f32.mrf.mxu0  ;;  %v4001_v8 = vpop.f32.mrf.mxu1 }
 0xab9   :  { %v4015_v41 = vpack.c.bf16 %v3911_v21, %v3908_v1  ;;  %7433 = vmatprep.subr.bf16.mxu1 %v4016_v24 }
 0xaba   :  { %7434 = vmatpush3.bf16.msra.mxu1 %v4016_v24  ;;  %v7403_v59 = vpop.f32.mrf.mxu0 }
 0xabb   :  { %7435 = vmatprep.subr.bf16.mxu1 %v4015_v41 }
 0xabc   :  { %v4068_v30 = vpop.f32.mrf.mxu0 }
 0xabe   :  { %7436 = vmatpush3.bf16.msra.mxu1 %v4015_v41  ;;  %v7404_v52 = vpop.f32.mrf.mxu0 }
 0xabf   :  { %7437 = vmatprep.subr.bf16.mxu1 %v4014_v16 }
 0xac0   :  { %v4071_v57 = vpop.f32.mrf.mxu0 }
 0xac2   :  { %7438 = vmatpush3.bf16.msra.mxu1 %v4014_v16  ;;  %v7407_v60 = vpop.f32.mrf.mxu0  ;;  %v6448_v16 = vld [vmem:[%s12159_s6 + $0x3] ss:$0 sm:$0xff] }
 0xac3   :  { %7439 = vmatprep.subr.bf16.mxu1 %v4013_v17 }
 0xac4   :  { %v4084_v3 = vpop.f32.mrf.mxu0 }
 0xac6   :  { %7440 = vmatpush3.bf16.msra.mxu1 %v4013_v17  ;;  %v7408_v18 = vpop.f32.mrf.mxu0 }
 0xac7   :  { %7485 = vmatprep.subr.bf16.mxu1 %v8036_v27 }
 0xac8   :  { %v4087_v51 = vpop.f32.mrf.mxu0 }
 0xac9   :  { %7442 = vmatmul.mubr.msk.bf16.vlgmr.msra.gmra.mxu1 %vm683_vm1, %v8229_v42 }
 0xaca   :  { %7445 = vmatprep.mubr.msk.bf16.mxu1 %vm683_vm1, %v8230_v7  ;;  %v7411_v0 = vpop.f32.mrf.mxu0  ;;  %7486 = vmatpush3.bf16.msra.mxu1 %v8036_v27  ;;  %v10860_v27 = vadd.f32 %v7395_v56, %v6448_v16 }
 0xacb   :  { %7487 = vmatprep.subr.bf16.mxu1 %v8037_v46 }
 0xacc   :  { %v4100_v5 = vpop.f32.mrf.mxu0  ;;  %12314 = vst [vmem:[#allocation14_spill] sm:$0xff] %v10860_v27 }
 0xace   :  { %v7412_v49 = vpop.f32.mrf.mxu0  ;;  %7488 = vmatpush3.bf16.msra.mxu1 %v8037_v46 }
 0xacf   :  { %7489 = vmatprep.subr.bf16.mxu1 %v8038_v23 }
 0xad0   :  { %v10825_v44 = vpop.f32.mrf.mxu0 }
 0xad1   :  { %7446 = vmatmul.mubr.msk.bf16.gmra.mxu1 %vm683_vm1, %v8231_v14  ;;  %v10852_v14 = vadd.f32 %v7391_v37, %v6448_v16 }
 0xad2   :  { %7449 = vmatprep.mubr.msk.bf16.mxu1 %vm683_vm1, %v8232_v15  ;;  %v10830_v20 = vpop.f32.mrf.mxu0  ;;  %7490 = vmatpush3.bf16.msra.mxu1 %v8038_v23 }
 0xad3   :  { %7491 = vmatprep.subr.bf16.mxu1 %v8039_v36 }
 0xad4   :  { %v10835_v31 = vpop.f32.mrf.mxu0 }
 0xad6   :  { %7492 = vmatpush3.bf16.msra.mxu1 %v8039_v36  ;;  %v10837_v48 = vpop.f32.mrf.mxu0 }
 0xad8   :  { %v10839_v39 = vpop.f32.mrf.mxu0 }
 0xad9   :  { %7450 = vmatmul.mubr.msk.bf16.gmra.mxu1 %vm683_vm1, %v8233_v47 }
 0xada   :  { %7453 = vmatprep.mubr.msk.bf16.mxu1 %vm683_vm1, %v8234_v63  ;;  %v10841_v34 = vpop.f32.mrf.mxu0  ;;  %v10854_v63 = vadd.f32 %v6448_v16, %v3982_v22  ;;  %v10864_v22 = vadd.f32 %v6448_v16, %v3998_v12 }
 0xadc   :  { %v10843_v1 = vpop.f32.mrf.mxu0 }
 0xade   :  { %v10845_v21 = vpop.f32.mrf.mxu0 }
 0xae0   :  { %v10850_v42 = vpop.f32.mrf.mxu0 }
 0xae1   :  { %7454 = vmatmul.mubr.msk.bf16.gmra.mxu1 %vm683_vm1, %v8235_v29  ;;  %v10856_v29 = vadd.f32 %v7392_v33, %v6448_v16  ;;  %v10866_v33 = vadd.f32 %v7396_v35, %v6448_v16 }
 0xae2   :  { %7457 = vmatprep.mubr.msk.bf16.mxu1 %vm683_vm1, %v8236_v32  ;;  %v10862_v46 = vpop.f32.mrf.mxu0 }
 0xae4   :  { %v10894_v12 = vpop.f32.mrf.mxu0 }
 0xae9   :  { %7458 = vmatmul.mubr.msk.bf16.gmra.mxu1 %vm683_vm1, %v8237_v2 }
 0xaea   :  { %7461 = vmatprep.mubr.msk.bf16.mxu1 %vm683_vm1, %v8238_v58 }
 0xaf1   :  { %7462 = vmatmul.mubr.msk.bf16.gmra.mxu1 %vm683_vm1, %v8239_v45 }
 0xaf2   :  { %7465 = vmatprep.mubr.msk.bf16.mxu1 %vm683_vm1, %v8240_v11 }
 0xaf9   :  { %7466 = vmatmul.mubr.msk.bf16.gmra.mxu1 %vm683_vm1, %v8241_v38 }
 0xafa   :  { %7469 = vmatprep.mubr.msk.bf16.mxu1 %vm683_vm1, %v8242_v54 }
 0xb01   :  { %7470 = vmatmul.mubr.msk.bf16.gmra.mxu1 %vm683_vm1, %v8243_v50  ;;  %v10858_v50 = vadd.f32 %v6448_v16, %v3985_v28 }
 0xb89   :  { %v7443_v13 = vpop.f32.mrf.mxu1 }
 0xb8a   :  { %v4238_v15 = vadd.f32 %v7443_v13, %v7403_v59 }
 0xb8b   :  { %v4229_v40 = vpop.f32.mrf.mxu1 }
 0xb8c   :  { %v4230_v47 = vadd.f32 %v4229_v40, %v4068_v30 }
 0xb8d   :  { %v7444_v10 = vpop.f32.mrf.mxu1 }
 0xb8e   :  { %v4241_v32 = vadd.f32 %v7444_v10, %v7404_v52  ;;  %v10869_v52 = vadd.f32 %v4238_v15, %v10852_v14 }
 0xb8f   :  { %v4232_v4 = vpop.f32.mrf.mxu1 }
 0xb90   :  { %v4233_v45 = vadd.f32 %v4232_v4, %v4071_v57  ;;  %v10872_v57 = vadd.f32 %v4230_v47, %v10854_v63  ;;  %v4366_v13 = vmul.f32 %v10869_v52, %v10869_v52 }
 0xb91   :  { %v7447_v25 = vpop.f32.mrf.mxu1 }
 0xb92   :  { %v4254_v11 = vadd.f32 %v7447_v25, %v7407_v60  ;;  %v10874_v60 = vadd.f32 %v6448_v16, %v4001_v8  ;;  %v4364_v40 = vmul.f32 %v10872_v57, %v10872_v57 }
 0xb93   :  { %v4245_v53 = vpop.f32.mrf.mxu1 }
 0xb94   :  { %v4246_v38 = vadd.f32 %v4245_v53, %v4084_v3  ;;  %v10877_v3 = vadd.f32 %v4241_v32, %v10856_v29  ;;  %v10886_v28 = vadd.f32 %v4254_v11, %v10860_v27 }
 0xb95   :  { %v7448_v24 = vpop.f32.mrf.mxu1 }
 0xb96   :  { %v4257_v54 = vadd.f32 %v7448_v24, %v7408_v18  ;;  %12315 = vst [vmem:[#allocation8_spill] sm:$0xff] %v10886_v28  ;;  %v10889_v56 = vadd.f32 %v4246_v38, %v10864_v22  ;;  %v4367_v4 = vmul.f32 %v10877_v3, %v10877_v3  ;;  %v4370_v16 = vmul.f32 %v10886_v28, %v10886_v28 }
 0xb97   :  { %v4248_v41 = vpop.f32.mrf.mxu1 }
 0xb98   :  { %v4249_v37 = vadd.f32 %v4248_v41, %v4087_v51  ;;  %12316 = vst [vmem:[#allocation2_spill] sm:$0xff] %v10889_v56  ;;  %v10892_v23 = vadd.f32 %v4257_v54, %v10866_v33 }
 0xb99   :  { %v7451_v17 = vpop.f32.mrf.mxu1 }
 0xb9a   :  { %v4270_v2 = vadd.f32 %v7451_v17, %v7411_v0  ;;  %v10897_v36 = vadd.f32 %v4249_v37, %v10874_v60  ;;  %v4371_v17 = vmul.f32 %v10892_v23, %v10892_v23 }
 0xb9b   :  { %v4261_v7 = vpop.f32.mrf.mxu1 }
 0xb9c   :  { %v4262_v59 = vadd.f32 %v4261_v7, %v4100_v5  ;;  %v10880_v18 = vadd.f32 %v4270_v2, %v10852_v14  ;;  %v10883_v5 = vadd.f32 %v4233_v45, %v10858_v50  ;;  %v10924_v7 = vpop.f32.mrf.mxu0  ;;  %v10928_v15 = vmul.f32 %v10897_v36, %v10897_v36 }
 0xb9d   :  { %v7452_v58 = vpop.f32.mrf.mxu1 }
 0xb9e   :  { %v4273_v51 = vadd.f32 %v7452_v58, %v7412_v49  ;;  %v10900_v49 = vadd.f32 %v4262_v59, %v10854_v63  ;;  %v4406_v25 = vmul.f32 %v10880_v18, %v10880_v18  ;;  %v4365_v41 = vmul.f32 %v10883_v5, %v10883_v5 }
 0xb9f   :  { %v4264_v30 = vpop.f32.mrf.mxu1  ;;  %v4382_v58 = vadd.f32 %v10880_v18, %v10869_v52  ;;  %v4390_v11 = vmax.f32 %v10869_v52, %v10880_v18  ;;  %v4398_v38 = vmin.f32 %v10869_v52, %v10880_v18  ;;  %v10958_v18 = vpop.f32.mrf.mxu0 }
 0xba0   :  { %v4265_v35 = vadd.f32 %v4264_v30, %v10825_v44  ;;  %v10913_v53 = vadd.f32 %v4273_v51, %v10856_v29  ;;  %v4414_v54 = vadd.f32 %v4406_v25, %v4366_v13  ;;  %v4380_v51 = vadd.f32 %v10900_v49, %v10872_v57 }
 0xba1   :  { %v7455_v0 = vpop.f32.mrf.mxu1 }
 0xba2   :  { %v4286_v10 = vadd.f32 %v7455_v0, %v10830_v20  ;;  %v4368_v20 = vmul.f32 %v10889_v56, %v10889_v56  ;;  %v10933_v47 = vadd.f32 %v4265_v35, %v10858_v50  ;;  %v4407_v37 = vmul.f32 %v10913_v53, %v10913_v53 }
 0xba3   :  { %v4277_v8 = vpop.f32.mrf.mxu1  ;;  %v4383_v13 = vadd.f32 %v10913_v53, %v10877_v3 }
 0xba4   :  { %v4278_v44 = vadd.f32 %v4277_v8, %v10835_v31  ;;  %v4404_v31 = vmul.f32 %v10900_v49, %v10900_v49  ;;  %v10939_v45 = vadd.f32 %v4286_v10, %v10860_v27 }
 0xba5   :  { %v7456_v24 = vpop.f32.mrf.mxu1 }
 0xba6   :  { %v4289_v32 = vadd.f32 %v7456_v24, %v10837_v48  ;;  %12317 = vst [vmem:[#allocation3_spill] sm:$0xff] %v10939_v45  ;;  %v10948_v59 = vadd.f32 %v4278_v44, %v10864_v22  ;;  %v4412_v8 = vadd.f32 %v4404_v31, %v4364_v40  ;;  %v4391_v24 = vmax.f32 %v10877_v3, %v10913_v53 }
 0xba7   :  { %v4280_v2 = vpop.f32.mrf.mxu1  ;;  %v4399_v40 = vmin.f32 %v10877_v3, %v10913_v53  ;;  %v4415_v31 = vadd.f32 %v4407_v37, %v4367_v4  ;;  %v4397_v3 = vmin.f32 %v10883_v5, %v10933_v47  ;;  %v7427_v4 = vpop.f32.mrf.mxu0  ;;  %v4386_v37 = vadd.f32 %v10939_v45, %v10886_v28 }
 0xba8   :  { %12318 = vst [vmem:[#allocation4_spill] sm:$0xff] %v10948_v59  ;;  %v4281_v48 = vadd.f32 %v4280_v2, %v10839_v39  ;;  %v4405_v39 = vmul.f32 %v10933_v47, %v10933_v47  ;;  %v10965_v10 = vadd.f32 %v4289_v32, %v10866_v33  ;;  %v4381_v2 = vadd.f32 %v10933_v47, %v10883_v5 }
 0xba9   :  { %v7459_v30 = vpop.f32.mrf.mxu1  ;;  %v4408_v32 = vmul.f32 %v10948_v59, %v10948_v59  ;;  %v4164_v6 = vpop.f32.mrf.mxu0 }
 0xbaa   :  { %v4302_v0 = vadd.f32 %v7459_v30, %v10841_v34  ;;  %v4410_v34 = vmul.f32 %v10939_v45, %v10939_v45  ;;  %v10979_v30 = vadd.f32 %v4281_v48, %v10874_v60  ;;  %v4413_v53 = vadd.f32 %v4405_v39, %v4365_v41 }
 0xbab   :  { %v4293_v25 = vpop.f32.mrf.mxu1  ;;  %v4411_v48 = vmul.f32 %v10965_v10, %v10965_v10  ;;  %v4416_v41 = vadd.f32 %v4408_v32, %v4368_v20 }
 0xbac   :  { %v4294_v44 = vadd.f32 %v4293_v25, %v10843_v1  ;;  %v4422_v35 = vadd.f32 %v4302_v0, %v10852_v14  ;;  %v4389_v25 = vmax.f32 %v10883_v5, %v10933_v47  ;;  %v4418_v0 = vadd.f32 %v4410_v34, %v4370_v16 }
 0xbad   :  { %v7460_v52 = vpop.f32.mrf.mxu1  ;;  %v4392_v5 = vmax.f32 %v10889_v56, %v10948_v59  ;;  %v4409_v47 = vmul.f32 %v10979_v30, %v10979_v30  ;;  %v4387_v16 = vadd.f32 %v10965_v10, %v10892_v23  ;;  %v4419_v19 = vadd.f32 %v4411_v48, %v4371_v17 }
 0xbae   :  { %v4305_v1 = vadd.f32 %v7460_v52, %v10845_v21  ;;  %v4420_v9 = vadd.f32 %v4294_v44, %v10854_v63  ;;  %v4384_v21 = vadd.f32 %v10948_v59, %v10889_v56  ;;  %v4394_v52 = vmax.f32 %v10886_v28, %v10939_v45  ;;  %v7428_v45 = vpop.f32.mrf.mxu0 }
 0xbaf   :  { %v4296_v62 = vpop.f32.mrf.mxu1  ;;  %v4454_v34 = vmul.f32 %v4422_v35, %v4422_v35  ;;  %v4385_v20 = vadd.f32 %v10979_v30, %v10897_v36  ;;  %v11017_v48 = vmax.f32 %v4390_v11, %v4422_v35  ;;  %v11019_v59 = vmin.f32 %v4398_v38, %v4422_v35 }
 0xbb0   :  { %v4423_v39 = vadd.f32 %v4305_v1, %v10856_v29  ;;  %v4297_v61 = vadd.f32 %v4296_v62, %v10850_v42  ;;  %v4452_v32 = vmul.f32 %v4420_v9, %v4420_v9  ;;  %v4430_v62 = vadd.f32 %v4422_v35, %v4382_v58 }
 0xbb1   :  { %v7463_v44 = vpop.f32.mrf.mxu1  ;;  %v4462_v28 = vadd.f32 %v4454_v34, %v4414_v54  ;;  %v12320_v11 = vmin.f32 %v10872_v57, %v10900_v49 }
 0xbb2   :  { %v4318_v26 = vadd.f32 %v7463_v44, %v10862_v46  ;;  %v4421_v1 = vadd.f32 %v4297_v61, %v10858_v50  ;;  %v4393_v46 = vmax.f32 %v10897_v36, %v10979_v30  ;;  %v4417_v44 = vadd.f32 %v4409_v47, %v10928_v15 }
 0xbb3   :  { %v4309_v43 = vpop.f32.mrf.mxu1  ;;  %v4455_v55 = vmul.f32 %v4423_v39, %v4423_v39  ;;  %v4428_v61 = vadd.f32 %v4420_v9, %v4380_v51  ;;  %v12319_v15 = vmax.f32 %v10872_v57, %v10900_v49  ;;  %v11033_v38 = vmin.f32 %v12320_v11, %v4420_v9 }
 0xbb4   :  { %v11011_v42 = vadd.f32 %v4318_v26, %v10860_v27  ;;  %v4310_v56 = vadd.f32 %v4309_v43, %v10894_v12  ;;  %v4460_v43 = vadd.f32 %v4452_v32, %v4412_v8  ;;  %v4453_v12 = vmul.f32 %v4421_v1, %v4421_v1 }
 0xbb5   :  { %v7464_v17 = vpop.f32.mrf.mxu1  ;;  %v11028_v47 = vmax.f32 %v12319_v15, %v4420_v9  ;;  %v4431_v54 = vadd.f32 %v4423_v39, %v4383_v13  ;;  %v11040_v51 = vmax.f32 %v4391_v24, %v4423_v39  ;;  %v4463_v35 = vadd.f32 %v4455_v55, %v4415_v31  ;;  %v4167_v15 = vpop.f32.mrf.mxu0 }
 0xbb6   :  { %v11022_v58 = vadd.f32 %v4310_v56, %v10864_v22  ;;  %v4321_v26 = vadd.f32 %v7464_v17, %v10924_v7  ;;  %v4458_v56 = vmul.f32 %v11011_v42, %v11011_v42  ;;  %v11045_v17 = vmin.f32 %v4399_v40, %v4423_v39 }
 0xbb7   :  { %v4312_v27 = vpop.f32.mrf.mxu1  ;;  %v4429_v9 = vadd.f32 %v4421_v1, %v4381_v2  ;;  %v11047_v49 = vmax.f32 %v4389_v25, %v4421_v1  ;;  %v11049_v13 = vmin.f32 %v4397_v3, %v4421_v1  ;;  %v4434_v24 = vadd.f32 %v11011_v42, %v4386_v37  ;;  %v7431_v1 = vpop.f32.mrf.mxu0 }
 0xbb8   :  { %v11038_v7 = vadd.f32 %v4321_v26, %v10866_v33  ;;  %v4456_v8 = vmul.f32 %v11022_v58, %v11022_v58  ;;  %v4313_v34 = vadd.f32 %v4312_v27, %v10958_v18  ;;  %v4461_v26 = vadd.f32 %v4453_v12, %v4413_v53 }
 0xbb9   :  { %v7467_v32 = vpop.f32.mrf.mxu1  ;;  %v11057_v18 = vadd.f32 %v4458_v56, %v4418_v0  ;;  %v11063_v25 = vmax.f32 %v4394_v52, %v11011_v42  ;;  %v4432_v3 = vadd.f32 %v11022_v58, %v4384_v21  ;;  %v11071_v39 = vmax.f32 %v4392_v5, %v11022_v58 }
 0xbba   :  { %v4334_v57 = vadd.f32 %v7467_v32, %v7427_v4  ;;  %v4459_v55 = vmul.f32 %v11038_v7, %v11038_v7  ;;  %v11055_v31 = vadd.f32 %v4313_v34, %v10874_v60  ;;  %v11066_v4 = vadd.f32 %v4456_v8, %v4416_v41 }
 0xbbb   :  { %v4325_v27 = vpop.f32.mrf.mxu1  ;;  %v11080_v21 = vadd.f32 %v11038_v7, %v4387_v16 }
 0xbbc   :  { %v11060_v40 = vadd.f32 %v4334_v57, %v10852_v14  ;;  %v4326_v2 = vadd.f32 %v4325_v27, %v4164_v6  ;;  %v4457_v53 = vmul.f32 %v11055_v31, %v11055_v31  ;;  %v11082_v41 = vadd.f32 %v4459_v55, %v4419_v19 }
 0xbbd   :  { %v7468_v37 = vpop.f32.mrf.mxu1  ;;  %v11085_v12 = vadd.f32 %v11055_v31, %v4385_v20  ;;  %v11104_v32 = vmax.f32 %v4393_v46, %v11055_v31 }
 0xbbe   :  { %v4478_v0 = vadd.f32 %v11060_v40, %v4430_v62  ;;  %v4502_v14 = vmul.f32 %v11060_v40, %v11060_v40  ;;  %v11077_v6 = vadd.f32 %v4326_v2, %v10854_v63  ;;  %v4337_v52 = vadd.f32 %v7468_v37, %v7428_v45 }
 0xbbf   :  { %v4328_v5 = vpop.f32.mrf.mxu1  ;;  %v12321_v62 = vmax.f32 %v10892_v23, %v10965_v10  ;;  %v11098_v19 = vadd.f32 %v4457_v53, %v4417_v44 }
 0xbc0   :  { %v4510_v56 = vadd.f32 %v4502_v14, %v4462_v28  ;;  %v11093_v63 = vmul.f32 0.25, %v4478_v0  ;;  %v4476_v45 = vadd.f32 %v11077_v6, %v4428_v61  ;;  %v4500_v16 = vmul.f32 %v11077_v6, %v11077_v6  ;;  %v4180_v61 = vpop.f32.mrf.mxu0 }
 0xbc1   :  { %v11091_v11 = vmax.f32 %v12321_v62, %v11038_v7  ;;  %v11101_v20 = vadd.f32 %v4337_v52, %v10856_v29  ;;  %v4329_v8 = vadd.f32 %v4328_v5, %v4167_v15  ;;  %v7471_v34 = vpop.f32.mrf.mxu1 }
 0xbc2   :  { %v4526_v57 = vmul.f32 0.25, %v4510_v56  ;;  %v4534_v28 = vmul.f32 %v11093_v63, %v11093_v63  ;;  %v4508_v55 = vadd.f32 %v4500_v16, %v4460_v43  ;;  %v11108_v27 = vmul.f32 0.25, %v4476_v45  ;;  %v12322_v56 = vld [vmem:[#allocation14_spill] sm:$0xff] }
 0xbc3   :  { %v4479_v2 = vadd.f32 %v11101_v20, %v4431_v54  ;;  %v4503_v44 = vmul.f32 %v11101_v20, %v11101_v20  ;;  %v11114_v29 = vadd.f32 %v4329_v8, %v10858_v50  ;;  %v4350_v15 = vadd.f32 %v7471_v34, %v7431_v1  ;;  %v4341_v53 = vpop.f32.mrf.mxu1 }
 0xbc4   :  { %v4542_v46 = vsub.f32 %v4526_v57, %v4534_v28  ;;  %v4524_v37 = vmul.f32 0.25, %v4508_v55  ;;  %v4532_v0 = vmul.f32 %v11108_v27, %v11108_v27  ;;  %v4342_v14 = vadd.f32 %v4341_v53, %v4180_v61  ;;  %v7432_v61 = vpop.f32.mrf.mxu0 }
 0xbc5   :  { %v4511_v43 = vadd.f32 %v4503_v44, %v4463_v35  ;;  %v11118_v52 = vmul.f32 0.25, %v4479_v2  ;;  %v4477_v5 = vadd.f32 %v11114_v29, %v4429_v9  ;;  %v4501_v54 = vmul.f32 %v11114_v29, %v11114_v29  ;;  %v7472_v9 = vpop.f32.mrf.mxu1 }
 0xbc6   :  { %v4540_v62 = vsub.f32 %v4524_v37, %v4532_v0  ;;  %v11124_v50 = vadd.f32 %v4350_v15, %v12322_v56  ;;  %v11127_v1 = vadd.f32 %v4342_v14, %v10864_v22  ;;  %v4486_v45 = vmax.f32 %v11017_v48, %v11060_v40 }
 0xbc7   :  { %v4527_v16 = vmul.f32 0.25, %v4511_v43  ;;  %v4535_v35 = vmul.f32 %v11118_v52, %v11118_v52  ;;  %v4509_v8 = vadd.f32 %v4501_v54, %v4461_v26  ;;  %v11133_v34 = vmul.f32 0.25, %v4477_v5 }
 0xbc8   :  { %v4550_v57 = vmax.f32 %v4542_v46, 0.0  ;;  %v4482_v28 = vadd.f32 %v11124_v50, %v4434_v24  ;;  %v4506_v55 = vmul.f32 %v11124_v50, %v11124_v50  ;;  %v4494_v22 = vmin.f32 %v11019_v59, %v11060_v40  ;;  %v8040_v59 = vld [vmem:[%s12158_s8 + $0xd8] sm:$0xff]  }
 0xbc9   :  { %v4543_v2 = vsub.f32 %v4527_v16, %v4535_v35  ;;  %v4525_v48 = vmul.f32 0.25, %v4509_v8  ;;  %v4533_v44 = vmul.f32 %v11133_v34, %v11133_v34  ;;  %v4480_v26 = vadd.f32 %v11127_v1, %v4432_v3  ;;  %v4344_v3 = vpop.f32.mrf.mxu1  ;;  %7493 = vmatprep.subr.bf16.mxu1 %v8040_v59 }
 0xbca   :  { %v4514_v15 = vadd.f32 %v4506_v55, %v11057_v18  ;;  %v11144_v53 = vmul.f32 0.25, %v4482_v28  ;;  %v4504_v24 = vmul.f32 %v11127_v1, %v11127_v1  ;;  %v4484_v46 = vmax.f32 %v11028_v47, %v11077_v6  ;;  %v4183_v47 = vpop.f32.mrf.mxu0  ;;  %7494 = vmatpush3.bf16.msra.mxu1 %v8040_v59 }
 0xbcb   :  { %v4548_v40 = vmax.f32 %v4540_v62, 0.0  ;;  %v4551_v37 = vmax.f32 %v4543_v2, 0.0  ;;  %v11153_v0 = vmul.f32 0.25, %v4480_v26  ;;  %v4353_v14 = vadd.f32 %v7472_v9, %v7432_v61 }
 0xbcc   :  { %v4530_v43 = vmul.f32 0.25, %v4514_v15  ;;  %v4538_v18 = vmul.f32 %v11144_v53, %v11144_v53  ;;  %v4512_v5 = vadd.f32 %v4504_v24, %v11066_v4  ;;  %v4487_v54 = vmax.f32 %v11040_v51, %v11101_v20 }
 0xbcd   :  { %v11160_v56 = vadd.f32 1e-05, %v4550_v57  ;;  %v4541_v16 = vsub.f32 %v4525_v48, %v4533_v44  ;;  %v11163_v62 = vadd.f32 %v4353_v14, %v10866_v33  ;;  %v4492_v35 = vmin.f32 %v11033_v38, %v11077_v6 }
 0xbce   :  { %v4546_v8 = vsub.f32 %v4530_v43, %v4538_v18  ;;  %v4536_v9 = vmul.f32 %v11153_v0, %v11153_v0  ;;  %v7828_v4 = vpack.i.bf16 %v4487_v54, %v4486_v45  ;;  %v4345_v28 = vadd.f32 %v4344_v3, %v4183_v47 }
 0xbcf   :  { %v4528_v55 = vmul.f32 0.25, %v4512_v5  ;;  %v4483_v51 = vadd.f32 %v11163_v62, %v11080_v21  ;;  %v4507_v57 = vmul.f32 %v11163_v62, %v11163_v62  ;;  %v4485_v33 = vmax.f32 %v11047_v49, %v11114_v29  ;;  %v8041_v21 = vld [vmem:[%s12158_s8 + $0xd0] sm:$0xff]   ;;  %v8042_v49 = vld [vmem:[%s12158_s8 + $0xc8] sm:$0xff]  }
 0xbd0   :  { %v11175_v61 = vadd.f32 1e-05, %v4548_v40  ;;  %v11177_v38 = vadd.f32 1e-05, %v4551_v37  ;;  %7829 = vrot.lane.b32.xlu1 %v7828_v4, %s8277_s26  ;;  %v11181_v6 = vadd.f32 %v4345_v28, %v10874_v60  ;;  %v4495_v45 = vmin.f32 %v11045_v17, %v11101_v20  ;;  %7495 = vmatprep.subr.bf16.mxu1 %v8041_v21  ;;  %v12324_v4 = vld [vmem:[#allocation8_spill] sm:$0xff] }
 0xbd1   :  { %v4515_v2 = vadd.f32 %v4507_v57, %v11082_v41  ;;  %v11192_v48 = vmul.f32 0.25, %v4483_v51  ;;  %v7838_v44 = vpack.i.bf16 %v4485_v33, %v4484_v46  ;;  %v4493_v60 = vmin.f32 %v11049_v13, %v11114_v29  ;;  %7496 = vmatpush3.bf16.msra.mxu1 %v8041_v21  ;;  %v12325_v51 = vld [vmem:[#allocation4_spill] sm:$0xff]  ;;  %v12326_v57 = vld [vmem:[#allocation2_spill] sm:$0xff] }
 0xbd2   :  { %v4549_v26 = vmax.f32 %v4541_v16, 0.0  ;;  %v4554_v15 = vmax.f32 %v4546_v8, 0.0  ;;  %v4481_v17 = vadd.f32 %v11181_v6, %v11085_v12  ;;  %v4505_v20 = vmul.f32 %v11181_v6, %v11181_v6  ;;  %7497 = vmatprep.subr.bf16.mxu1 %v8042_v49 }
 0xbd3   :  { %v4544_v24 = vsub.f32 %v4528_v55, %v4536_v9  ;;  %v4531_v59 = vmul.f32 0.25, %v4515_v2  ;;  %v4539_v41 = vmul.f32 %v11192_v48, %v11192_v48  ;;  %7839 = vrot.lane.b32.xlu0 %v7838_v44, %s8277_s26  ;;  %v7833_v46 = vpack.i.bf16 %v4495_v45, %v4494_v22  ;;  %v12323_v9 = vld [vmem:[#allocation3_spill] sm:$0xff] }
 0xbd4   :  { %v4513_v13 = vadd.f32 %v4505_v20, %v11098_v19  ;;  %v11204_v29 = vmul.f32 0.25, %v4481_v17  ;;  %v7843_v40 = vpack.i.bf16 %v4493_v60, %v4492_v35  ;;  %v4490_v12 = vmax.f32 %v11063_v25, %v11124_v50 }
 0xbd5   :  { %v4547_v37 = vsub.f32 %v4531_v59, %v4539_v41  ;;  %7834 = vrot.lane.b32.xlu1 %v7833_v46, %s8276_s25  ;;  %v4491_v14 = vmax.f32 %v11091_v11, %v11163_v62  ;;  %v4488_v3 = vmax.f32 %v11071_v39, %v11127_v1  ;;  %v4489_v22 = vmax.f32 %v11104_v32, %v11181_v6 }
 0xbd6   :  { %v11215_v19 = vadd.f32 1e-05, %v4549_v26  ;;  %v4529_v43 = vmul.f32 0.25, %v4513_v13  ;;  %v4537_v18 = vmul.f32 %v11204_v29, %v11204_v29  ;;  %8108 = vrsqrt.f32 %v11160_v56  ;;  %7498 = vmatpush3.bf16.msra.mxu1 %v8042_v49  ;;  %v8043_v49 = vld [vmem:[%s12158_s8 + $0xc0] sm:$0xff]  }
 0xbd7   :  { %v4552_v25 = vmax.f32 %v4544_v24, 0.0  ;;  %v4555_v5 = vmax.f32 %v4547_v37, 0.0  ;;  %7844 = vrot.lane.b32.xlu0 %v7843_v40, %s8276_s25  ;;  %v7848_v54 = vpack.i.bf16 %v4491_v14, %v4490_v12  ;;  %v7853_v11 = vpack.i.bf16 %v4489_v22, %v4488_v3  ;;  %7499 = vmatprep.subr.bf16.mxu1 %v8043_v49 }
 0xbd8   :  { %v4545_v47 = vsub.f32 %v4529_v43, %v4537_v18  ;;  %8110 = vrsqrt.f32 %v11177_v38  ;;  %v11222_v39 = vadd.f32 1e-05, %v4554_v15  ;;  %v4402_v28 = vmin.f32 %v12324_v4, %v12323_v9 }
 0xbd9   :  { %7849 = vrot.lane.b32.xlu1 %v7848_v54, %s8277_s26  ;;  %8112 = vrsqrt.f32 %v11175_v61  ;;  %v11226_v32 = vadd.f32 1e-05, %v4555_v5  ;;  %v11228_v35 = vadd.f32 1e-05, %v4552_v25  ;;  %v4403_v55 = vmin.f32 %v10892_v23, %v10965_v10 }
 0xbda   :  { %v4553_v16 = vmax.f32 %v4545_v47, 0.0  ;;  %8114 = vrsqrt.f32 %v11215_v19  ;;  %v4400_v33 = vmin.f32 %v12326_v57, %v12325_v51  ;;  %v4401_v45 = vmin.f32 %v10897_v36, %v10979_v30  ;;  %7500 = vmatpush3.bf16.msra.mxu1 %v8043_v49 }
 0xbdb   :  { %7854 = vrot.lane.b32.xlu0 %v7853_v11, %s8277_s26  ;;  %8116 = vrsqrt.f32 %v11222_v39  ;;  %v4450_v21 = vmin.f32 %v4402_v28, %v11011_v42  ;;  %vm4580_vm11 = vcmp.eq.f32.partialorder %v11160_v56, inf  ;;  %v4451_v44 = vmin.f32 %v4403_v55, %v11038_v7 }
 0xbdc   :  { %v11232_v8 = vadd.f32 1e-05, %v4553_v16  ;;  %8118 = vrsqrt.f32 %v11226_v32  ;;  %v11253_v60 = vmin.f32 %v4400_v33, %v11022_v58  ;;  %v11256_v23 = vmin.f32 %v4401_v45, %v11055_v31  ;;  %v8044_v33 = vld [vmem:[%s12151_s3 + $0x48] sm:$0xff]  }
 0xbdd   :  { %8120 = vrsqrt.f32 %v11228_v35  ;;  %vm4582_vm12 = vcmp.eq.f32.partialorder %v11160_v56, 0.0  ;;  %v4583_v36 = vand.u32 2147483648, %v11160_v56  ;;  %vm4587_vm13 = vcmp.eq.f32.partialorder %v11177_v38, inf  ;;  %7509 = vmatprep.subr.bf16.mxu0 %v8044_v33 }
 0xbde   :  { %8122 = vrsqrt.f32 %v11232_v8  ;;  %vm4589_vm14 = vcmp.eq.f32.partialorder %v11177_v38, 0.0  ;;  %v4590_v42 = vand.u32 2147483648, %v11177_v38  ;;  %vm4566_vm15 = vcmp.eq.f32.partialorder %v11175_v61, inf  ;;  %7510 = vmatpush3.bf16.msra.mxu0 %v8044_v33 }
 0xbdf   :  { %vm4568_vm2 = vcmp.eq.f32.partialorder %v11175_v61, 0.0  ;;  %v4569_v26 = vand.u32 2147483648, %v11175_v61  ;;  %v4499_v15 = vmin.f32 %v4451_v44, %v11163_v62  ;;  %vm4573_vm3 = vcmp.eq.f32.partialorder %v11215_v19, inf }
 0xbe0   :  { %vm4575_vm5 = vcmp.eq.f32.partialorder %v11215_v19, 0.0  ;;  %v4576_v20 = vand.u32 2147483648, %v11215_v19  ;;  %v4498_v41 = vmin.f32 %v4450_v21, %v11124_v50  ;;  %v4496_v46 = vmin.f32 %v11253_v60, %v11127_v1 }
 0xbe1   :  { %v4497_v62 = vmin.f32 %v11256_v23, %v11181_v6  ;;  %vm4608_vm6 = vcmp.eq.f32.partialorder %v11222_v39, inf  ;;  %vm4610_vm7 = vcmp.eq.f32.partialorder %v11222_v39, 0.0  ;;  %v4611_v6 = vand.u32 2147483648, %v11222_v39 }
 0xbe2   :  { %v7873_v3 = vpack.i.bf16 %v4499_v15, %v4498_v41  ;;  %vm4615_vm8 = vcmp.eq.f32.partialorder %v11226_v32, inf  ;;  %vm4617_vm9 = vcmp.eq.f32.partialorder %v11226_v32, 0.0  ;;  %v4618_v47 = vand.u32 2147483648, %v11226_v32 }
 0xbe3   :  { %v8109_v2 = vpop.eup %8108  ;;  %vm4594_vm10 = vcmp.eq.f32.partialorder %v11228_v35, inf  ;;  %v4604_v55 = vand.u32 2147483648, %v11232_v8 }
 0xbe4   :  { %v4579_v10 = vmul.f32 %v8109_v2, %v11160_v56 }
 0xbe5   :  { %v8111_v30 = vpop.eup %8110 }
 0xbe6   :  { %v8113_v58 = vpop.eup %8112  ;;  %v4581_v7 = vsel %vm4580_vm11, %v11160_v56, %v4579_v10  ;;  %v4586_v31 = vmul.f32 %v8111_v30, %v11177_v38  ;;  %vm4601_vm11 = vcmp.eq.f32.partialorder %v11232_v8, inf }
 0xbe7   :  { %v4565_v17 = vmul.f32 %v8113_v58, %v11175_v61  ;;  %v8115_v24 = vpop.eup %8114  ;;  %v4584_v13 = vsel %vm4582_vm12, %v4583_v36, %v4581_v7  ;;  %vm4603_vm12 = vcmp.eq.f32.partialorder %v11232_v8, 0.0 }
 0xbe8   :  { %v4588_v59 = vsel %vm4587_vm13, %v11177_v38, %v4586_v31  ;;  %v4572_v37 = vmul.f32 %v8115_v24, %v11215_v19  ;;  %v8117_v14 = vpop.eup %8116  ;;  %vm4596_vm13 = vcmp.eq.f32.partialorder %v11228_v35, 0.0 }
 0xbe9   :  { %v4591_v40 = vsel %vm4589_vm14, %v4590_v42, %v4588_v59  ;;  %v4567_v12 = vsel %vm4566_vm15, %v11175_v61, %v4565_v17  ;;  %v8119_v1 = vpop.eup %8118  ;;  %v4607_v38 = vmul.f32 %v8117_v14, %v11222_v39 }
 0xbea   :  { %v7858_v50 = vpack.i.bf16 %v4591_v40, %v4584_v13  ;;  %v4574_v56 = vsel %vm4573_vm3, %v11215_v19, %v4572_v37  ;;  %v8121_v22 = vpop.eup %8120  ;;  %v4570_v43 = vsel %vm4568_vm2, %v4569_v26, %v4567_v12  ;;  %v4614_v25 = vmul.f32 %v8119_v1, %v11226_v32 }
 0xbeb   :  { %v4577_v18 = vsel %vm4575_vm5, %v4576_v20, %v4574_v56  ;;  %v8123_v5 = vpop.eup %8122  ;;  %v4609_v11 = vsel %vm4608_vm6, %v11222_v39, %v4607_v38  ;;  %v4593_v16 = vmul.f32 %v8121_v22, %v11228_v35  ;;  %v7868_v39 = vpack.i.bf16 %v4497_v62, %v4496_v46 }
 0xbec   :  { %7859 = vrot.lane.b32.xlu1 %v7858_v50, %s8278_s29  ;;  %v7863_v54 = vpack.i.bf16 %v4577_v18, %v4570_v43  ;;  %v4616_v9 = vsel %vm4615_vm8, %v11226_v32, %v4614_v25  ;;  %v4600_v61 = vmul.f32 %v8123_v5, %v11232_v8  ;;  %v4612_v19 = vsel %vm4610_vm7, %v4611_v6, %v4609_v11 }
 0xbed   :  { %v4619_v4 = vsel %vm4617_vm9, %v4618_v47, %v4616_v9  ;;  %v4595_v28 = vsel %vm4594_vm10, %v11228_v35, %v4593_v16  ;;  %v4597_v32 = vand.u32 2147483648, %v11228_v35 }
 0xbee   :  { %7864 = vrot.lane.b32.xlu0 %v7863_v54, %s8278_s29  ;;  %v7883_v51 = vpack.i.bf16 %v4619_v4, %v4612_v19  ;;  %v4602_v57 = vsel %vm4601_vm11, %v11232_v8, %v4600_v61 }
 0xbef   :  { %v4605_v45 = vsel %vm4603_vm12, %v4604_v55, %v4602_v57  ;;  %v4598_v21 = vsel %vm4596_vm13, %v4597_v32, %v4595_v28 }
 0xbf0   :  { %7874 = vrot.lane.b32.xlu1 %v7873_v3, %s8276_s25  ;;  %v7878_v49 = vpack.i.bf16 %v4605_v45, %v4598_v21 }
 0xbf2   :  { %7869 = vrot.lane.b32.xlu0 %v7868_v39, %s8276_s25 }
 0xbf4   :  { %7884 = vrot.lane.b32.xlu1 %v7883_v51, %s8278_s29 }
 0xbf6   :  { %7879 = vrot.lane.b32.xlu0 %v7878_v49, %s8278_s29 }
 0xc42   :  { %v7830_v2 = vpop.permute.xlu1 %7829 }
 0xc43   :  { %v7832_v10 = vunpack.i.h.bf16 %v7830_v2  ;;  %v7831_v36 = vunpack.i.l.bf16 %v7830_v2  ;;  %v8045_v2 = vld [vmem:[%s12151_s3 + $0x40] sm:$0xff]  }
 0xc44   :  { %7511 = vmatprep.subr.bf16.mxu0 %v8045_v2 }
 0xc45   :  { %v7840_v8 = vpop.permute.xlu0 %7839  ;;  %v4718_v24 = vsel %vm128_vm0, %v11093_v63, %v7831_v36  ;;  %v4719_v59 = vsel %vm128_vm0, %v11118_v52, %v7832_v10  ;;  %7512 = vmatpush3.bf16.msra.mxu0 %v8045_v2  ;;  %v8248_v2 = vld [vmem:[%s12155_s2 + $0x18] sm:$0xff]  }
 0xc46   :  { %v7842_v30 = vunpack.i.h.bf16 %v7840_v8  ;;  %v7841_v35 = vunpack.i.l.bf16 %v7840_v8  ;;  %v8046_v8 = vld [vmem:[%s12153_s4 + $0x48] sm:$0xff]  }
 0xc47   :  { %v7835_v44 = vpop.permute.xlu1 %7834  ;;  %7521 = vmatprep.subr.bf16.mxu1 %v8046_v8 }
 0xc48   :  { %v7837_v58 = vunpack.i.h.bf16 %v7835_v44  ;;  %v7836_v7 = vunpack.i.l.bf16 %v7835_v44  ;;  %v4717_v41 = vsel %vm128_vm0, %v11133_v34, %v7842_v30  ;;  %v4716_v46 = vsel %vm128_vm0, %v11108_v27, %v7841_v35  ;;  %v8047_v44 = vld [vmem:[%s12153_s4 + $0x40] sm:$0xff]  }
 0xc49   :  { %v7845_v60 = vpop.permute.xlu0 %7844 }
 0xc4a   :  { %v7847_v26 = vunpack.i.h.bf16 %v7845_v60  ;;  %v7846_v15 = vunpack.i.l.bf16 %v7845_v60  ;;  %v4726_v13 = vsel %vm683_vm1, %v4718_v24, %v7836_v7  ;;  %v4727_v40 = vsel %vm683_vm1, %v4719_v59, %v7837_v58  ;;  %v8048_v60 = vld [vmem:[%s12154_s5 + $0x48] sm:$0xff]   ;;  %v6498_v58 = vld [vmem:[%s12160_s9 + $0x3] ss:$0 sm:$0xff] }
 0xc4b   :  { %v7850_v23 = vpop.permute.xlu1 %7849  ;;  %7533 = vmatprep.subr.bf16.mxu0 %v8048_v60 }
 0xc4c   :  { %v4724_v50 = vsel %vm683_vm1, %v4716_v46, %v7846_v15  ;;  %v4725_v63 = vsel %vm683_vm1, %v4717_v41, %v7847_v26  ;;  %v7852_v34 = vunpack.i.h.bf16 %v7850_v23  ;;  %v7851_v56 = vunpack.i.l.bf16 %v7850_v23  ;;  %v7479_v23 = vpop.f32.mrf.mxu0 }
 0xc4d   :  { %v7855_v42 = vpop.permute.xlu0 %7854 }
 0xc4e   :  { %v7857_v38 = vunpack.i.h.bf16 %v7855_v42  ;;  %v7856_v6 = vunpack.i.l.bf16 %v7855_v42  ;;  %v4722_v61 = vsel %vm128_vm0, %v11144_v53, %v7851_v56  ;;  %v4723_v19 = vsel %vm128_vm0, %v11192_v48, %v7852_v34  ;;  %v4803_v10 = vpop.f32.mrf.mxu0 }
 0xc4f   :  { %v4804_v26 = vadd.f32 %v6498_v58, %v4803_v10  ;;  %v8253_v10 = vld [vmem:[%s12155_s2 + $0x40] sm:$0xff]  }
 0xc50   :  { %v4721_v4 = vsel %vm128_vm0, %v11204_v29, %v7857_v38  ;;  %v4720_v28 = vsel %vm128_vm0, %v11153_v0, %v7856_v6  ;;  %v7480_v36 = vpop.f32.mrf.mxu0 }
 0xc51   :  { %v4815_v15 = vadd.f32 %v7480_v36, %v6498_v58  ;;  %v8254_v36 = vld [vmem:[%s12155_s2 + $0x48] sm:$0xff]  }
 0xc52   :  { %v4806_v30 = vpop.f32.mrf.mxu0 }
 0xc53   :  { %v4807_v24 = vadd.f32 %v6498_v58, %v4806_v30  ;;  %v8255_v30 = vld [vmem:[%s12155_s2 + $0x50] sm:$0xff]  }
 0xc54   :  { %v7483_v35 = vpop.f32.mrf.mxu0 }
 0xc56   :  { %v4819_v7 = vpop.f32.mrf.mxu0 }
 0xc57   :  { %v4820_v38 = vadd.f32 %v6498_v58, %v4819_v7  ;;  %v8259_v7 = vld [vmem:[%s12155_s2 + $0x70] sm:$0xff]  }
 0xc58   :  { %v7484_v46 = vpop.f32.mrf.mxu0 }
 0xc59   :  { %v4831_v6 = vadd.f32 %v7484_v46, %v6498_v58 }
 0xc5a   :  { %v4822_v34 = vpop.f32.mrf.mxu0 }
 0xc5e   :  { %v7860_v31 = vpop.permute.xlu1 %7859 }
 0xc5f   :  { %v7862_v17 = vunpack.i.h.bf16 %v7860_v31  ;;  %v7861_v20 = vunpack.i.l.bf16 %v7860_v31 }
 0xc60   :  { %v7865_v62 = vpop.permute.xlu0 %7864 }
 0xc61   :  { %v7867_v12 = vunpack.i.h.bf16 %v7865_v62  ;;  %v7866_v37 = vunpack.i.l.bf16 %v7865_v62  ;;  %v4735_v52 = vsel %vm1269_vm4, %v4727_v40, %v7862_v17  ;;  %v4734_v3 = vsel %vm1269_vm4, %v4726_v13, %v7861_v20 }
 0xc62   :  { %v7875_v14 = vpop.permute.xlu1 %7874  ;;  %v4741_v18 = vpack.c.bf16 %v4735_v52, %v4734_v3  ;;  %v4812_v17 = vadd.f32 %v7479_v23, %v6498_v58  ;;  %v12331_v52 = vld [vmem:[#allocation5_spill] sm:$0xff] }
 0xc63   :  { %v4732_v1 = vsel %vm1269_vm4, %v4724_v50, %v7866_v37  ;;  %v4733_v27 = vsel %vm1269_vm4, %v4725_v63, %v7867_v12  ;;  %v7877_v25 = vunpack.i.h.bf16 %v7875_v14  ;;  %v7876_v5 = vunpack.i.l.bf16 %v7875_v14  ;;  %v12327_v12 = vld [vmem:[#allocation9_spill] sm:$0xff]  ;;  %v12329_v50 = vld [vmem:[#allocation7_spill] sm:$0xff] }
 0xc64   :  { %v7870_v22 = vpop.permute.xlu0 %7869  ;;  %v4740_v43 = vpack.c.bf16 %v4733_v27, %v4732_v1  ;;  %v12333_v1 = vld [vmem:[#allocation10_spill] sm:$0xff]  ;;  %v8252_v23 = vld [vmem:[%s12155_s2 + $0x38] sm:$0xff]  }
 0xc65   :  { %v7872_v11 = vunpack.i.h.bf16 %v7870_v22  ;;  %v7871_v47 = vunpack.i.l.bf16 %v7870_v22  ;;  %v4730_v51 = vsel %vm683_vm1, %v4722_v61, %v7876_v5  ;;  %v4731_v32 = vsel %vm683_vm1, %v4723_v19, %v7877_v25  ;;  %v8049_v5 = vld [vmem:[%s12154_s5 + $0x40] sm:$0xff]   ;;  %v12335_v19 = vld [vmem:[#allocation11_spill] sm:$0xff] }
 0xc66   :  { %v7885_v54 = vpop.permute.xlu1 %7884  ;;  %7501 = vmatprep.mubr.bf16.mxu1 %v4740_v43  ;;  %v4828_v43 = vadd.f32 %v7483_v35, %v6498_v58  ;;  %v8256_v35 = vld [vmem:[%s12155_s2 + $0x58] sm:$0xff]  }
 0xc67   :  { %v7887_v16 = vunpack.i.h.bf16 %v7885_v54  ;;  %v7886_v9 = vunpack.i.l.bf16 %v7885_v54  ;;  %7502 = vmatmul.mubr.bf16.vlgmr.msra.gmra.mxu1 %v4741_v18  ;;  %v4729_v39 = vsel %vm683_vm1, %v4721_v4, %v7872_v11  ;;  %v4728_v53 = vsel %vm683_vm1, %v4720_v28, %v7871_v47  ;;  %v8050_v28 = vld [vmem:[%s12157_s7 + $0x48] sm:$0xff]  }
 0xc68   :  { %v7880_v55 = vpop.permute.xlu0 %7879  ;;  %7522 = vmatpush3.bf16.msra.mxu1 %v8046_v8  ;;  %v4823_v54 = vadd.f32 %v6498_v58, %v4822_v34  ;;  %v8249_v8 = vld [vmem:[%s12155_s2 + $0x20] sm:$0xff]   ;;  %v8258_v58 = vld [vmem:[%s12155_s2 + $0x68] sm:$0xff]  }
 0xc69   :  { %v7882_v57 = vunpack.i.h.bf16 %v7880_v55  ;;  %v7881_v33 = vunpack.i.l.bf16 %v7880_v55  ;;  %v4739_v45 = vsel %vm1269_vm4, %v4731_v32, %v7887_v16  ;;  %v4738_v48 = vsel %vm1269_vm4, %v4730_v51, %v7886_v9  ;;  %7523 = vmatprep.subr.bf16.mxu1 %v8047_v44  ;;  %v12337_v55 = vld [vmem:[#allocation6_spill] sm:$0xff]  ;;  %v12339_v32 = vld [vmem:[#allocation13_spill] sm:$0xff] }
 0xc6a   :  { %v4743_v49 = vpack.c.bf16 %v4739_v45, %v4738_v48  ;;  %v8244_v48 = vld [vmem:[%s12155_s2] sm:$0xff]  }
 0xc6b   :  { %v4736_v29 = vsel %vm1269_vm4, %v4728_v53, %v7881_v33  ;;  %v4737_v21 = vsel %vm1269_vm4, %v4729_v39, %v7882_v57  ;;  %v12341_v33 = vld [vmem:[#allocation12_spill] sm:$0xff]  ;;  %v8264_v34 = vld [vmem:[%s12156_s1 + $0x20] sm:$0xff]  }
 0xc6c   :  { %v4742_v0 = vpack.c.bf16 %v4737_v21, %v4736_v29  ;;  %7524 = vmatpush3.bf16.msra.mxu1 %v8047_v44  ;;  %v8245_v29 = vld [vmem:[%s12156_s1] sm:$0xff]   ;;  %v8250_v44 = vld [vmem:[%s12155_s2 + $0x28] sm:$0xff]  }
 0xc6d   :  { %v8051_v21 = vld [vmem:[%s12157_s7 + $0x40] sm:$0xff]  }
 0xc6e   :  { %7505 = vmatprep.mubr.bf16.mxu1 %v4742_v0  ;;  %v8246_v0 = vld [vmem:[%s12155_s2 + $0x8] sm:$0xff]  }
 0xc6f   :  { %7506 = vmatmul.mubr.bf16.gmra.mxu1 %v4743_v49  ;;  %v8247_v49 = vld [vmem:[%s12155_s2 + $0x10] sm:$0xff]  }
 0xd27   :  { %v7503_v42 = vpop.f32.mrf.mxu1 }
 0xd28   :  { %v4966_v62 = vadd.f32 %v7503_v42, %v4812_v17  ;;  %v8257_v42 = vld [vmem:[%s12155_s2 + $0x60] sm:$0xff]  }
 0xd29   :  { %v4933_v31 = vpop.f32.mrf.mxu1 }
 0xd2a   :  { %v4964_v59 = vadd.f32 %v4933_v31, %v4804_v26  ;;  %v11387_v27 = vadd.f32 %v4966_v62, %v12333_v1  ;;  %v8260_v31 = vld [vmem:[%s12155_s2 + $0x78] sm:$0xff]   ;;  %v8265_v1 = vld [vmem:[%s12156_s1 + $0x28] sm:$0xff]  }
 0xd2b   :  { %v7504_v20 = vpop.f32.mrf.mxu1 }
 0xd2c   :  { %v4967_v41 = vadd.f32 %v7504_v20, %v4815_v15  ;;  %v11381_v63 = vadd.f32 %v4964_v59, %v12329_v50  ;;  %12334 = vst [vmem:[#allocation4_spill] sm:$0xff] %v11387_v27  ;;  %v8262_v50 = vld [vmem:[%s12156_s1 + $0x10] sm:$0xff]  }
 0xd2d   :  { %v4936_v13 = vpop.f32.mrf.mxu1 }
 0xd2e   :  { %v4965_v40 = vadd.f32 %v4936_v13, %v4807_v24  ;;  %v11378_v37 = vadd.f32 %v4967_v41, %v12327_v12  ;;  %12330 = vst [vmem:[#allocation3_spill] sm:$0xff] %v11381_v63 }
 0xd2f   :  { %v7507_v14 = vpop.f32.mrf.mxu1 }
 0xd30   :  { %12328 = vst [vmem:[#allocation14_spill] sm:$0xff] %v11378_v37  ;;  %v11384_v3 = vadd.f32 %v4965_v40, %v12331_v52  ;;  %v11395_v18 = vpack.c.bf16 %v11378_v37, %v11387_v27  ;;  %v4970_v16 = vadd.f32 %v7507_v14, %v4828_v43  ;;  %v8261_v14 = vld [vmem:[%s12156_s1 + $0x8] sm:$0xff]   ;;  %v8263_v52 = vld [vmem:[%s12156_s1 + $0x18] sm:$0xff]   ;;  %v8270_v43 = vld [vmem:[%s12156_s1 + $0x50] sm:$0xff]  }
 0xd31   :  { %v4949_v56 = vpop.f32.mrf.mxu1 }
 0xd32   :  { %12332 = vst [vmem:[#allocation8_spill] sm:$0xff] %v11384_v3  ;;  %v11391_v22 = vpack.c.bf16 %v11384_v3, %v11381_v63  ;;  %v4968_v11 = vadd.f32 %v4949_v56, %v4820_v38  ;;  %v11421_v39 = vadd.f32 %v4970_v16, %v12341_v33  ;;  %v8266_v56 = vld [vmem:[%s12156_s1 + $0x30] sm:$0xff]   ;;  %v8267_v38 = vld [vmem:[%s12156_s1 + $0x38] sm:$0xff]  }
 0xd33   :  { %v7508_v25 = vpop.f32.mrf.mxu1 }
 0xd34   :  { %v4971_v47 = vadd.f32 %v7508_v25, %v4831_v6  ;;  %7513 = vmatprep.mubr.msk.bf16.mxu0 %vm128_vm0, %v11391_v22  ;;  %7525 = vmatprep.mubr.msk.bf16.mxu1 %vm128_vm0, %v11391_v22  ;;  %v11415_v51 = vadd.f32 %v4968_v11, %v12337_v55  ;;  %12342 = vst [vmem:[#allocation5_spill] sm:$0xff] %v11421_v39  ;;  %v8268_v6 = vld [vmem:[%s12156_s1 + $0x40] sm:$0xff]   ;;  %v8275_v11 = vld [vmem:[%s12156_s1 + $0x78] sm:$0xff]  }
 0xd35   :  { %v4952_v9 = vpop.f32.mrf.mxu1  ;;  %7514 = vmatmul.mubr.msk.bf16.vlgmr.msra.gmra.mxu0 %vm128_vm0, %v11395_v18  ;;  %7526 = vmatmul.mubr.msk.bf16.vlgmr.msra.gmra.mxu1 %vm128_vm0, %v11395_v18  ;;  %v8272_v25 = vld [vmem:[%s12156_s1 + $0x60] sm:$0xff]  }
 0xd36   :  { %v4969_v61 = vadd.f32 %v4952_v9, %v4823_v54  ;;  %7534 = vmatpush3.bf16.msra.mxu0 %v8048_v60  ;;  %v11409_v4 = vadd.f32 %v4971_v47, %v12335_v19  ;;  %12338 = vst [vmem:[#allocation9_spill] sm:$0xff] %v11415_v51  ;;  %v8251_v60 = vld [vmem:[%s12155_s2 + $0x30] sm:$0xff]  }
 0xd37   :  { %7535 = vmatprep.subr.bf16.mxu0 %v8049_v5  ;;  %v8274_v54 = vld [vmem:[%s12156_s1 + $0x70] sm:$0xff]  }
 0xd38   :  { %12336 = vst [vmem:[#allocation2_spill] sm:$0xff] %v11409_v4  ;;  %v11418_v57 = vadd.f32 %v4969_v61, %v12339_v32  ;;  %v4983_v45 = vpack.c.bf16 %v11409_v4, %v11421_v39 }
 0xd3a   :  { %12340 = vst [vmem:[#allocation7_spill] sm:$0xff] %v11418_v57  ;;  %v4982_v53 = vpack.c.bf16 %v11418_v57, %v11415_v51  ;;  %7536 = vmatpush3.bf16.msra.mxu0 %v8049_v5  ;;  %v8273_v5 = vld [vmem:[%s12156_s1 + $0x68] sm:$0xff]  }
 0xd3b   :  { %7609 = vmatprep.subr.bf16.mxu0 %v8050_v28 }
 0xd3c   :  { %7517 = vmatprep.mubr.msk.bf16.mxu0 %vm128_vm0, %v4982_v53  ;;  %7529 = vmatprep.mubr.msk.bf16.mxu1 %vm128_vm0, %v4982_v53 }
 0xd3d   :  { %7518 = vmatmul.mubr.msk.bf16.gmra.mxu0 %vm128_vm0, %v4983_v45  ;;  %7530 = vmatmul.mubr.msk.bf16.gmra.mxu1 %vm128_vm0, %v4983_v45 }
 0xd3e   :  { %7537 = vmatprep.mubr.msk.bf16.mxu0 %vm128_vm0, %v8244_v48  ;;  %7577 = vmatprep.mubr.msk.bf16.mxu1 %vm683_vm1, %v8245_v29 }
 0xd45   :  { %7538 = vmatmul.mubr.msk.bf16.vlgmr.msra.gmra.mxu0 %vm128_vm0, %v8246_v0 }
 0xd46   :  { %7541 = vmatprep.mubr.msk.bf16.mxu0 %vm128_vm0, %v8247_v49  ;;  %7610 = vmatpush3.bf16.msra.mxu0 %v8050_v28  ;;  %v8052_v49 = vld [vmem:[%s12158_s8 + $0x138] sm:$0xff]  }
 0xd47   :  { %7611 = vmatprep.subr.bf16.mxu0 %v8051_v21 }
 0xd4a   :  { %7612 = vmatpush3.bf16.msra.mxu0 %v8051_v21 }
 0xd4d   :  { %7542 = vmatmul.mubr.msk.bf16.gmra.mxu0 %vm128_vm0, %v8248_v2  ;;  %v8053_v2 = vld [vmem:[%s12158_s8 + $0x130] sm:$0xff]  }
 0xd4e   :  { %7545 = vmatprep.mubr.msk.bf16.mxu0 %vm128_vm0, %v8249_v8 }
 0xd55   :  { %7546 = vmatmul.mubr.msk.bf16.gmra.mxu0 %vm128_vm0, %v8250_v44 }
 0xd56   :  { %7549 = vmatprep.mubr.msk.bf16.mxu0 %vm128_vm0, %v8251_v60  ;;  %v8054_v60 = vld [vmem:[%s12158_s8 + $0x128] sm:$0xff]  }
 0xd5d   :  { %7550 = vmatmul.mubr.msk.bf16.gmra.mxu0 %vm128_vm0, %v8252_v23 }
 0xd5e   :  { %7553 = vmatprep.mubr.msk.bf16.mxu0 %vm128_vm0, %v8253_v10 }
 0xd65   :  { %7554 = vmatmul.mubr.msk.bf16.gmra.mxu0 %vm128_vm0, %v8254_v36  ;;  %v8055_v36 = vld [vmem:[%s12158_s8 + $0x120] sm:$0xff]  }
 0xd66   :  { %7557 = vmatprep.mubr.msk.bf16.mxu0 %vm128_vm0, %v8255_v30 }
 0xd6d   :  { %7558 = vmatmul.mubr.msk.bf16.gmra.mxu0 %vm128_vm0, %v8256_v35 }
 0xd6e   :  { %7561 = vmatprep.mubr.msk.bf16.mxu0 %vm128_vm0, %v8257_v42 }
 0xd75   :  { %7562 = vmatmul.mubr.msk.bf16.gmra.mxu0 %vm128_vm0, %v8258_v58 }
 0xd76   :  { %7565 = vmatprep.mubr.msk.bf16.mxu0 %vm128_vm0, %v8259_v7 }
 0xd7d   :  { %7566 = vmatmul.mubr.msk.bf16.gmra.mxu0 %vm128_vm0, %v8260_v31 }
 0xd7e   :  { %7613 = vmatprep.mubr.msk.bf16.mxu0 %vm128_vm0, %v11391_v22  ;;  %v8269_v22 = vld [vmem:[%s12156_s1 + $0x48] sm:$0xff]  }
 0xd85   :  { %7614 = vmatmul.mubr.msk.bf16.vlgmr.msra.gmra.mxu0 %vm128_vm0, %v11395_v18  ;;  %v8271_v18 = vld [vmem:[%s12156_s1 + $0x58] sm:$0xff]  }
 0xd86   :  { %7617 = vmatprep.mubr.msk.bf16.mxu0 %vm128_vm0, %v4982_v53 }
 0xd8d   :  { %7618 = vmatmul.mubr.msk.bf16.gmra.mxu0 %vm128_vm0, %v4983_v45 }
 0xdf5   :  { %v7515_v26 = vpop.f32.mrf.mxu0  ;;  %v7527_v32 = vpop.f32.mrf.mxu1 }
 0xdf7   :  { %v5047_v15 = vpop.f32.mrf.mxu0  ;;  %v5137_v53 = vpop.f32.mrf.mxu1 }
 0xdf9   :  { %v7516_v17 = vpop.f32.mrf.mxu0  ;;  %v7528_v48 = vpop.f32.mrf.mxu1 }
 0xdfa   :  { %v5169_v40 = vpack.c.bf16 %v7516_v17, %v7515_v26 }
 0xdfb   :  { %v5050_v20 = vpop.f32.mrf.mxu0  ;;  %v5140_v21 = vpop.f32.mrf.mxu1 }
 0xdfc   :  { %v5168_v12 = vpack.c.bf16 %v5050_v20, %v5047_v15 }
 0xdfd   :  { %v7519_v24 = vpop.f32.mrf.mxu0  ;;  %v7531_v8 = vpop.f32.mrf.mxu1 }
 0xdff   :  { %v5063_v59 = vpop.f32.mrf.mxu0  ;;  %v5153_v23 = vpop.f32.mrf.mxu1 }
 0xe01   :  { %v7520_v41 = vpop.f32.mrf.mxu0  ;;  %v7532_v30 = vpop.f32.mrf.mxu1 }
 0xe02   :  { %v5171_v46 = vpack.c.bf16 %v7520_v41, %v7519_v24 }
 0xe03   :  { %v5066_v62 = vpop.f32.mrf.mxu0  ;;  %v5156_v42 = vpop.f32.mrf.mxu1 }
 0xe04   :  { %v5170_v13 = vpack.c.bf16 %v5066_v62, %v5063_v59  ;;  %7569 = vmatprep.subr.bf16.mxu1 %v5171_v46 }
 0xe05   :  { %7570 = vmatpush3.bf16.msra.mxu1 %v5171_v46  ;;  %v7539_v47 = vpop.f32.mrf.mxu0 }
 0xe06   :  { %7571 = vmatprep.subr.bf16.mxu1 %v5170_v13 }
 0xe07   :  { %v5223_v16 = vpop.f32.mrf.mxu0 }
 0xe09   :  { %7572 = vmatpush3.bf16.msra.mxu1 %v5170_v13  ;;  %v7540_v9 = vpop.f32.mrf.mxu0 }
 0xe0a   :  { %7573 = vmatprep.subr.bf16.mxu1 %v5169_v40 }
 0xe0b   :  { %v5226_v61 = vpop.f32.mrf.mxu0 }
 0xe0d   :  { %7574 = vmatpush3.bf16.msra.mxu1 %v5169_v40  ;;  %v7543_v19 = vpop.f32.mrf.mxu0  ;;  %v6544_v40 = vld [vmem:[%s12159_s6 + $0x4] ss:$0 sm:$0xff] }
 0xe0e   :  { %7575 = vmatprep.subr.bf16.mxu1 %v5168_v12 }
 0xe0f   :  { %v5239_v28 = vpop.f32.mrf.mxu0 }
 0xe11   :  { %7576 = vmatpush3.bf16.msra.mxu1 %v5168_v12  ;;  %v7544_v55 = vpop.f32.mrf.mxu0 }
 0xe12   :  { %7621 = vmatprep.subr.bf16.mxu1 %v8052_v49 }
 0xe13   :  { %v5242_v33 = vpop.f32.mrf.mxu0 }
 0xe14   :  { %7578 = vmatmul.mubr.msk.bf16.vlgmr.msra.gmra.mxu1 %vm683_vm1, %v8261_v14 }
 0xe15   :  { %7581 = vmatprep.mubr.msk.bf16.mxu1 %vm683_vm1, %v8262_v50  ;;  %v7547_v45 = vpop.f32.mrf.mxu0  ;;  %7622 = vmatpush3.bf16.msra.mxu1 %v8052_v49  ;;  %v11609_v49 = vadd.f32 %v7531_v8, %v6544_v40 }
 0xe16   :  { %7623 = vmatprep.subr.bf16.mxu1 %v8053_v2 }
 0xe17   :  { %v5255_v29 = vpop.f32.mrf.mxu0  ;;  %12343 = vst [vmem:[#allocation10_spill] sm:$0xff] %v11609_v49 }
 0xe19   :  { %v7548_v0 = vpop.f32.mrf.mxu0  ;;  %7624 = vmatpush3.bf16.msra.mxu1 %v8053_v2 }
 0xe1a   :  { %7625 = vmatprep.subr.bf16.mxu1 %v8054_v60 }
 0xe1b   :  { %v11574_v44 = vpop.f32.mrf.mxu0 }
 0xe1c   :  { %7582 = vmatmul.mubr.msk.bf16.gmra.mxu1 %vm683_vm1, %v8263_v52  ;;  %v11601_v52 = vadd.f32 %v7527_v32, %v6544_v40 }
 0xe1d   :  { %7585 = vmatprep.mubr.msk.bf16.mxu1 %vm683_vm1, %v8264_v34  ;;  %v11579_v10 = vpop.f32.mrf.mxu0  ;;  %7626 = vmatpush3.bf16.msra.mxu1 %v8054_v60 }
 0xe1e   :  { %7627 = vmatprep.subr.bf16.mxu1 %v8055_v36 }
 0xe1f   :  { %v11584_v35 = vpop.f32.mrf.mxu0 }
 0xe21   :  { %7628 = vmatpush3.bf16.msra.mxu1 %v8055_v36  ;;  %v11586_v58 = vpop.f32.mrf.mxu0 }
 0xe23   :  { %v11588_v31 = vpop.f32.mrf.mxu0 }
 0xe24   :  { %7586 = vmatmul.mubr.msk.bf16.gmra.mxu1 %vm683_vm1, %v8265_v1 }
 0xe25   :  { %7589 = vmatprep.mubr.msk.bf16.mxu1 %vm683_vm1, %v8266_v56  ;;  %v11590_v17 = vpop.f32.mrf.mxu0  ;;  %v11603_v56 = vadd.f32 %v6544_v40, %v5137_v53  ;;  %v11613_v53 = vadd.f32 %v6544_v40, %v5153_v23 }
 0xe27   :  { %v11592_v59 = vpop.f32.mrf.mxu0 }
 0xe29   :  { %v11594_v62 = vpop.f32.mrf.mxu0 }
 0xe2b   :  { %v11599_v14 = vpop.f32.mrf.mxu0 }
 0xe2c   :  { %7590 = vmatmul.mubr.msk.bf16.gmra.mxu1 %vm683_vm1, %v8267_v38  ;;  %v11605_v38 = vadd.f32 %v7528_v48, %v6544_v40  ;;  %v11615_v48 = vadd.f32 %v7532_v30, %v6544_v40 }
 0xe2d   :  { %7593 = vmatprep.mubr.msk.bf16.mxu1 %vm683_vm1, %v8268_v6  ;;  %v11611_v2 = vpop.f32.mrf.mxu0 }
 0xe2f   :  { %v11643_v23 = vpop.f32.mrf.mxu0 }
 0xe34   :  { %7594 = vmatmul.mubr.msk.bf16.gmra.mxu1 %vm683_vm1, %v8269_v22 }
 0xe35   :  { %7597 = vmatprep.mubr.msk.bf16.mxu1 %vm683_vm1, %v8270_v43 }
 0xe3c   :  { %7598 = vmatmul.mubr.msk.bf16.gmra.mxu1 %vm683_vm1, %v8271_v18 }
 0xe3d   :  { %7601 = vmatprep.mubr.msk.bf16.mxu1 %vm683_vm1, %v8272_v25 }
 0xe44   :  { %7602 = vmatmul.mubr.msk.bf16.gmra.mxu1 %vm683_vm1, %v8273_v5 }
 0xe45   :  { %7605 = vmatprep.mubr.msk.bf16.mxu1 %vm683_vm1, %v8274_v54 }
 0xe4c   :  { %7606 = vmatmul.mubr.msk.bf16.gmra.mxu1 %vm683_vm1, %v8275_v11  ;;  %v11607_v11 = vadd.f32 %v6544_v40, %v5140_v21 }
 0xed4   :  { %v7579_v7 = vpop.f32.mrf.mxu1 }
 0xed5   :  { %v5393_v34 = vadd.f32 %v7579_v7, %v7539_v47 }
 0xed6   :  { %v5384_v26 = vpop.f32.mrf.mxu1 }
 0xed7   :  { %v5385_v1 = vadd.f32 %v5384_v26, %v5223_v16 }
 0xed8   :  { %v7580_v15 = vpop.f32.mrf.mxu1 }
 0xed9   :  { %v5396_v6 = vadd.f32 %v7580_v15, %v7540_v9  ;;  %v11618_v9 = vadd.f32 %v5393_v34, %v11601_v52 }
 0xeda   :  { %v5387_v20 = vpop.f32.mrf.mxu1 }
 0xedb   :  { %v5388_v18 = vadd.f32 %v5387_v20, %v5226_v61  ;;  %v11621_v61 = vadd.f32 %v5385_v1, %v11603_v56  ;;  %v5521_v7 = vmul.f32 %v11618_v9, %v11618_v9 }
 0xedc   :  { %v7583_v24 = vpop.f32.mrf.mxu1 }
 0xedd   :  { %v5409_v25 = vadd.f32 %v7583_v24, %v7543_v19  ;;  %v11623_v19 = vadd.f32 %v6544_v40, %v5156_v42  ;;  %v5519_v26 = vmul.f32 %v11621_v61, %v11621_v61 }
 0xede   :  { %v5400_v41 = vpop.f32.mrf.mxu1 }
 0xedf   :  { %v5401_v5 = vadd.f32 %v5400_v41, %v5239_v28  ;;  %v11626_v28 = vadd.f32 %v5396_v6, %v11605_v38  ;;  %v11635_v21 = vadd.f32 %v5409_v25, %v11609_v49 }
 0xee0   :  { %v7584_v46 = vpop.f32.mrf.mxu1 }
 0xee1   :  { %v5412_v54 = vadd.f32 %v7584_v46, %v7544_v55  ;;  %12344 = vst [vmem:[#allocation11_spill] sm:$0xff] %v11635_v21  ;;  %v11638_v8 = vadd.f32 %v5401_v5, %v11613_v53  ;;  %v5522_v20 = vmul.f32 %v11626_v28, %v11626_v28  ;;  %v5525_v40 = vmul.f32 %v11635_v21, %v11635_v21 }
 0xee2   :  { %v5403_v13 = vpop.f32.mrf.mxu1 }
 0xee3   :  { %v5404_v32 = vadd.f32 %v5403_v13, %v5242_v33  ;;  %12345 = vst [vmem:[#allocation6_spill] sm:$0xff] %v11638_v8  ;;  %v11641_v60 = vadd.f32 %v5412_v54, %v11615_v48 }
 0xee4   :  { %v7587_v12 = vpop.f32.mrf.mxu1 }
 0xee5   :  { %v5425_v22 = vadd.f32 %v7587_v12, %v7547_v45  ;;  %v11646_v36 = vadd.f32 %v5404_v32, %v11623_v19  ;;  %v5526_v12 = vmul.f32 %v11641_v60, %v11641_v60 }
 0xee6   :  { %v5416_v50 = vpop.f32.mrf.mxu1 }
 0xee7   :  { %v5417_v47 = vadd.f32 %v5416_v50, %v5255_v29  ;;  %v11629_v55 = vadd.f32 %v5425_v22, %v11601_v52  ;;  %v11632_v29 = vadd.f32 %v5388_v18, %v11607_v11  ;;  %v11673_v50 = vpop.f32.mrf.mxu0  ;;  %v11677_v34 = vmul.f32 %v11646_v36, %v11646_v36 }
 0xee8   :  { %v7588_v43 = vpop.f32.mrf.mxu1 }
 0xee9   :  { %v5428_v33 = vadd.f32 %v7588_v43, %v7548_v0  ;;  %v11649_v0 = vadd.f32 %v5417_v47, %v11603_v56  ;;  %v5561_v24 = vmul.f32 %v11629_v55, %v11629_v55  ;;  %v5520_v13 = vmul.f32 %v11632_v29, %v11632_v29 }
 0xeea   :  { %v5419_v16 = vpop.f32.mrf.mxu1  ;;  %v5537_v43 = vadd.f32 %v11629_v55, %v11618_v9  ;;  %v5545_v25 = vmax.f32 %v11618_v9, %v11629_v55  ;;  %v5553_v5 = vmin.f32 %v11618_v9, %v11629_v55  ;;  %v11707_v55 = vpop.f32.mrf.mxu0 }
 0xeeb   :  { %v5420_v30 = vadd.f32 %v5419_v16, %v11574_v44  ;;  %v11662_v41 = vadd.f32 %v5428_v33, %v11605_v38  ;;  %v5569_v54 = vadd.f32 %v5561_v24, %v5521_v7  ;;  %v5535_v33 = vadd.f32 %v11649_v0, %v11621_v61 }
 0xeec   :  { %v7591_v45 = vpop.f32.mrf.mxu1 }
 0xeed   :  { %v5441_v15 = vadd.f32 %v7591_v45, %v11579_v10  ;;  %v5523_v10 = vmul.f32 %v11638_v8, %v11638_v8  ;;  %v11682_v1 = vadd.f32 %v5420_v30, %v11607_v11  ;;  %v5562_v32 = vmul.f32 %v11662_v41, %v11662_v41 }
 0xeee   :  { %v5432_v42 = vpop.f32.mrf.mxu1  ;;  %v5538_v7 = vadd.f32 %v11662_v41, %v11626_v28 }
 0xeef   :  { %v5433_v44 = vadd.f32 %v5432_v42, %v11584_v35  ;;  %v5559_v35 = vmul.f32 %v11649_v0, %v11649_v0  ;;  %v11688_v18 = vadd.f32 %v5441_v15, %v11609_v49 }
 0xef0   :  { %v7592_v46 = vpop.f32.mrf.mxu1 }
 0xef1   :  { %v5444_v6 = vadd.f32 %v7592_v46, %v11586_v58  ;;  %12346 = vst [vmem:[#allocation13_spill] sm:$0xff] %v11688_v18  ;;  %v11697_v47 = vadd.f32 %v5433_v44, %v11613_v53  ;;  %v5567_v42 = vadd.f32 %v5559_v35, %v5519_v26  ;;  %v5546_v46 = vmax.f32 %v11626_v28, %v11662_v41 }
 0xef2   :  { %v5435_v22 = vpop.f32.mrf.mxu1  ;;  %v5554_v26 = vmin.f32 %v11626_v28, %v11662_v41  ;;  %v5570_v35 = vadd.f32 %v5562_v32, %v5522_v20  ;;  %v5552_v28 = vmin.f32 %v11632_v29, %v11682_v1  ;;  %v7563_v20 = vpop.f32.mrf.mxu0  ;;  %v5541_v32 = vadd.f32 %v11688_v18, %v11635_v21 }
 0xef3   :  { %12347 = vst [vmem:[#allocation12_spill] sm:$0xff] %v11697_v47  ;;  %v5436_v58 = vadd.f32 %v5435_v22, %v11588_v31  ;;  %v5560_v31 = vmul.f32 %v11682_v1, %v11682_v1  ;;  %v11714_v15 = vadd.f32 %v5444_v6, %v11615_v48  ;;  %v5536_v22 = vadd.f32 %v11682_v1, %v11632_v29 }
 0xef4   :  { %v7595_v16 = vpop.f32.mrf.mxu1  ;;  %v5563_v6 = vmul.f32 %v11697_v47, %v11697_v47  ;;  %v5319_v37 = vpop.f32.mrf.mxu0 }
 0xef5   :  { %v5457_v45 = vadd.f32 %v7595_v16, %v11590_v17  ;;  %v5565_v17 = vmul.f32 %v11688_v18, %v11688_v18  ;;  %v11728_v16 = vadd.f32 %v5436_v58, %v11623_v19  ;;  %v5568_v41 = vadd.f32 %v5560_v31, %v5520_v13 }
 0xef6   :  { %v5448_v24 = vpop.f32.mrf.mxu1  ;;  %v5566_v58 = vmul.f32 %v11714_v15, %v11714_v15  ;;  %v5571_v13 = vadd.f32 %v5563_v6, %v5523_v10 }
 0xef7   :  { %v5449_v44 = vadd.f32 %v5448_v24, %v11592_v59  ;;  %v5577_v30 = vadd.f32 %v5457_v45, %v11601_v52  ;;  %v5544_v24 = vmax.f32 %v11632_v29, %v11682_v1  ;;  %v5573_v45 = vadd.f32 %v5565_v17, %v5525_v40 }
 0xef8   :  { %v7596_v9 = vpop.f32.mrf.mxu1  ;;  %v5547_v29 = vmax.f32 %v11638_v8, %v11697_v47  ;;  %v5564_v1 = vmul.f32 %v11728_v16, %v11728_v16  ;;  %v5542_v40 = vadd.f32 %v11714_v15, %v11641_v60  ;;  %v5574_v63 = vadd.f32 %v5566_v58, %v5526_v12 }
 0xef9   :  { %v5460_v59 = vadd.f32 %v7596_v9, %v11594_v62  ;;  %v5575_v57 = vadd.f32 %v5449_v44, %v11603_v56  ;;  %v5539_v62 = vadd.f32 %v11697_v47, %v11638_v8  ;;  %v5549_v9 = vmax.f32 %v11635_v21, %v11688_v18  ;;  %v7564_v18 = vpop.f32.mrf.mxu0 }
 0xefa   :  { %v5451_v4 = vpop.f32.mrf.mxu1  ;;  %v5609_v17 = vmul.f32 %v5577_v30, %v5577_v30  ;;  %v5540_v10 = vadd.f32 %v11728_v16, %v11646_v36  ;;  %v11766_v58 = vmax.f32 %v5545_v25, %v5577_v30  ;;  %v11768_v47 = vmin.f32 %v5553_v5, %v5577_v30 }
 0xefb   :  { %v5578_v31 = vadd.f32 %v5460_v59, %v11605_v38  ;;  %v5452_v51 = vadd.f32 %v5451_v4, %v11599_v14  ;;  %v5607_v6 = vmul.f32 %v5575_v57, %v5575_v57  ;;  %v5585_v4 = vadd.f32 %v5577_v30, %v5537_v43 }
 0xefc   :  { %v7599_v44 = vpop.f32.mrf.mxu1  ;;  %v5617_v21 = vadd.f32 %v5609_v17, %v5569_v54  ;;  %v12349_v25 = vmin.f32 %v11621_v61, %v11649_v0 }
 0xefd   :  { %v5473_v39 = vadd.f32 %v7599_v44, %v11611_v2  ;;  %v5576_v59 = vadd.f32 %v5452_v51, %v11607_v11  ;;  %v5548_v2 = vmax.f32 %v11646_v36, %v11728_v16  ;;  %v5572_v44 = vadd.f32 %v5564_v1, %v11677_v34 }
 0xefe   :  { %v5464_v27 = vpop.f32.mrf.mxu1  ;;  %v5610_v3 = vmul.f32 %v5578_v31, %v5578_v31  ;;  %v5583_v51 = vadd.f32 %v5575_v57, %v5535_v33  ;;  %v12348_v34 = vmax.f32 %v11621_v61, %v11649_v0  ;;  %v11782_v5 = vmin.f32 %v12349_v25, %v5575_v57 }
 0xeff   :  { %v11760_v14 = vadd.f32 %v5473_v39, %v11609_v49  ;;  %v5465_v8 = vadd.f32 %v5464_v27, %v11643_v23  ;;  %v5615_v27 = vadd.f32 %v5607_v6, %v5567_v42  ;;  %v5608_v23 = vmul.f32 %v5576_v59, %v5576_v59 }
 0xf00   :  { %v7600_v12 = vpop.f32.mrf.mxu1  ;;  %v11777_v1 = vmax.f32 %v12348_v34, %v5575_v57  ;;  %v5586_v54 = vadd.f32 %v5578_v31, %v5538_v7  ;;  %v11789_v33 = vmax.f32 %v5546_v46, %v5578_v31  ;;  %v5618_v30 = vadd.f32 %v5610_v3, %v5570_v35  ;;  %v5322_v34 = vpop.f32.mrf.mxu0 }
 0xf01   :  { %v11771_v43 = vadd.f32 %v5465_v8, %v11613_v53  ;;  %v5476_v39 = vadd.f32 %v7600_v12, %v11673_v50  ;;  %v5613_v8 = vmul.f32 %v11760_v14, %v11760_v14  ;;  %v11794_v12 = vmin.f32 %v5554_v26, %v5578_v31 }
 0xf02   :  { %v5467_v49 = vpop.f32.mrf.mxu1  ;;  %v5584_v57 = vadd.f32 %v5576_v59, %v5536_v22  ;;  %v11796_v0 = vmax.f32 %v5544_v24, %v5576_v59  ;;  %v11798_v7 = vmin.f32 %v5552_v28, %v5576_v59  ;;  %v5589_v46 = vadd.f32 %v11760_v14, %v5541_v32  ;;  %v7567_v59 = vpop.f32.mrf.mxu0 }
 0xf03   :  { %v11787_v50 = vadd.f32 %v5476_v39, %v11615_v48  ;;  %v5611_v42 = vmul.f32 %v11771_v43, %v11771_v43  ;;  %v5468_v17 = vadd.f32 %v5467_v49, %v11707_v55  ;;  %v5616_v39 = vadd.f32 %v5608_v23, %v5568_v41 }
 0xf04   :  { %v7603_v6 = vpop.f32.mrf.mxu1  ;;  %v11806_v55 = vadd.f32 %v5613_v8, %v5573_v45  ;;  %v11812_v24 = vmax.f32 %v5549_v9, %v11760_v14  ;;  %v5587_v28 = vadd.f32 %v11771_v43, %v5539_v62  ;;  %v11820_v31 = vmax.f32 %v5547_v29, %v11771_v43 }
 0xf05   :  { %v5489_v61 = vadd.f32 %v7603_v6, %v7563_v20  ;;  %v5614_v3 = vmul.f32 %v11787_v50, %v11787_v50  ;;  %v11804_v35 = vadd.f32 %v5468_v17, %v11623_v19  ;;  %v11815_v20 = vadd.f32 %v5611_v42, %v5571_v13 }
 0xf06   :  { %v5480_v49 = vpop.f32.mrf.mxu1  ;;  %v11829_v62 = vadd.f32 %v11787_v50, %v5542_v40 }
 0xf07   :  { %v11809_v26 = vadd.f32 %v5489_v61, %v11601_v52  ;;  %v5481_v22 = vadd.f32 %v5480_v49, %v5319_v37  ;;  %v5612_v41 = vmul.f32 %v11804_v35, %v11804_v35  ;;  %v11831_v13 = vadd.f32 %v5614_v3, %v5574_v63 }
 0xf08   :  { %v7604_v32 = vpop.f32.mrf.mxu1  ;;  %v11834_v23 = vadd.f32 %v11804_v35, %v5540_v10  ;;  %v11853_v6 = vmax.f32 %v5548_v2, %v11804_v35 }
 0xf09   :  { %v5633_v45 = vadd.f32 %v11809_v26, %v5585_v4  ;;  %v5657_v52 = vmul.f32 %v11809_v26, %v11809_v26  ;;  %v11826_v37 = vadd.f32 %v5481_v22, %v11603_v56  ;;  %v5492_v9 = vadd.f32 %v7604_v32, %v7564_v18 }
 0xf0a   :  { %v5483_v29 = vpop.f32.mrf.mxu1  ;;  %v12350_v4 = vmax.f32 %v11641_v60, %v11714_v15  ;;  %v11847_v63 = vadd.f32 %v5612_v41, %v5572_v44 }
 0xf0b   :  { %v5665_v8 = vadd.f32 %v5657_v52, %v5617_v21  ;;  %v11842_v56 = vmul.f32 0.25, %v5633_v45  ;;  %v5631_v18 = vadd.f32 %v11826_v37, %v5583_v51  ;;  %v5655_v40 = vmul.f32 %v11826_v37, %v11826_v37  ;;  %v5335_v51 = vpop.f32.mrf.mxu0 }
 0xf0c   :  { %v11840_v25 = vmax.f32 %v12350_v4, %v11787_v50  ;;  %v11850_v10 = vadd.f32 %v5492_v9, %v11605_v38  ;;  %v5484_v42 = vadd.f32 %v5483_v29, %v5322_v34  ;;  %v7607_v17 = vpop.f32.mrf.mxu1 }
 0xf0d   :  { %v5681_v61 = vmul.f32 0.25, %v5665_v8  ;;  %v5689_v21 = vmul.f32 %v11842_v56, %v11842_v56  ;;  %v5663_v3 = vadd.f32 %v5655_v40, %v5615_v27  ;;  %v11857_v49 = vmul.f32 0.25, %v5631_v18  ;;  %v12351_v8 = vld [vmem:[#allocation10_spill] sm:$0xff] }
 0xf0e   :  { %v5634_v22 = vadd.f32 %v11850_v10, %v5586_v54  ;;  %v5658_v44 = vmul.f32 %v11850_v10, %v11850_v10  ;;  %v11863_v38 = vadd.f32 %v5484_v42, %v11607_v11  ;;  %v5505_v34 = vadd.f32 %v7607_v17, %v7567_v59  ;;  %v5496_v41 = vpop.f32.mrf.mxu1 }
 0xf0f   :  { %v5697_v2 = vsub.f32 %v5681_v61, %v5689_v21  ;;  %v5679_v32 = vmul.f32 0.25, %v5663_v3  ;;  %v5687_v45 = vmul.f32 %v11857_v49, %v11857_v49  ;;  %v5497_v52 = vadd.f32 %v5496_v41, %v5335_v51  ;;  %v7568_v51 = vpop.f32.mrf.mxu0 }
 0xf10   :  { %v5666_v27 = vadd.f32 %v5658_v44, %v5618_v30  ;;  %v11867_v9 = vmul.f32 0.25, %v5634_v22  ;;  %v5632_v29 = vadd.f32 %v11863_v38, %v5584_v57  ;;  %v5656_v54 = vmul.f32 %v11863_v38, %v11863_v38  ;;  %v7608_v57 = vpop.f32.mrf.mxu1 }
 0xf11   :  { %v5695_v4 = vsub.f32 %v5679_v32, %v5687_v45  ;;  %v11873_v11 = vadd.f32 %v5505_v34, %v12351_v8  ;;  %v11876_v59 = vadd.f32 %v5497_v52, %v11613_v53  ;;  %v5641_v18 = vmax.f32 %v11766_v58, %v11809_v26 }
 0xf12   :  { %v5682_v40 = vmul.f32 0.25, %v5666_v27  ;;  %v5690_v30 = vmul.f32 %v11867_v9, %v11867_v9  ;;  %v5664_v42 = vadd.f32 %v5656_v54, %v5616_v39  ;;  %v11882_v17 = vmul.f32 0.25, %v5632_v29 }
 0xf13   :  { %v5705_v61 = vmax.f32 %v5697_v2, 0.0  ;;  %v5637_v21 = vadd.f32 %v11873_v11, %v5589_v46  ;;  %v5661_v3 = vmul.f32 %v11873_v11, %v11873_v11  ;;  %v5649_v53 = vmin.f32 %v11768_v47, %v11809_v26  ;;  %v8056_v47 = vld [vmem:[%s12158_s8 + $0x118] sm:$0xff]  }
 0xf14   :  { %v5698_v22 = vsub.f32 %v5682_v40, %v5690_v30  ;;  %v5680_v58 = vmul.f32 0.25, %v5664_v42  ;;  %v5688_v44 = vmul.f32 %v11882_v17, %v11882_v17  ;;  %v5635_v39 = vadd.f32 %v11876_v59, %v5587_v28  ;;  %v5499_v28 = vpop.f32.mrf.mxu1  ;;  %7629 = vmatprep.subr.bf16.mxu1 %v8056_v47 }
 0xf15   :  { %v5669_v34 = vadd.f32 %v5661_v3, %v11806_v55  ;;  %v11893_v41 = vmul.f32 0.25, %v5637_v21  ;;  %v5659_v46 = vmul.f32 %v11876_v59, %v11876_v59  ;;  %v5639_v2 = vmax.f32 %v11777_v1, %v11826_v37  ;;  %v5338_v1 = vpop.f32.mrf.mxu0  ;;  %7630 = vmatpush3.bf16.msra.mxu1 %v8056_v47 }
 0xf16   :  { %v5703_v26 = vmax.f32 %v5695_v4, 0.0  ;;  %v5706_v32 = vmax.f32 %v5698_v22, 0.0  ;;  %v11902_v45 = vmul.f32 0.25, %v5635_v39  ;;  %v5508_v52 = vadd.f32 %v7608_v57, %v7568_v51 }
 0xf17   :  { %v5685_v27 = vmul.f32 0.25, %v5669_v34  ;;  %v5693_v55 = vmul.f32 %v11893_v41, %v11893_v41  ;;  %v5667_v29 = vadd.f32 %v5659_v46, %v11815_v20  ;;  %v5642_v54 = vmax.f32 %v11789_v33, %v11850_v10 }
 0xf18   :  { %v11909_v8 = vadd.f32 1e-05, %v5705_v61  ;;  %v5696_v40 = vsub.f32 %v5680_v58, %v5688_v44  ;;  %v11912_v4 = vadd.f32 %v5508_v52, %v11615_v48  ;;  %v5647_v30 = vmin.f32 %v11782_v5, %v11826_v37 }
 0xf19   :  { %v5701_v42 = vsub.f32 %v5685_v27, %v5693_v55  ;;  %v5691_v57 = vmul.f32 %v11902_v45, %v11902_v45  ;;  %v7888_v20 = vpack.i.bf16 %v5642_v54, %v5641_v18  ;;  %v5500_v21 = vadd.f32 %v5499_v28, %v5338_v1 }
 0xf1a   :  { %v5683_v3 = vmul.f32 0.25, %v5667_v29  ;;  %v5638_v33 = vadd.f32 %v11912_v4, %v11829_v62  ;;  %v5662_v61 = vmul.f32 %v11912_v4, %v11912_v4  ;;  %v5640_v48 = vmax.f32 %v11796_v0, %v11863_v38  ;;  %v8057_v62 = vld [vmem:[%s12158_s8 + $0x110] sm:$0xff]   ;;  %v8058_v0 = vld [vmem:[%s12158_s8 + $0x108] sm:$0xff]  }
 0xf1b   :  { %v11924_v51 = vadd.f32 1e-05, %v5703_v26  ;;  %v11926_v5 = vadd.f32 1e-05, %v5706_v32  ;;  %7889 = vrot.lane.b32.xlu1 %v7888_v20, %s8277_s26  ;;  %v11930_v37 = vadd.f32 %v5500_v21, %v11623_v19  ;;  %v5650_v18 = vmin.f32 %v11794_v12, %v11850_v10  ;;  %7631 = vmatprep.subr.bf16.mxu1 %v8057_v62  ;;  %v12353_v20 = vld [vmem:[#allocation11_spill] sm:$0xff] }
 0xf1c   :  { %v5670_v22 = vadd.f32 %v5662_v61, %v11831_v13  ;;  %v11941_v58 = vmul.f32 0.25, %v5638_v33  ;;  %v7898_v44 = vpack.i.bf16 %v5640_v48, %v5639_v2  ;;  %v5648_v19 = vmin.f32 %v11798_v7, %v11863_v38  ;;  %7632 = vmatpush3.bf16.msra.mxu1 %v8057_v62  ;;  %v12354_v33 = vld [vmem:[#allocation12_spill] sm:$0xff]  ;;  %v12355_v61 = vld [vmem:[#allocation6_spill] sm:$0xff] }
 0xf1d   :  { %v5704_v39 = vmax.f32 %v5696_v40, 0.0  ;;  %v5709_v34 = vmax.f32 %v5701_v42, 0.0  ;;  %v5636_v12 = vadd.f32 %v11930_v37, %v11834_v23  ;;  %v5660_v10 = vmul.f32 %v11930_v37, %v11930_v37  ;;  %7633 = vmatprep.subr.bf16.mxu1 %v8058_v0 }
 0xf1e   :  { %v5699_v46 = vsub.f32 %v5683_v3, %v5691_v57  ;;  %v5686_v47 = vmul.f32 0.25, %v5670_v22  ;;  %v5694_v13 = vmul.f32 %v11941_v58, %v11941_v58  ;;  %7899 = vrot.lane.b32.xlu0 %v7898_v44, %s8277_s26  ;;  %v7893_v2 = vpack.i.bf16 %v5650_v18, %v5649_v53  ;;  %v12352_v57 = vld [vmem:[#allocation13_spill] sm:$0xff] }
 0xf1f   :  { %v5668_v7 = vadd.f32 %v5660_v10, %v11847_v63  ;;  %v11953_v38 = vmul.f32 0.25, %v5636_v12  ;;  %v7903_v26 = vpack.i.bf16 %v5648_v19, %v5647_v30  ;;  %v5645_v23 = vmax.f32 %v11812_v24, %v11873_v11 }
 0xf20   :  { %v5702_v32 = vsub.f32 %v5686_v47, %v5694_v13  ;;  %7894 = vrot.lane.b32.xlu1 %v7893_v2, %s8276_s25  ;;  %v5646_v52 = vmax.f32 %v11840_v25, %v11912_v4  ;;  %v5643_v28 = vmax.f32 %v11820_v31, %v11876_v59  ;;  %v5644_v53 = vmax.f32 %v11853_v6, %v11930_v37 }
 0xf21   :  { %v11964_v63 = vadd.f32 1e-05, %v5704_v39  ;;  %v5684_v27 = vmul.f32 0.25, %v5668_v7  ;;  %v5692_v55 = vmul.f32 %v11953_v38, %v11953_v38  ;;  %8124 = vrsqrt.f32 %v11909_v8  ;;  %7634 = vmatpush3.bf16.msra.mxu1 %v8058_v0  ;;  %v8059_v0 = vld [vmem:[%s12158_s8 + $0x100] sm:$0xff]  }
 0xf22   :  { %v5707_v24 = vmax.f32 %v5699_v46, 0.0  ;;  %v5710_v29 = vmax.f32 %v5702_v32, 0.0  ;;  %7904 = vrot.lane.b32.xlu0 %v7903_v26, %s8276_s25  ;;  %v7908_v54 = vpack.i.bf16 %v5646_v52, %v5645_v23  ;;  %v7913_v25 = vpack.i.bf16 %v5644_v53, %v5643_v28  ;;  %7635 = vmatprep.subr.bf16.mxu1 %v8059_v0 }
 0xf23   :  { %v5700_v1 = vsub.f32 %v5684_v27, %v5692_v55  ;;  %8126 = vrsqrt.f32 %v11926_v5  ;;  %v11971_v31 = vadd.f32 1e-05, %v5709_v34  ;;  %v5557_v21 = vmin.f32 %v12353_v20, %v12352_v57 }
 0xf24   :  { %7909 = vrot.lane.b32.xlu1 %v7908_v54, %s8277_s26  ;;  %8128 = vrsqrt.f32 %v11924_v51  ;;  %v11975_v6 = vadd.f32 1e-05, %v5710_v29  ;;  %v11977_v30 = vadd.f32 1e-05, %v5707_v24  ;;  %v5558_v3 = vmin.f32 %v11641_v60, %v11714_v15 }
 0xf25   :  { %v5708_v40 = vmax.f32 %v5700_v1, 0.0  ;;  %8130 = vrsqrt.f32 %v11964_v63  ;;  %v5555_v48 = vmin.f32 %v12355_v61, %v12354_v33  ;;  %v5556_v18 = vmin.f32 %v11646_v36, %v11728_v16  ;;  %7636 = vmatpush3.bf16.msra.mxu1 %v8059_v0 }
 0xf26   :  { %7914 = vrot.lane.b32.xlu0 %v7913_v25, %s8277_s26  ;;  %8132 = vrsqrt.f32 %v11971_v31  ;;  %v5605_v62 = vmin.f32 %v5557_v21, %v11760_v14  ;;  %vm5735_vm14 = vcmp.eq.f32.partialorder %v11909_v8, inf  ;;  %v5606_v44 = vmin.f32 %v5558_v3, %v11787_v50 }
 0xf27   :  { %v11981_v42 = vadd.f32 1e-05, %v5708_v40  ;;  %8134 = vrsqrt.f32 %v11975_v6  ;;  %v12002_v19 = vmin.f32 %v5555_v48, %v11771_v43  ;;  %v12005_v60 = vmin.f32 %v5556_v18, %v11804_v35 }
 0xf28   :  { %8136 = vrsqrt.f32 %v11977_v30  ;;  %vm5737_vm15 = vcmp.eq.f32.partialorder %v11909_v8, 0.0  ;;  %v5738_v36 = vand.u32 2147483648, %v11909_v8  ;;  %vm5742_vm2 = vcmp.eq.f32.partialorder %v11926_v5, inf }
 0xf29   :  { %8138 = vrsqrt.f32 %v11981_v42  ;;  %vm5744_vm3 = vcmp.eq.f32.partialorder %v11926_v5, 0.0  ;;  %v5745_v14 = vand.u32 2147483648, %v11926_v5  ;;  %vm5721_vm5 = vcmp.eq.f32.partialorder %v11924_v51, inf }
 0xf2a   :  { %vm5723_vm6 = vcmp.eq.f32.partialorder %v11924_v51, 0.0  ;;  %v5724_v39 = vand.u32 2147483648, %v11924_v51  ;;  %v5654_v34 = vmin.f32 %v5606_v44, %v11912_v4  ;;  %vm5728_vm7 = vcmp.eq.f32.partialorder %v11964_v63, inf }
 0xf2b   :  { %vm5730_vm8 = vcmp.eq.f32.partialorder %v11964_v63, 0.0  ;;  %v5731_v10 = vand.u32 2147483648, %v11964_v63  ;;  %v5653_v13 = vmin.f32 %v5605_v62, %v11873_v11  ;;  %v5651_v2 = vmin.f32 %v12002_v19, %v11876_v59 }
 0xf2c   :  { %v5652_v4 = vmin.f32 %v12005_v60, %v11930_v37  ;;  %vm5763_vm9 = vcmp.eq.f32.partialorder %v11971_v31, inf  ;;  %vm5765_vm10 = vcmp.eq.f32.partialorder %v11971_v31, 0.0  ;;  %v5766_v37 = vand.u32 2147483648, %v11971_v31 }
 0xf2d   :  { %v7933_v28 = vpack.i.bf16 %v5654_v34, %v5653_v13  ;;  %vm5770_vm11 = vcmp.eq.f32.partialorder %v11975_v6, inf  ;;  %vm5772_vm12 = vcmp.eq.f32.partialorder %v11975_v6, 0.0  ;;  %v5773_v1 = vand.u32 2147483648, %v11975_v6 }
 0xf2e   :  { %v8125_v22 = vpop.eup %8124  ;;  %vm5749_vm13 = vcmp.eq.f32.partialorder %v11977_v30, inf  ;;  %v5759_v3 = vand.u32 2147483648, %v11981_v42  ;;  %v7928_v48 = vpack.i.bf16 %v5652_v4, %v5651_v2 }
 0xf2f   :  { %v5734_v15 = vmul.f32 %v8125_v22, %v11909_v8 }
 0xf30   :  { %v8127_v16 = vpop.eup %8126 }
 0xf31   :  { %v8129_v43 = vpop.eup %8128  ;;  %v5736_v50 = vsel %vm5735_vm14, %v11909_v8, %v5734_v15  ;;  %v5741_v35 = vmul.f32 %v8127_v16, %v11926_v5  ;;  %vm5756_vm14 = vcmp.eq.f32.partialorder %v11981_v42, inf }
 0xf32   :  { %v5720_v12 = vmul.f32 %v8129_v43, %v11924_v51  ;;  %v8131_v46 = vpop.eup %8130  ;;  %v5739_v7 = vsel %vm5737_vm15, %v5738_v36, %v5736_v50  ;;  %vm5758_vm15 = vcmp.eq.f32.partialorder %v11981_v42, 0.0 }
 0xf33   :  { %v5743_v47 = vsel %vm5742_vm2, %v11926_v5, %v5741_v35  ;;  %v5727_v32 = vmul.f32 %v8131_v46, %v11964_v63  ;;  %v8133_v52 = vpop.eup %8132  ;;  %vm5751_vm2 = vcmp.eq.f32.partialorder %v11977_v30, 0.0 }
 0xf34   :  { %v5746_v26 = vsel %vm5744_vm3, %v5745_v14, %v5743_v47  ;;  %v5722_v23 = vsel %vm5721_vm5, %v11924_v51, %v5720_v12  ;;  %v8135_v59 = vpop.eup %8134  ;;  %v5762_v5 = vmul.f32 %v8133_v52, %v11971_v31 }
 0xf35   :  { %v7918_v11 = vpack.i.bf16 %v5746_v26, %v5739_v7  ;;  %v5729_v8 = vsel %vm5728_vm7, %v11964_v63, %v5727_v32  ;;  %v8137_v53 = vpop.eup %8136  ;;  %v5725_v27 = vsel %vm5723_vm6, %v5724_v39, %v5722_v23  ;;  %v5769_v24 = vmul.f32 %v8135_v59, %v11975_v6 }
 0xf36   :  { %v5732_v55 = vsel %vm5730_vm8, %v5731_v10, %v5729_v8  ;;  %v8139_v29 = vpop.eup %8138  ;;  %v5764_v25 = vsel %vm5763_vm9, %v11971_v31, %v5762_v5  ;;  %v5748_v40 = vmul.f32 %v8137_v53, %v11977_v30 }
 0xf37   :  { %7919 = vrot.lane.b32.xlu1 %v7918_v11, %s8278_s29  ;;  %v7923_v54 = vpack.i.bf16 %v5732_v55, %v5725_v27  ;;  %v5771_v57 = vsel %vm5770_vm11, %v11975_v6, %v5769_v24  ;;  %v5755_v51 = vmul.f32 %v8139_v29, %v11981_v42  ;;  %v5767_v63 = vsel %vm5765_vm10, %v5766_v37, %v5764_v25 }
 0xf38   :  { %v5774_v20 = vsel %vm5772_vm12, %v5773_v1, %v5771_v57  ;;  %v5750_v21 = vsel %vm5749_vm13, %v11977_v30, %v5748_v40  ;;  %v5752_v6 = vand.u32 2147483648, %v11977_v30 }
 0xf39   :  { %7924 = vrot.lane.b32.xlu0 %v7923_v54, %s8278_s29  ;;  %v7943_v33 = vpack.i.bf16 %v5774_v20, %v5767_v63  ;;  %v5757_v61 = vsel %vm5756_vm14, %v11981_v42, %v5755_v51 }
 0xf3a   :  { %v5760_v18 = vsel %vm5758_vm15, %v5759_v3, %v5757_v61  ;;  %v5753_v31 = vsel %vm5751_vm2, %v5752_v6, %v5750_v21 }
 0xf3b   :  { %7934 = vrot.lane.b32.xlu1 %v7933_v28, %s8276_s25  ;;  %v7938_v62 = vpack.i.bf16 %v5760_v18, %v5753_v31 }
 0xf3d   :  { %7929 = vrot.lane.b32.xlu0 %v7928_v48, %s8276_s25 }
 0xf3f   :  { %7944 = vrot.lane.b32.xlu1 %v7943_v33, %s8278_s29 }
 0xf41   :  { %7939 = vrot.lane.b32.xlu0 %v7938_v62, %s8278_s29 }
 0xf8d   :  { %v7890_v0 = vpop.permute.xlu1 %7889 }
 0xf8e   :  { %v7892_v15 = vunpack.i.h.bf16 %v7890_v0  ;;  %v7891_v36 = vunpack.i.l.bf16 %v7890_v0  ;;  %v7615_v0 = vpop.f32.mrf.mxu0 }
 0xf90   :  { %v7900_v22 = vpop.permute.xlu0 %7899  ;;  %v5873_v10 = vsel %vm128_vm0, %v11842_v56, %v7891_v36  ;;  %v5874_v46 = vsel %vm128_vm0, %v11867_v9, %v7892_v15 }
 0xf91   :  { %v7902_v42 = vunpack.i.h.bf16 %v7900_v22  ;;  %v7901_v16 = vunpack.i.l.bf16 %v7900_v22  ;;  %v5958_v22 = vpop.f32.mrf.mxu0 }
 0xf92   :  { %v7895_v44 = vpop.permute.xlu1 %7894 }
 0xf93   :  { %v7897_v30 = vunpack.i.h.bf16 %v7895_v44  ;;  %v7896_v43 = vunpack.i.l.bf16 %v7895_v44  ;;  %v5872_v47 = vsel %vm128_vm0, %v11882_v17, %v7902_v42  ;;  %v5871_v13 = vsel %vm128_vm0, %v11857_v49, %v7901_v16  ;;  %v7616_v44 = vpop.f32.mrf.mxu0 }
 0xf94   :  { %v7905_v19 = vpop.permute.xlu0 %7904 }
 0xf95   :  { %v7907_v35 = vunpack.i.h.bf16 %v7905_v19  ;;  %v7906_v39 = vunpack.i.l.bf16 %v7905_v19  ;;  %v5881_v4 = vsel %vm683_vm1, %v5873_v10, %v7896_v43  ;;  %v5882_v7 = vsel %vm683_vm1, %v5874_v46, %v7897_v30  ;;  %v5961_v19 = vpop.f32.mrf.mxu0  ;;  %v12357_v46 = vld [vmem:[#allocation3_spill] sm:$0xff] }
 0xf96   :  { %v7910_v60 = vpop.permute.xlu1 %7909 }
 0xf97   :  { %v5879_v52 = vsel %vm683_vm1, %v5871_v13, %v7906_v39  ;;  %v5880_v56 = vsel %vm683_vm1, %v5872_v47, %v7907_v35  ;;  %v7912_v17 = vunpack.i.h.bf16 %v7910_v60  ;;  %v7911_v59 = vunpack.i.l.bf16 %v7910_v60  ;;  %v6594_v60 = vld [vmem:[%s12160_s9 + $0x4] ss:$0 sm:$0xff]  ;;  %v7619_v15 = vpop.f32.mrf.mxu0  ;;  %v12356_v35 = vld [vmem:[#allocation4_spill] sm:$0xff] }
 0xf98   :  { %v7915_v14 = vpop.permute.xlu0 %7914  ;;  %v5967_v36 = vadd.f32 %v7615_v0, %v6594_v60  ;;  %v5959_v16 = vadd.f32 %v6594_v60, %v5958_v22  ;;  %v5962_v10 = vadd.f32 %v6594_v60, %v5961_v19 }
 0xf99   :  { %v7917_v8 = vunpack.i.h.bf16 %v7915_v14  ;;  %v7916_v5 = vunpack.i.l.bf16 %v7915_v14  ;;  %v5877_v57 = vsel %vm128_vm0, %v11893_v41, %v7911_v59  ;;  %v5878_v51 = vsel %vm128_vm0, %v11941_v58, %v7912_v17  ;;  %v5974_v30 = vpop.f32.mrf.mxu0 }
 0xf9b   :  { %v5876_v63 = vsel %vm128_vm0, %v11953_v38, %v7917_v8  ;;  %v5875_v20 = vsel %vm128_vm0, %v11902_v45, %v7916_v5  ;;  %v12360_v8 = vld [vmem:[#allocation5_spill] sm:$0xff] }
 0xfa9   :  { %v7920_v50 = vpop.permute.xlu1 %7919 }
 0xfaa   :  { %v7922_v34 = vunpack.i.h.bf16 %v7920_v50  ;;  %v7921_v12 = vunpack.i.l.bf16 %v7920_v50  ;;  %v5970_v50 = vadd.f32 %v7616_v44, %v6594_v60 }
 0xfab   :  { %v7925_v2 = vpop.permute.xlu0 %7924 }
 0xfac   :  { %v7927_v26 = vunpack.i.h.bf16 %v7925_v2  ;;  %v7926_v23 = vunpack.i.l.bf16 %v7925_v2  ;;  %v5890_v9 = vsel %vm1269_vm4, %v5882_v7, %v7922_v34  ;;  %v5889_v11 = vsel %vm1269_vm4, %v5881_v4, %v7921_v12  ;;  %v7620_v2 = vpop.f32.mrf.mxu0 }
 0xfad   :  { %v7935_v32 = vpop.permute.xlu1 %7934  ;;  %v5896_v27 = vpack.c.bf16 %v5890_v9, %v5889_v11  ;;  %v5983_v7 = vadd.f32 %v7619_v15, %v6594_v60  ;;  %v12359_v9 = vld [vmem:[#allocation8_spill] sm:$0xff]  ;;  %v5986_v59 = vadd.f32 %v7620_v2, %v6594_v60 }
 0xfae   :  { %v5887_v28 = vsel %vm1269_vm4, %v5879_v52, %v7926_v23  ;;  %v5888_v49 = vsel %vm1269_vm4, %v5880_v56, %v7927_v26  ;;  %v7937_v55 = vunpack.i.h.bf16 %v7935_v32  ;;  %v7936_v24 = vunpack.i.l.bf16 %v7935_v32  ;;  %v12358_v26 = vld [vmem:[#allocation14_spill] sm:$0xff] }
 0xfaf   :  { %v7930_v37 = vpop.permute.xlu0 %7929  ;;  %v5895_v53 = vpack.c.bf16 %v5888_v49, %v5887_v28  ;;  %v5975_v56 = vadd.f32 %v6594_v60, %v5974_v30  ;;  %v5977_v28 = vpop.f32.mrf.mxu0 }
 0xfb0   :  { %v7932_v54 = vunpack.i.h.bf16 %v7930_v37  ;;  %v7931_v25 = vunpack.i.l.bf16 %v7930_v37  ;;  %v5885_v3 = vsel %vm683_vm1, %v5877_v57, %v7936_v24  ;;  %v5886_v33 = vsel %vm683_vm1, %v5878_v51, %v7937_v55  ;;  %v12361_v55 = vld [vmem:[#allocation9_spill] sm:$0xff]  ;;  %v12363_v57 = vld [vmem:[#allocation7_spill] sm:$0xff] }
 0xfb1   :  { %v7945_v29 = vpop.permute.xlu1 %7944  ;;  %7637 = vmatprep.mubr.bf16.mxu1 %v5895_v53 }
 0xfb2   :  { %v7947_v1 = vunpack.i.h.bf16 %v7945_v29  ;;  %v7946_v40 = vunpack.i.l.bf16 %v7945_v29  ;;  %7638 = vmatmul.mubr.bf16.vlgmr.msra.gmra.mxu1 %v5896_v27  ;;  %v5884_v48 = vsel %vm683_vm1, %v5876_v63, %v7932_v54  ;;  %v5883_v41 = vsel %vm683_vm1, %v5875_v20, %v7931_v25  ;;  %v12362_v25 = vld [vmem:[#allocation2_spill] sm:$0xff] }
 0xfb3   :  { %v7940_v21 = vpop.permute.xlu0 %7939  ;;  %v5978_v27 = vadd.f32 %v6594_v60, %v5977_v28 }
 0xfb4   :  { %v7942_v6 = vunpack.i.h.bf16 %v7940_v21  ;;  %v7941_v61 = vunpack.i.l.bf16 %v7940_v21  ;;  %v5894_v18 = vsel %vm1269_vm4, %v5886_v33, %v7947_v1  ;;  %v5893_v58 = vsel %vm1269_vm4, %v5885_v3, %v7946_v40 }
 0xfb5   :  { %v5898_v62 = vpack.c.bf16 %v5894_v18, %v5893_v58 }
 0xfb6   :  { %v5891_v38 = vsel %vm1269_vm4, %v5883_v41, %v7941_v61  ;;  %v5892_v31 = vsel %vm1269_vm4, %v5884_v48, %v7942_v6 }
 0xfb7   :  { %v5897_v45 = vpack.c.bf16 %v5892_v31, %v5891_v38 }
 0xfb9   :  { %7641 = vmatprep.mubr.bf16.mxu1 %v5897_v45 }
 0xfba   :  { %7642 = vmatmul.mubr.bf16.gmra.mxu1 %v5898_v62 }
0x1072   :  { %v7639_v42 = vpop.f32.mrf.mxu1 }
0x1073   :  { %v6121_v14 = vadd.f32 %v7639_v42, %v5967_v36 }
0x1074   :  { %v6088_v43 = vpop.f32.mrf.mxu1 }
0x1075   :  { %v6129_v39 = vadd.f32 %v6121_v14, %v12356_v35  ;;  %v6119_v34 = vadd.f32 %v6088_v43, %v5959_v16 }
0x1076   :  { %v7640_v12 = vpop.f32.mrf.mxu1 }
0x1077   :  { %6137 = vst.msk [vmem:[%s12161_s10 + $0x10] sm:$0xff] %vm128_vm0, %v6129_v39  ;;  %v6127_v47 = vadd.f32 %v6119_v34, %v12357_v46  ;;  %v6122_v13 = vadd.f32 %v7640_v12, %v5970_v50 }
0x1078   :  { %v6091_v4 = vpop.f32.mrf.mxu1 }
0x1079   :  { %6135 = vst.msk [vmem:[%s12161_s10] sm:$0xff] %vm128_vm0, %v6127_v47  ;;  %v6130_v23 = vadd.f32 %v6122_v13, %v12358_v26  ;;  %v6120_v32 = vadd.f32 %v6091_v4, %v5962_v10 }
0x107a   :  { %v7643_v52 = vpop.f32.mrf.mxu1 }
0x107b   :  { %6138 = vst.msk [vmem:[%s12161_s10 + $0x18] sm:$0xff] %vm128_vm0, %v6130_v23  ;;  %v6128_v11 = vadd.f32 %v6120_v32, %v12359_v9  ;;  %v6125_v17 = vadd.f32 %v7643_v52, %v5983_v7 }
0x107c   :  { %v6104_v49 = vpop.f32.mrf.mxu1 }
0x107d   :  { %6136 = vst.msk [vmem:[%s12161_s10 + $0x8] sm:$0xff] %vm128_vm0, %v6128_v11  ;;  %v6133_v5 = vadd.f32 %v6125_v17, %v12360_v8  ;;  %v6123_v37 = vadd.f32 %v6104_v49, %v5975_v56 }
0x107e   :  { %v7644_v53 = vpop.f32.mrf.mxu1 }
0x107f   :  { %6141 = vst.msk [vmem:[%s12161_s10 + $0x30] sm:$0xff] %vm128_vm0, %v6133_v5  ;;  %v6131_v24 = vadd.f32 %v6123_v37, %v12361_v55  ;;  %v6126_v29 = vadd.f32 %v7644_v53, %v5986_v59 }
0x1080   :  { %v6107_v54 = vpop.f32.mrf.mxu1 }
0x1081   :  { %6139 = vst.msk [vmem:[%s12161_s10 + $0x20] sm:$0xff] %vm128_vm0, %v6131_v24  ;;  %v6134_v1 = vadd.f32 %v6126_v29, %v12362_v25  ;;  %v6124_v40 = vadd.f32 %v6107_v54, %v5978_v27 }
0x1083   :  { %6142 = vst.msk [vmem:[%s12161_s10 + $0x38] sm:$0xff] %vm128_vm0, %v6134_v1  ;;  %v6132_v51 = vadd.f32 %v6124_v40, %v12363_v57 }
0x1085   :  { %6140 = vst.msk [vmem:[%s12161_s10 + $0x28] sm:$0xff] %vm128_vm0, %v6132_v51 }

</bundles_post_ra>
